<compile_context>
chip_gen: v5e
topology: v5e:2x2
jax: 0.10.0
libtpu: 0.0.40
codegen_flags: <defaults>
</compile_context>

<pallas_src>
import jax
import jax.numpy as jnp
import numpy as np
from jax import lax
from jax.experimental import pallas as pl
from jax.experimental.pallas import tpu as pltpu

EPS = 1e-5


def _make_dense_block_kernel(L, k0, k, N, H, W):
    """Build the fused DenseBlock kernel (all shapes are static, closed over)."""
    C4 = 4 * k
    Ctot = k0 + L * k
    M = N * H * W
    inv_m = 1.0 / float(M)
    K9 = 9 * k

    def kernel(*refs):
        x_ref = refs[0]                       # (W, N, H, k0) input activations
        p_refs = refs[1:1 + 8 * L]            # 8 parameter refs per layer
        out_ref = refs[1 + 8 * L]             # (W, N, H, Ctot): concat buffer == output
        zpad_ref = refs[2 + 8 * L]            # (W+2, N, H+2, 9k): padded per-tap partials

        # Concat buffer in APPEND order [x0 | y0 | y1 | ...]: layer i reads the
        # lane-aligned prefix [0:cin] (offset 0 -> no per-layer lane rotate).
        out_ref[:, :, :, 0:k0] = x_ref[...]

        # Zero only the halo of the padded scratch, once (the interior is fully
        # rewritten every layer).
        zpad_ref[0:1, :, :, :] = jnp.zeros((1, N, H + 2, K9), jnp.float32)
        zpad_ref[W + 1:W + 2, :, :, :] = jnp.zeros((1, N, H + 2, K9), jnp.float32)
        zpad_ref[:, :, 0:1, :] = jnp.zeros((W + 2, N, 1, K9), jnp.float32)
        zpad_ref[:, :, H + 1:H + 2, :] = jnp.zeros((W + 2, N, 1, K9), jnp.float32)

        for i in range(L):
            g1, b1, w1, c1b, g2, b2, w2, c2b = p_refs[8 * i:8 * (i + 1)]
            cin = k0 + i * k

            # Rows of every (M, C) matrix below are ordered (w, n, h); H is a
            # multiple of 8 so this reshape is layout-preserving.
            x = out_ref[:, :, :, 0:cin].reshape(M, cin)

            # --- BatchNorm1 (training-mode batch stats) + ReLU, single pass.
            # var = E[x^2] - mean^2, clamped >= 0 (cancellation guard).
            s1 = jnp.sum(x, axis=0, keepdims=True)
            s2 = jnp.sum(x * x, axis=0, keepdims=True)
            m1 = s1 * inv_m
            v1 = jnp.maximum(s2 * inv_m - m1 * m1, 0.0)
            a1 = jnp.maximum(
                (x - m1) * (lax.rsqrt(v1 + EPS) * g1[...]) + b1[...], 0.0)

            # --- 1x1 conv == channel matmul on the MXU (f32 in, f32 acc).
            y1 = jnp.dot(a1, w1[...], preferred_element_type=jnp.float32) + c1b[...]

            # --- BatchNorm2 + ReLU (same one-pass stats).
            t1 = jnp.sum(y1, axis=0, keepdims=True)
            t2 = jnp.sum(y1 * y1, axis=0, keepdims=True)
            m2 = t1 * inv_m
            v2 = jnp.maximum(t2 * inv_m - m2 * m2, 0.0)
            a2 = jnp.maximum(
                (y1 - m2) * (lax.rsqrt(v2 + EPS) * g2[...]) + b2[...], 0.0)

            # --- 3x3 conv, padding=1, with NO im2col buffer:
            #       Z = a2 @ W_all,   W_all (C4, 9k), columns t*k:(t+1)*k hold
            #       tap (kh, kw) with t = 3*kh + kw;
            #       y2(w, h) = sum_t Z(w + kw - 1, h + kh - 1)[tap t].
            z = jnp.dot(a2, w2[...], preferred_element_type=jnp.float32)
            zpad_ref[1:W + 1, :, 1:H + 1, :] = z.reshape(W, N, H, K9)

            y2 = jnp.zeros((W, N, H, k), jnp.float32)
            for kh in range(3):
                # Sum the three kw taps first: these reads only slice the
                # leading (untiled) W axis, so they are relayout-free.
                r = (zpad_ref[0:W, :, :, (3 * kh + 0) * k:(3 * kh + 1) * k]
                     + zpad_ref[1:W + 1, :, :, (3 * kh + 1) * k:(3 * kh + 2) * k]
                     + zpad_ref[2:W + 2, :, :, (3 * kh + 2) * k:(3 * kh + 3) * k])
                # One sublane (H) shift per kh: 3 relayouts total instead of 9.
                y2 = y2 + r[:, :, kh:kh + H, :]
            y2 = y2 + c2b[...].reshape(1, 1, 1, k)

            # Append this layer's k new channels to the concat buffer/output.
            out_ref[:, :, :, cin:cin + k] = y2

    return kernel


def dense_block(x_nchw, params):
    """DenseBlock forward pass (PyTorch NCHW in / NCHW out, training-mode BN)."""
    N, k0, H, W = x_nchw.shape
    L = len(params)
    C4 = params[0]["w1"].shape[1]
    k = params[0]["w2"].shape[-1]
    assert C4 == 4 * k
    Ctot = k0 + L * k
    M = N * H * W

    # Channels on the 128-lane axis, W leading (cheap dx window slices), H on
    # the sublane axis (multiple of 8 -> layout-free (M, C) reshapes).
    x_wnhc = jnp.transpose(x_nchw, (3, 0, 2, 1)).astype(jnp.float32)

    # TODO(synk): for small-k configs at production scale, pad k / C4 / Ctot up
    # to 128-lane multiples (zero-padded weight columns) to avoid masked
    # partial stores; at real DenseNet widths (C4 >= 128) this is already met.
    flat = []
    for i, p in enumerate(params):
        cin = k0 + i * k
        # Kernel concat layout is APPEND order [x0, y0, ..., y_{i-1}] while
        # torch.cat((y, x), 1) PREPENDS.  Permute the per-input-channel params
        # once on the host so the kernel can read a lane-aligned prefix instead
        # of a shifting, unaligned tail slice.
        perm = np.empty((cin,), np.int32)
        perm[:k0] = i * k + np.arange(k0)
        for j in range(i):
            perm[k0 + j * k:k0 + (j + 1) * k] = (i - 1 - j) * k + np.arange(k)
        # 3x3 weights laid out as (C4, 9k): column block t = 3*kh + kw.
        w_all = p["w2"].reshape(9, C4, k).transpose(1, 0, 2).reshape(C4, 9 * k)
        flat += [
            p["bn1_g"][perm].reshape(1, cin).astype(jnp.float32),
            p["bn1_b"][perm].reshape(1, cin).astype(jnp.float32),
            p["w1"][perm, :].astype(jnp.float32),          # (cin, 4k)
            p["c1_b"].reshape(1, C4).astype(jnp.float32),
            p["bn2_g"].reshape(1, C4).astype(jnp.float32),
            p["bn2_b"].reshape(1, C4).astype(jnp.float32),
            w_all.astype(jnp.float32),                     # (C4, 9k)
            p["c2_b"].reshape(1, k).astype(jnp.float32),
        ]

    # Advisory cost estimate (two MXU matmuls per layer + elementwise).
    flops = 0
    for i in range(L):
        cin = k0 + i * k
        flops += 2 * M * C4 * (cin + 9 * k)            # the two MXU matmuls
        flops += 12 * M * (cin + C4) + 12 * M * k      # BN/ReLU/tap adds (rough)
    transcendentals = L * (Ctot + C4)                  # per-channel rsqrt (rough)
    bytes_accessed = 4 * (int(x_wnhc.size) + M * Ctot)
    bytes_accessed += sum(4 * int(a.size) for a in flat)

    # VMEM budget derived from the actual buffers (replaces the hard-coded
    # 32 MiB); with headroom, clipped so it also respects v7x's 64 MiB at
    # these shapes.
    zpad_bytes = 4 * (W + 2) * N * (H + 2) * 9 * k
    vmem_limit = int(np.clip(4 * (zpad_bytes + bytes_accessed),
                             16 * 2**20, 100 * 2**20))

    vmem = pl.BlockSpec(memory_space=pltpu.MemorySpace.VMEM)
    kernel = _make_dense_block_kernel(L, k0, k, N, H, W)

    # TODO(synk): for production DenseNet shapes, add a spatially tiled
    # "parallel" grid axis with a two-phase BatchNorm (global stats pass, then
    # normalize+conv) so both v7x TensorCores are used and the working set
    # stays under 64 MiB; for large L keep weights in HBM (pl.ANY) and
    # double-buffer the next layer's w1/w2 with pltpu.make_async_copy.
    out_slab = pl.pallas_call(
        kernel,
        out_shape=jax.ShapeDtypeStruct((W, N, H, Ctot), jnp.float32),
        in_specs=[vmem] * (1 + 8 * L),
        out_specs=vmem,
        scratch_shapes=[
            pltpu.VMEM((W + 2, N, H + 2, 9 * k), jnp.float32),  # padded Z taps
        ],
        compiler_params=pltpu.CompilerParams(vmem_limit_bytes=vmem_limit),
        cost_estimate=pl.CostEstimate(flops=int(flops),
                                      transcendentals=int(transcendentals),
                                      bytes_accessed=int(bytes_accessed)),
    )(x_wnhc, *flat)

    # (W, N, H, Ctot) append order -> NCHW in PyTorch's prepend order
    # [y_{L-1}, ..., y0, x0]; pure layout work, done once in the wrapper.
    nchw = jnp.transpose(out_slab, (1, 3, 2, 0))
    pieces = [nchw[:, k0 + j * k:k0 + (j + 1) * k] for j in range(L - 1, -1, -1)]
    pieces.append(nchw[:, 0:k0])
    return jnp.concatenate(pieces, axis=1)


# ------------------------- pure-JAX reference (NCHW) -------------------------
def _ref_bn(x, g, b):
    m = jnp.mean(x, axis=(0, 2, 3), keepdims=True)
    v = jnp.mean((x - m) ** 2, axis=(0, 2, 3), keepdims=True)
    return (x - m) * lax.rsqrt(v + EPS) * g.reshape(1, -1, 1, 1) + b.reshape(1, -1, 1, 1)


def _ref_h(x, p):
    a = jax.nn.relu(_ref_bn(x, p["bn1_g"], p["bn1_b"]))
    w1 = jnp.transpose(p["w1"])[:, :, None, None]           # (4k, Cin, 1, 1)
    y = lax.conv_general_dilated(a, w1, (1, 1), "VALID",
                                 dimension_numbers=("NCHW", "OIHW", "NCHW"),
                                 precision=lax.Precision.HIGHEST)
    y = y + p["c1_b"].reshape(1, -1, 1, 1)
    a2 = jax.nn.relu(_ref_bn(y, p["bn2_g"], p["bn2_b"]))
    w2 = jnp.transpose(p["w2"], (3, 2, 0, 1))                # HWIO -> OIHW
    y2 = lax.conv_general_dilated(a2, w2, (1, 1), ((1, 1), (1, 1)),
                                  dimension_numbers=("NCHW", "OIHW", "NCHW"),
                                  precision=lax.Precision.HIGHEST)
    return y2 + p["c2_b"].reshape(1, -1, 1, 1)


def ref_dense_block(x, params):
    for p in params:
        y = _ref_h(x, p)
        x = jnp.concatenate([y, x], axis=1)
    return x


# ------------------------------ param init ----------------------------------
def init_params(key, L, k0, k):
    params = []
    for i in range(L):
        cin = k0 + k * i
        c4 = 4 * k
        key, k1, k2, k3, k4 = jax.random.split(key, 5)
        params.append(dict(
            bn1_g=jnp.ones((cin,), jnp.float32),
            bn1_b=jnp.zeros((cin,), jnp.float32),
            w1=0.1 * jax.random.normal(k1, (cin, c4), jnp.float32),
            c1_b=0.1 * jax.random.normal(k2, (c4,), jnp.float32),
            bn2_g=jnp.ones((c4,), jnp.float32),
            bn2_b=jnp.zeros((c4,), jnp.float32),
            w2=0.1 * jax.random.normal(k3, (3, 3, c4, k), jnp.float32),
            c2_b=0.1 * jax.random.normal(k4, (k,), jnp.float32),
        ))
    return params


if __name__ == "__main__":
    L, k0, k = 3, 4, 4           # DenseBlock(L=3, k0=4, k=4)
    N, Hs, Ws = 2, 8, 8

    root = jax.random.PRNGKey(0)
    kx, kp = jax.random.split(root)
    x = jax.random.normal(kx, (N, k0, Hs, Ws), jnp.float32)   # NCHW input
    params = init_params(kp, L, k0, k)

    out = jax.block_until_ready(dense_block(x, params))

    expected_channels = k0 + L * k
    assert out.shape == (N, expected_channels, Hs, Ws), out.shape

    ref = jax.block_until_ready(ref_dense_block(x, params))
    # f32 MXU operands with f32 accumulation vs. the HIGHEST-precision
    # reference: tolerance tightened from 1e-1 per the correctness review.
    np.testing.assert_allclose(np.asarray(out), np.asarray(ref),
                               rtol=2e-2, atol=2e-2)

    print("KERNEL_OK")
</pallas_src>

<mosaic_0001>
module attributes {stable_mosaic.version = 11 : i64} {
  func.func @kernel(%arg0: memref<8x2x8x4xf32, #tpu.memory_space<vmem>>, %arg1: memref<1x4xf32, #tpu.memory_space<vmem>>, %arg2: memref<1x4xf32, #tpu.memory_space<vmem>>, %arg3: memref<4x16xf32, #tpu.memory_space<vmem>>, %arg4: memref<1x16xf32, #tpu.memory_space<vmem>>, %arg5: memref<1x16xf32, #tpu.memory_space<vmem>>, %arg6: memref<1x16xf32, #tpu.memory_space<vmem>>, %arg7: memref<16x36xf32, #tpu.memory_space<vmem>>, %arg8: memref<1x4xf32, #tpu.memory_space<vmem>>, %arg9: memref<1x8xf32, #tpu.memory_space<vmem>>, %arg10: memref<1x8xf32, #tpu.memory_space<vmem>>, %arg11: memref<8x16xf32, #tpu.memory_space<vmem>>, %arg12: memref<1x16xf32, #tpu.memory_space<vmem>>, %arg13: memref<1x16xf32, #tpu.memory_space<vmem>>, %arg14: memref<1x16xf32, #tpu.memory_space<vmem>>, %arg15: memref<16x36xf32, #tpu.memory_space<vmem>>, %arg16: memref<1x4xf32, #tpu.memory_space<vmem>>, %arg17: memref<1x12xf32, #tpu.memory_space<vmem>>, %arg18: memref<1x12xf32, #tpu.memory_space<vmem>>, %arg19: memref<12x16xf32, #tpu.memory_space<vmem>>, %arg20: memref<1x16xf32, #tpu.memory_space<vmem>>, %arg21: memref<1x16xf32, #tpu.memory_space<vmem>>, %arg22: memref<1x16xf32, #tpu.memory_space<vmem>>, %arg23: memref<16x36xf32, #tpu.memory_space<vmem>>, %arg24: memref<1x4xf32, #tpu.memory_space<vmem>>, %arg25: memref<8x2x8x16xf32, #tpu.memory_space<vmem>>, %arg26: memref<10x2x10x36xf32, #tpu.memory_space<vmem>>) attributes {dimension_semantics = [], scalar_prefetch = 0 : i64, scratch_operands = 1 : i64, tpu.core_type = #tpu.core_type<tc>} {
    %c0 = arith.constant 0 : index
    %c0_0 = arith.constant 0 : index
    %c0_1 = arith.constant 0 : index
    %c0_2 = arith.constant 0 : index
    %0 = vector.load %arg0[%c0, %c0_0, %c0_1, %c0_2] : memref<8x2x8x4xf32, #tpu.memory_space<vmem>>, vector<8x2x8x4xf32>
    %c0_3 = arith.constant 0 : index
    %c0_4 = arith.constant 0 : index
    %c0_5 = arith.constant 0 : index
    %c0_6 = arith.constant 0 : index
    %1 = vector.load %arg25[%c0_3, %c0_4, %c0_5, %c0_6] : memref<8x2x8x16xf32, #tpu.memory_space<vmem>>, vector<8x2x8x4xf32>
    tpu.vector_store %arg25[%c0_3, %c0_4, %c0_5, %c0_6], %0 {strides = array<i32>} : memref<8x2x8x16xf32, #tpu.memory_space<vmem>>, vector<8x2x8x4xf32>,
    %cst = arith.constant 0.000000e+00 : f32
    %2 = vector.broadcast %cst : f32 to vector<1x2x10x36xf32>
    %c0_7 = arith.constant 0 : index
    %c0_8 = arith.constant 0 : index
    %c0_9 = arith.constant 0 : index
    %c0_10 = arith.constant 0 : index
    %3 = vector.load %arg26[%c0_7, %c0_8, %c0_9, %c0_10] : memref<10x2x10x36xf32, #tpu.memory_space<vmem>>, vector<1x2x10x36xf32>
    tpu.vector_store %arg26[%c0_7, %c0_8, %c0_9, %c0_10], %2 {strides = array<i32>} : memref<10x2x10x36xf32, #tpu.memory_space<vmem>>, vector<1x2x10x36xf32>,
    %cst_11 = arith.constant 0.000000e+00 : f32
    %4 = vector.broadcast %cst_11 : f32 to vector<1x2x10x36xf32>
    %c9 = arith.constant 9 : index
    %c0_12 = arith.constant 0 : index
    %c0_13 = arith.constant 0 : index
    %c0_14 = arith.constant 0 : index
    %5 = vector.load %arg26[%c9, %c0_12, %c0_13, %c0_14] : memref<10x2x10x36xf32, #tpu.memory_space<vmem>>, vector<1x2x10x36xf32>
    tpu.vector_store %arg26[%c9, %c0_12, %c0_13, %c0_14], %4 {strides = array<i32>} : memref<10x2x10x36xf32, #tpu.memory_space<vmem>>, vector<1x2x10x36xf32>,
    %cst_15 = arith.constant 0.000000e+00 : f32
    %6 = vector.broadcast %cst_15 : f32 to vector<10x2x1x36xf32>
    %c0_16 = arith.constant 0 : index
    %c0_17 = arith.constant 0 : index
    %c0_18 = arith.constant 0 : index
    %c0_19 = arith.constant 0 : index
    %7 = vector.load %arg26[%c0_16, %c0_17, %c0_18, %c0_19] : memref<10x2x10x36xf32, #tpu.memory_space<vmem>>, vector<10x2x1x36xf32>
    tpu.vector_store %arg26[%c0_16, %c0_17, %c0_18, %c0_19], %6 {strides = array<i32>} : memref<10x2x10x36xf32, #tpu.memory_space<vmem>>, vector<10x2x1x36xf32>,
    %cst_20 = arith.constant 0.000000e+00 : f32
    %8 = vector.broadcast %cst_20 : f32 to vector<10x2x1x36xf32>
    %c0_21 = arith.constant 0 : index
    %c0_22 = arith.constant 0 : index
    %c9_23 = arith.constant 9 : index
    %c0_24 = arith.constant 0 : index
    %9 = vector.load %arg26[%c0_21, %c0_22, %c9_23, %c0_24] : memref<10x2x10x36xf32, #tpu.memory_space<vmem>>, vector<10x2x1x36xf32>
    tpu.vector_store %arg26[%c0_21, %c0_22, %c9_23, %c0_24], %8 {strides = array<i32>} : memref<10x2x10x36xf32, #tpu.memory_space<vmem>>, vector<10x2x1x36xf32>,
    %c0_25 = arith.constant 0 : index
    %c0_26 = arith.constant 0 : index
    %c0_27 = arith.constant 0 : index
    %c0_28 = arith.constant 0 : index
    %10 = vector.load %arg25[%c0_25, %c0_26, %c0_27, %c0_28] : memref<8x2x8x16xf32, #tpu.memory_space<vmem>>, vector<8x2x8x4xf32>
    %11 = vector.shape_cast %10 : vector<8x2x8x4xf32> to vector<128x4xf32>
    %cst_29 = arith.constant dense<0.000000e+00> : vector<4xf32>
    %12 = vector.multi_reduction <add>, %11, %cst_29 [0] : vector<128x4xf32> to vector<4xf32>
    %13 = vector.shape_cast %12 : vector<4xf32> to vector<1x4xf32>
    %14 = arith.mulf %11, %11 : vector<128x4xf32>
    %cst_30 = arith.constant dense<0.000000e+00> : vector<4xf32>
    %15 = vector.multi_reduction <add>, %14, %cst_30 [0] : vector<128x4xf32> to vector<4xf32>
    %16 = vector.shape_cast %15 : vector<4xf32> to vector<1x4xf32>
    %cst_31 = arith.constant 7.812500e-03 : f32
    %17 = vector.broadcast %cst_31 : f32 to vector<1x4xf32>
    %18 = arith.mulf %13, %17 : vector<1x4xf32>
    %cst_32 = arith.constant 7.812500e-03 : f32
    %19 = vector.broadcast %cst_32 : f32 to vector<1x4xf32>
    %20 = arith.mulf %16, %19 : vector<1x4xf32>
    %21 = arith.mulf %18, %18 : vector<1x4xf32>
    %22 = arith.subf %20, %21 : vector<1x4xf32>
    %cst_33 = arith.constant 0.000000e+00 : f32
    %23 = vector.broadcast %cst_33 : f32 to vector<1x4xf32>
    %24 = arith.maximumf %22, %23 : vector<1x4xf32>
    %25 = vector.broadcast %18 : vector<1x4xf32> to vector<128x4xf32>
    %26 = arith.subf %11, %25 : vector<128x4xf32>
    %cst_34 = arith.constant 9.99999974E-6 : f32
    %27 = vector.broadcast %cst_34 : f32 to vector<1x4xf32>
    %28 = arith.addf %24, %27 : vector<1x4xf32>
    %29 = math.rsqrt %28 : vector<1x4xf32>
    %c0_35 = arith.constant 0 : index
    %c0_36 = arith.constant 0 : index
    %30 = vector.load %arg1[%c0_35, %c0_36] : memref<1x4xf32, #tpu.memory_space<vmem>>, vector<1x4xf32>
    %31 = arith.mulf %29, %30 : vector<1x4xf32>
    %32 = vector.broadcast %31 : vector<1x4xf32> to vector<128x4xf32>
    %33 = arith.mulf %26, %32 : vector<128x4xf32>
    %c0_37 = arith.constant 0 : index
    %c0_38 = arith.constant 0 : index
    %34 = vector.load %arg2[%c0_37, %c0_38] : memref<1x4xf32, #tpu.memory_space<vmem>>, vector<1x4xf32>
    %35 = vector.broadcast %34 : vector<1x4xf32> to vector<128x4xf32>
    %36 = arith.addf %33, %35 : vector<128x4xf32>
    %cst_39 = arith.constant 0.000000e+00 : f32
    %37 = vector.broadcast %cst_39 : f32 to vector<128x4xf32>
    %38 = arith.maximumf %36, %37 : vector<128x4xf32>
    %c0_40 = arith.constant 0 : index
    %c0_41 = arith.constant 0 : index
    %39 = vector.load %arg3[%c0_40, %c0_41] : memref<4x16xf32, #tpu.memory_space<vmem>>, vector<4x16xf32>
    %cst_42 = arith.constant dense<0.000000e+00> : vector<128x16xf32>
    %40 = tpu.matmul %38, %39, %cst_42 {dimension_numbers = #tpu.dot_dimension_numbers<[1], [0], [0], [1], [0, 0, 1, 1], [], []>} : vector<128x4xf32>, vector<4x16xf32>, vector<128x16xf32> -> vector<128x16xf32>
    %c0_43 = arith.constant 0 : index
    %c0_44 = arith.constant 0 : index
    %41 = vector.load %arg4[%c0_43, %c0_44] : memref<1x16xf32, #tpu.memory_space<vmem>>, vector<1x16xf32>
    %42 = vector.broadcast %41 : vector<1x16xf32> to vector<128x16xf32>
    %43 = arith.addf %40, %42 : vector<128x16xf32>
    %cst_45 = arith.constant dense<0.000000e+00> : vector<16xf32>
    %44 = vector.multi_reduction <add>, %43, %cst_45 [0] : vector<128x16xf32> to vector<16xf32>
    %45 = vector.shape_cast %44 : vector<16xf32> to vector<1x16xf32>
    %46 = arith.mulf %43, %43 : vector<128x16xf32>
    %cst_46 = arith.constant dense<0.000000e+00> : vector<16xf32>
    %47 = vector.multi_reduction <add>, %46, %cst_46 [0] : vector<128x16xf32> to vector<16xf32>
    %48 = vector.shape_cast %47 : vector<16xf32> to vector<1x16xf32>
    %cst_47 = arith.constant 7.812500e-03 : f32
    %49 = vector.broadcast %cst_47 : f32 to vector<1x16xf32>
    %50 = arith.mulf %45, %49 : vector<1x16xf32>
    %cst_48 = arith.constant 7.812500e-03 : f32
    %51 = vector.broadcast %cst_48 : f32 to vector<1x16xf32>
    %52 = arith.mulf %48, %51 : vector<1x16xf32>
    %53 = arith.mulf %50, %50 : vector<1x16xf32>
    %54 = arith.subf %52, %53 : vector<1x16xf32>
    %cst_49 = arith.constant 0.000000e+00 : f32
    %55 = vector.broadcast %cst_49 : f32 to vector<1x16xf32>
    %56 = arith.maximumf %54, %55 : vector<1x16xf32>
    %57 = vector.broadcast %50 : vector<1x16xf32> to vector<128x16xf32>
    %58 = arith.subf %43, %57 : vector<128x16xf32>
    %cst_50 = arith.constant 9.99999974E-6 : f32
    %59 = vector.broadcast %cst_50 : f32 to vector<1x16xf32>
    %60 = arith.addf %56, %59 : vector<1x16xf32>
    %61 = math.rsqrt %60 : vector<1x16xf32>
    %c0_51 = arith.constant 0 : index
    %c0_52 = arith.constant 0 : index
    %62 = vector.load %arg5[%c0_51, %c0_52] : memref<1x16xf32, #tpu.memory_space<vmem>>, vector<1x16xf32>
    %63 = arith.mulf %61, %62 : vector<1x16xf32>
    %64 = vector.broadcast %63 : vector<1x16xf32> to vector<128x16xf32>
    %65 = arith.mulf %58, %64 : vector<128x16xf32>
    %c0_53 = arith.constant 0 : index
    %c0_54 = arith.constant 0 : index
    %66 = vector.load %arg6[%c0_53, %c0_54] : memref<1x16xf32, #tpu.memory_space<vmem>>, vector<1x16xf32>
    %67 = vector.broadcast %66 : vector<1x16xf32> to vector<128x16xf32>
    %68 = arith.addf %65, %67 : vector<128x16xf32>
    %cst_55 = arith.constant 0.000000e+00 : f32
    %69 = vector.broadcast %cst_55 : f32 to vector<128x16xf32>
    %70 = arith.maximumf %68, %69 : vector<128x16xf32>
    %c0_56 = arith.constant 0 : index
    %c0_57 = arith.constant 0 : index
    %71 = vector.load %arg7[%c0_56, %c0_57] : memref<16x36xf32, #tpu.memory_space<vmem>>, vector<16x36xf32>
    %cst_58 = arith.constant dense<0.000000e+00> : vector<128x36xf32>
    %72 = tpu.matmul %70, %71, %cst_58 {dimension_numbers = #tpu.dot_dimension_numbers<[1], [0], [0], [1], [0, 0, 1, 1], [], []>} : vector<128x16xf32>, vector<16x36xf32>, vector<128x36xf32> -> vector<128x36xf32>
    %73 = vector.shape_cast %72 : vector<128x36xf32> to vector<8x2x8x36xf32>
    %c1 = arith.constant 1 : index
    %c0_59 = arith.constant 0 : index
    %c1_60 = arith.constant 1 : index
    %c0_61 = arith.constant 0 : index
    %74 = vector.load %arg26[%c1, %c0_59, %c1_60, %c0_61] : memref<10x2x10x36xf32, #tpu.memory_space<vmem>>, vector<8x2x8x36xf32>
    tpu.vector_store %arg26[%c1, %c0_59, %c1_60, %c0_61], %73 {strides = array<i32>} : memref<10x2x10x36xf32, #tpu.memory_space<vmem>>, vector<8x2x8x36xf32>,
    %cst_62 = arith.constant 0.000000e+00 : f32
    %75 = vector.broadcast %cst_62 : f32 to vector<8x2x8x4xf32>
    %c0_63 = arith.constant 0 : index
    %c0_64 = arith.constant 0 : index
    %c0_65 = arith.constant 0 : index
    %c0_66 = arith.constant 0 : index
    %76 = vector.load %arg26[%c0_63, %c0_64, %c0_65, %c0_66] : memref<10x2x10x36xf32, #tpu.memory_space<vmem>>, vector<8x2x10x4xf32>
    %c1_67 = arith.constant 1 : index
    %c0_68 = arith.constant 0 : index
    %c0_69 = arith.constant 0 : index
    %c4 = arith.constant 4 : index
    %77 = vector.load %arg26[%c1_67, %c0_68, %c0_69, %c4] : memref<10x2x10x36xf32, #tpu.memory_space<vmem>>, vector<8x2x10x4xf32>
    %78 = arith.addf %76, %77 : vector<8x2x10x4xf32>
    %c2 = arith.constant 2 : index
    %c0_70 = arith.constant 0 : index
    %c0_71 = arith.constant 0 : index
    %c8 = arith.constant 8 : index
    %79 = vector.load %arg26[%c2, %c0_70, %c0_71, %c8] : memref<10x2x10x36xf32, #tpu.memory_space<vmem>>, vector<8x2x10x4xf32>
    %80 = arith.addf %78, %79 : vector<8x2x10x4xf32>
    %81 = vector.extract_strided_slice %80 {offsets = [0, 0, 0, 0], sizes = [8, 2, 8, 4], strides = [1, 1, 1, 1]} : vector<8x2x10x4xf32> to vector<8x2x8x4xf32>
    %82 = arith.addf %75, %81 : vector<8x2x8x4xf32>
    %c0_72 = arith.constant 0 : index
    %c0_73 = arith.constant 0 : index
    %c0_74 = arith.constant 0 : index
    %c12 = arith.constant 12 : index
    %83 = vector.load %arg26[%c0_72, %c0_73, %c0_74, %c12] : memref<10x2x10x36xf32, #tpu.memory_space<vmem>>, vector<8x2x10x4xf32>
    %c1_75 = arith.constant 1 : index
    %c0_76 = arith.constant 0 : index
    %c0_77 = arith.constant 0 : index
    %c16 = arith.constant 16 : index
    %84 = vector.load %arg26[%c1_75, %c0_76, %c0_77, %c16] : memref<10x2x10x36xf32, #tpu.memory_space<vmem>>, vector<8x2x10x4xf32>
    %85 = arith.addf %83, %84 : vector<8x2x10x4xf32>
    %c2_78 = arith.constant 2 : index
    %c0_79 = arith.constant 0 : index
    %c0_80 = arith.constant 0 : index
    %c20 = arith.constant 20 : index
    %86 = vector.load %arg26[%c2_78, %c0_79, %c0_80, %c20] : memref<10x2x10x36xf32, #tpu.memory_space<vmem>>, vector<8x2x10x4xf32>
    %87 = arith.addf %85, %86 : vector<8x2x10x4xf32>
    %88 = vector.extract_strided_slice %87 {offsets = [0, 0, 1, 0], sizes = [8, 2, 8, 4], strides = [1, 1, 1, 1]} : vector<8x2x10x4xf32> to vector<8x2x8x4xf32>
    %89 = arith.addf %82, %88 : vector<8x2x8x4xf32>
    %c0_81 = arith.constant 0 : index
    %c0_82 = arith.constant 0 : index
    %c0_83 = arith.constant 0 : index
    %c24 = arith.constant 24 : index
    %90 = vector.load %arg26[%c0_81, %c0_82, %c0_83, %c24] : memref<10x2x10x36xf32, #tpu.memory_space<vmem>>, vector<8x2x10x4xf32>
    %c1_84 = arith.constant 1 : index
    %c0_85 = arith.constant 0 : index
    %c0_86 = arith.constant 0 : index
    %c28 = arith.constant 28 : index
    %91 = vector.load %arg26[%c1_84, %c0_85, %c0_86, %c28] : memref<10x2x10x36xf32, #tpu.memory_space<vmem>>, vector<8x2x10x4xf32>
    %92 = arith.addf %90, %91 : vector<8x2x10x4xf32>
    %c2_87 = arith.constant 2 : index
    %c0_88 = arith.constant 0 : index
    %c0_89 = arith.constant 0 : index
    %c32 = arith.constant 32 : index
    %93 = vector.load %arg26[%c2_87, %c0_88, %c0_89, %c32] : memref<10x2x10x36xf32, #tpu.memory_space<vmem>>, vector<8x2x10x4xf32>
    %94 = arith.addf %92, %93 : vector<8x2x10x4xf32>
    %95 = vector.extract_strided_slice %94 {offsets = [0, 0, 2, 0], sizes = [8, 2, 8, 4], strides = [1, 1, 1, 1]} : vector<8x2x10x4xf32> to vector<8x2x8x4xf32>
    %96 = arith.addf %89, %95 : vector<8x2x8x4xf32>
    %c0_90 = arith.constant 0 : index
    %c0_91 = arith.constant 0 : index
    %97 = vector.load %arg8[%c0_90, %c0_91] : memref<1x4xf32, #tpu.memory_space<vmem>>, vector<1x4xf32>
    %98 = vector.shape_cast %97 : vector<1x4xf32> to vector<1x1x1x4xf32>
    %99 = vector.broadcast %98 : vector<1x1x1x4xf32> to vector<8x2x8x4xf32>
    %100 = arith.addf %96, %99 : vector<8x2x8x4xf32>
    %c0_92 = arith.constant 0 : index
    %c0_93 = arith.constant 0 : index
    %c0_94 = arith.constant 0 : index
    %c4_95 = arith.constant 4 : index
    %101 = vector.load %arg25[%c0_92, %c0_93, %c0_94, %c4_95] : memref<8x2x8x16xf32, #tpu.memory_space<vmem>>, vector<8x2x8x4xf32>
    tpu.vector_store %arg25[%c0_92, %c0_93, %c0_94, %c4_95], %100 {strides = array<i32>} : memref<8x2x8x16xf32, #tpu.memory_space<vmem>>, vector<8x2x8x4xf32>,
    %c0_96 = arith.constant 0 : index
    %c0_97 = arith.constant 0 : index
    %c0_98 = arith.constant 0 : index
    %c0_99 = arith.constant 0 : index
    %102 = vector.load %arg25[%c0_96, %c0_97, %c0_98, %c0_99] : memref<8x2x8x16xf32, #tpu.memory_space<vmem>>, vector<8x2x8x8xf32>
    %103 = vector.shape_cast %102 : vector<8x2x8x8xf32> to vector<128x8xf32>
    %cst_100 = arith.constant dense<0.000000e+00> : vector<8xf32>
    %104 = vector.multi_reduction <add>, %103, %cst_100 [0] : vector<128x8xf32> to vector<8xf32>
    %105 = vector.shape_cast %104 : vector<8xf32> to vector<1x8xf32>
    %106 = arith.mulf %103, %103 : vector<128x8xf32>
    %cst_101 = arith.constant dense<0.000000e+00> : vector<8xf32>
    %107 = vector.multi_reduction <add>, %106, %cst_101 [0] : vector<128x8xf32> to vector<8xf32>
    %108 = vector.shape_cast %107 : vector<8xf32> to vector<1x8xf32>
    %cst_102 = arith.constant 7.812500e-03 : f32
    %109 = vector.broadcast %cst_102 : f32 to vector<1x8xf32>
    %110 = arith.mulf %105, %109 : vector<1x8xf32>
    %cst_103 = arith.constant 7.812500e-03 : f32
    %111 = vector.broadcast %cst_103 : f32 to vector<1x8xf32>
    %112 = arith.mulf %108, %111 : vector<1x8xf32>
    %113 = arith.mulf %110, %110 : vector<1x8xf32>
    %114 = arith.subf %112, %113 : vector<1x8xf32>
    %cst_104 = arith.constant 0.000000e+00 : f32
    %115 = vector.broadcast %cst_104 : f32 to vector<1x8xf32>
    %116 = arith.maximumf %114, %115 : vector<1x8xf32>
    %117 = vector.broadcast %110 : vector<1x8xf32> to vector<128x8xf32>
    %118 = arith.subf %103, %117 : vector<128x8xf32>
    %cst_105 = arith.constant 9.99999974E-6 : f32
    %119 = vector.broadcast %cst_105 : f32 to vector<1x8xf32>
    %120 = arith.addf %116, %119 : vector<1x8xf32>
    %121 = math.rsqrt %120 : vector<1x8xf32>
    %c0_106 = arith.constant 0 : index
    %c0_107 = arith.constant 0 : index
    %122 = vector.load %arg9[%c0_106, %c0_107] : memref<1x8xf32, #tpu.memory_space<vmem>>, vector<1x8xf32>
    %123 = arith.mulf %121, %122 : vector<1x8xf32>
    %124 = vector.broadcast %123 : vector<1x8xf32> to vector<128x8xf32>
    %125 = arith.mulf %118, %124 : vector<128x8xf32>
    %c0_108 = arith.constant 0 : index
    %c0_109 = arith.constant 0 : index
    %126 = vector.load %arg10[%c0_108, %c0_109] : memref<1x8xf32, #tpu.memory_space<vmem>>, vector<1x8xf32>
    %127 = vector.broadcast %126 : vector<1x8xf32> to vector<128x8xf32>
    %128 = arith.addf %125, %127 : vector<128x8xf32>
    %cst_110 = arith.constant 0.000000e+00 : f32
    %129 = vector.broadcast %cst_110 : f32 to vector<128x8xf32>
    %130 = arith.maximumf %128, %129 : vector<128x8xf32>
    %c0_111 = arith.constant 0 : index
    %c0_112 = arith.constant 0 : index
    %131 = vector.load %arg11[%c0_111, %c0_112] : memref<8x16xf32, #tpu.memory_space<vmem>>, vector<8x16xf32>
    %cst_113 = arith.constant dense<0.000000e+00> : vector<128x16xf32>
    %132 = tpu.matmul %130, %131, %cst_113 {dimension_numbers = #tpu.dot_dimension_numbers<[1], [0], [0], [1], [0, 0, 1, 1], [], []>} : vector<128x8xf32>, vector<8x16xf32>, vector<128x16xf32> -> vector<128x16xf32>
    %c0_114 = arith.constant 0 : index
    %c0_115 = arith.constant 0 : index
    %133 = vector.load %arg12[%c0_114, %c0_115] : memref<1x16xf32, #tpu.memory_space<vmem>>, vector<1x16xf32>
    %134 = vector.broadcast %133 : vector<1x16xf32> to vector<128x16xf32>
    %135 = arith.addf %132, %134 : vector<128x16xf32>
    %cst_116 = arith.constant dense<0.000000e+00> : vector<16xf32>
    %136 = vector.multi_reduction <add>, %135, %cst_116 [0] : vector<128x16xf32> to vector<16xf32>
    %137 = vector.shape_cast %136 : vector<16xf32> to vector<1x16xf32>
    %138 = arith.mulf %135, %135 : vector<128x16xf32>
    %cst_117 = arith.constant dense<0.000000e+00> : vector<16xf32>
    %139 = vector.multi_reduction <add>, %138, %cst_117 [0] : vector<128x16xf32> to vector<16xf32>
    %140 = vector.shape_cast %139 : vector<16xf32> to vector<1x16xf32>
    %cst_118 = arith.constant 7.812500e-03 : f32
    %141 = vector.broadcast %cst_118 : f32 to vector<1x16xf32>
    %142 = arith.mulf %137, %141 : vector<1x16xf32>
    %cst_119 = arith.constant 7.812500e-03 : f32
    %143 = vector.broadcast %cst_119 : f32 to vector<1x16xf32>
    %144 = arith.mulf %140, %143 : vector<1x16xf32>
    %145 = arith.mulf %142, %142 : vector<1x16xf32>
    %146 = arith.subf %144, %145 : vector<1x16xf32>
    %cst_120 = arith.constant 0.000000e+00 : f32
    %147 = vector.broadcast %cst_120 : f32 to vector<1x16xf32>
    %148 = arith.maximumf %146, %147 : vector<1x16xf32>
    %149 = vector.broadcast %142 : vector<1x16xf32> to vector<128x16xf32>
    %150 = arith.subf %135, %149 : vector<128x16xf32>
    %cst_121 = arith.constant 9.99999974E-6 : f32
    %151 = vector.broadcast %cst_121 : f32 to vector<1x16xf32>
    %152 = arith.addf %148, %151 : vector<1x16xf32>
    %153 = math.rsqrt %152 : vector<1x16xf32>
    %c0_122 = arith.constant 0 : index
    %c0_123 = arith.constant 0 : index
    %154 = vector.load %arg13[%c0_122, %c0_123] : memref<1x16xf32, #tpu.memory_space<vmem>>, vector<1x16xf32>
    %155 = arith.mulf %153, %154 : vector<1x16xf32>
    %156 = vector.broadcast %155 : vector<1x16xf32> to vector<128x16xf32>
    %157 = arith.mulf %150, %156 : vector<128x16xf32>
    %c0_124 = arith.constant 0 : index
    %c0_125 = arith.constant 0 : index
    %158 = vector.load %arg14[%c0_124, %c0_125] : memref<1x16xf32, #tpu.memory_space<vmem>>, vector<1x16xf32>
    %159 = vector.broadcast %158 : vector<1x16xf32> to vector<128x16xf32>
    %160 = arith.addf %157, %159 : vector<128x16xf32>
    %cst_126 = arith.constant 0.000000e+00 : f32
    %161 = vector.broadcast %cst_126 : f32 to vector<128x16xf32>
    %162 = arith.maximumf %160, %161 : vector<128x16xf32>
    %c0_127 = arith.constant 0 : index
    %c0_128 = arith.constant 0 : index
    %163 = vector.load %arg15[%c0_127, %c0_128] : memref<16x36xf32, #tpu.memory_space<vmem>>, vector<16x36xf32>
    %cst_129 = arith.constant dense<0.000000e+00> : vector<128x36xf32>
    %164 = tpu.matmul %162, %163, %cst_129 {dimension_numbers = #tpu.dot_dimension_numbers<[1], [0], [0], [1], [0, 0, 1, 1], [], []>} : vector<128x16xf32>, vector<16x36xf32>, vector<128x36xf32> -> vector<128x36xf32>
    %165 = vector.shape_cast %164 : vector<128x36xf32> to vector<8x2x8x36xf32>
    %c1_130 = arith.constant 1 : index
    %c0_131 = arith.constant 0 : index
    %c1_132 = arith.constant 1 : index
    %c0_133 = arith.constant 0 : index
    %166 = vector.load %arg26[%c1_130, %c0_131, %c1_132, %c0_133] : memref<10x2x10x36xf32, #tpu.memory_space<vmem>>, vector<8x2x8x36xf32>
    tpu.vector_store %arg26[%c1_130, %c0_131, %c1_132, %c0_133], %165 {strides = array<i32>} : memref<10x2x10x36xf32, #tpu.memory_space<vmem>>, vector<8x2x8x36xf32>,
    %cst_134 = arith.constant 0.000000e+00 : f32
    %167 = vector.broadcast %cst_134 : f32 to vector<8x2x8x4xf32>
    %c0_135 = arith.constant 0 : index
    %c0_136 = arith.constant 0 : index
    %c0_137 = arith.constant 0 : index
    %c0_138 = arith.constant 0 : index
    %168 = vector.load %arg26[%c0_135, %c0_136, %c0_137, %c0_138] : memref<10x2x10x36xf32, #tpu.memory_space<vmem>>, vector<8x2x10x4xf32>
    %c1_139 = arith.constant 1 : index
    %c0_140 = arith.constant 0 : index
    %c0_141 = arith.constant 0 : index
    %c4_142 = arith.constant 4 : index
    %169 = vector.load %arg26[%c1_139, %c0_140, %c0_141, %c4_142] : memref<10x2x10x36xf32, #tpu.memory_space<vmem>>, vector<8x2x10x4xf32>
    %170 = arith.addf %168, %169 : vector<8x2x10x4xf32>
    %c2_143 = arith.constant 2 : index
    %c0_144 = arith.constant 0 : index
    %c0_145 = arith.constant 0 : index
    %c8_146 = arith.constant 8 : index
    %171 = vector.load %arg26[%c2_143, %c0_144, %c0_145, %c8_146] : memref<10x2x10x36xf32, #tpu.memory_space<vmem>>, vector<8x2x10x4xf32>
    %172 = arith.addf %170, %171 : vector<8x2x10x4xf32>
    %173 = vector.extract_strided_slice %172 {offsets = [0, 0, 0, 0], sizes = [8, 2, 8, 4], strides = [1, 1, 1, 1]} : vector<8x2x10x4xf32> to vector<8x2x8x4xf32>
    %174 = arith.addf %167, %173 : vector<8x2x8x4xf32>
    %c0_147 = arith.constant 0 : index
    %c0_148 = arith.constant 0 : index
    %c0_149 = arith.constant 0 : index
    %c12_150 = arith.constant 12 : index
    %175 = vector.load %arg26[%c0_147, %c0_148, %c0_149, %c12_150] : memref<10x2x10x36xf32, #tpu.memory_space<vmem>>, vector<8x2x10x4xf32>
    %c1_151 = arith.constant 1 : index
    %c0_152 = arith.constant 0 : index
    %c0_153 = arith.constant 0 : index
    %c16_154 = arith.constant 16 : index
    %176 = vector.load %arg26[%c1_151, %c0_152, %c0_153, %c16_154] : memref<10x2x10x36xf32, #tpu.memory_space<vmem>>, vector<8x2x10x4xf32>
    %177 = arith.addf %175, %176 : vector<8x2x10x4xf32>
    %c2_155 = arith.constant 2 : index
    %c0_156 = arith.constant 0 : index
    %c0_157 = arith.constant 0 : index
    %c20_158 = arith.constant 20 : index
    %178 = vector.load %arg26[%c2_155, %c0_156, %c0_157, %c20_158] : memref<10x2x10x36xf32, #tpu.memory_space<vmem>>, vector<8x2x10x4xf32>
    %179 = arith.addf %177, %178 : vector<8x2x10x4xf32>
    %180 = vector.extract_strided_slice %179 {offsets = [0, 0, 1, 0], sizes = [8, 2, 8, 4], strides = [1, 1, 1, 1]} : vector<8x2x10x4xf32> to vector<8x2x8x4xf32>
    %181 = arith.addf %174, %180 : vector<8x2x8x4xf32>
    %c0_159 = arith.constant 0 : index
    %c0_160 = arith.constant 0 : index
    %c0_161 = arith.constant 0 : index
    %c24_162 = arith.constant 24 : index
    %182 = vector.load %arg26[%c0_159, %c0_160, %c0_161, %c24_162] : memref<10x2x10x36xf32, #tpu.memory_space<vmem>>, vector<8x2x10x4xf32>
    %c1_163 = arith.constant 1 : index
    %c0_164 = arith.constant 0 : index
    %c0_165 = arith.constant 0 : index
    %c28_166 = arith.constant 28 : index
    %183 = vector.load %arg26[%c1_163, %c0_164, %c0_165, %c28_166] : memref<10x2x10x36xf32, #tpu.memory_space<vmem>>, vector<8x2x10x4xf32>
    %184 = arith.addf %182, %183 : vector<8x2x10x4xf32>
    %c2_167 = arith.constant 2 : index
    %c0_168 = arith.constant 0 : index
    %c0_169 = arith.constant 0 : index
    %c32_170 = arith.constant 32 : index
    %185 = vector.load %arg26[%c2_167, %c0_168, %c0_169, %c32_170] : memref<10x2x10x36xf32, #tpu.memory_space<vmem>>, vector<8x2x10x4xf32>
    %186 = arith.addf %184, %185 : vector<8x2x10x4xf32>
    %187 = vector.extract_strided_slice %186 {offsets = [0, 0, 2, 0], sizes = [8, 2, 8, 4], strides = [1, 1, 1, 1]} : vector<8x2x10x4xf32> to vector<8x2x8x4xf32>
    %188 = arith.addf %181, %187 : vector<8x2x8x4xf32>
    %c0_171 = arith.constant 0 : index
    %c0_172 = arith.constant 0 : index
    %189 = vector.load %arg16[%c0_171, %c0_172] : memref<1x4xf32, #tpu.memory_space<vmem>>, vector<1x4xf32>
    %190 = vector.shape_cast %189 : vector<1x4xf32> to vector<1x1x1x4xf32>
    %191 = vector.broadcast %190 : vector<1x1x1x4xf32> to vector<8x2x8x4xf32>
    %192 = arith.addf %188, %191 : vector<8x2x8x4xf32>
    %c0_173 = arith.constant 0 : index
    %c0_174 = arith.constant 0 : index
    %c0_175 = arith.constant 0 : index
    %c8_176 = arith.constant 8 : index
    %193 = vector.load %arg25[%c0_173, %c0_174, %c0_175, %c8_176] : memref<8x2x8x16xf32, #tpu.memory_space<vmem>>, vector<8x2x8x4xf32>
    tpu.vector_store %arg25[%c0_173, %c0_174, %c0_175, %c8_176], %192 {strides = array<i32>} : memref<8x2x8x16xf32, #tpu.memory_space<vmem>>, vector<8x2x8x4xf32>,
    %c0_177 = arith.constant 0 : index
    %c0_178 = arith.constant 0 : index
    %c0_179 = arith.constant 0 : index
    %c0_180 = arith.constant 0 : index
    %194 = vector.load %arg25[%c0_177, %c0_178, %c0_179, %c0_180] : memref<8x2x8x16xf32, #tpu.memory_space<vmem>>, vector<8x2x8x12xf32>
    %195 = vector.shape_cast %194 : vector<8x2x8x12xf32> to vector<128x12xf32>
    %cst_181 = arith.constant dense<0.000000e+00> : vector<12xf32>
    %196 = vector.multi_reduction <add>, %195, %cst_181 [0] : vector<128x12xf32> to vector<12xf32>
    %197 = vector.shape_cast %196 : vector<12xf32> to vector<1x12xf32>
    %198 = arith.mulf %195, %195 : vector<128x12xf32>
    %cst_182 = arith.constant dense<0.000000e+00> : vector<12xf32>
    %199 = vector.multi_reduction <add>, %198, %cst_182 [0] : vector<128x12xf32> to vector<12xf32>
    %200 = vector.shape_cast %199 : vector<12xf32> to vector<1x12xf32>
    %cst_183 = arith.constant 7.812500e-03 : f32
    %201 = vector.broadcast %cst_183 : f32 to vector<1x12xf32>
    %202 = arith.mulf %197, %201 : vector<1x12xf32>
    %cst_184 = arith.constant 7.812500e-03 : f32
    %203 = vector.broadcast %cst_184 : f32 to vector<1x12xf32>
    %204 = arith.mulf %200, %203 : vector<1x12xf32>
    %205 = arith.mulf %202, %202 : vector<1x12xf32>
    %206 = arith.subf %204, %205 : vector<1x12xf32>
    %cst_185 = arith.constant 0.000000e+00 : f32
    %207 = vector.broadcast %cst_185 : f32 to vector<1x12xf32>
    %208 = arith.maximumf %206, %207 : vector<1x12xf32>
    %209 = vector.broadcast %202 : vector<1x12xf32> to vector<128x12xf32>
    %210 = arith.subf %195, %209 : vector<128x12xf32>
    %cst_186 = arith.constant 9.99999974E-6 : f32
    %211 = vector.broadcast %cst_186 : f32 to vector<1x12xf32>
    %212 = arith.addf %208, %211 : vector<1x12xf32>
    %213 = math.rsqrt %212 : vector<1x12xf32>
    %c0_187 = arith.constant 0 : index
    %c0_188 = arith.constant 0 : index
    %214 = vector.load %arg17[%c0_187, %c0_188] : memref<1x12xf32, #tpu.memory_space<vmem>>, vector<1x12xf32>
    %215 = arith.mulf %213, %214 : vector<1x12xf32>
    %216 = vector.broadcast %215 : vector<1x12xf32> to vector<128x12xf32>
    %217 = arith.mulf %210, %216 : vector<128x12xf32>
    %c0_189 = arith.constant 0 : index
    %c0_190 = arith.constant 0 : index
    %218 = vector.load %arg18[%c0_189, %c0_190] : memref<1x12xf32, #tpu.memory_space<vmem>>, vector<1x12xf32>
    %219 = vector.broadcast %218 : vector<1x12xf32> to vector<128x12xf32>
    %220 = arith.addf %217, %219 : vector<128x12xf32>
    %cst_191 = arith.constant 0.000000e+00 : f32
    %221 = vector.broadcast %cst_191 : f32 to vector<128x12xf32>
    %222 = arith.maximumf %220, %221 : vector<128x12xf32>
    %c0_192 = arith.constant 0 : index
    %c0_193 = arith.constant 0 : index
    %223 = vector.load %arg19[%c0_192, %c0_193] : memref<12x16xf32, #tpu.memory_space<vmem>>, vector<12x16xf32>
    %cst_194 = arith.constant dense<0.000000e+00> : vector<128x16xf32>
    %224 = tpu.matmul %222, %223, %cst_194 {dimension_numbers = #tpu.dot_dimension_numbers<[1], [0], [0], [1], [0, 0, 1, 1], [], []>} : vector<128x12xf32>, vector<12x16xf32>, vector<128x16xf32> -> vector<128x16xf32>
    %c0_195 = arith.constant 0 : index
    %c0_196 = arith.constant 0 : index
    %225 = vector.load %arg20[%c0_195, %c0_196] : memref<1x16xf32, #tpu.memory_space<vmem>>, vector<1x16xf32>
    %226 = vector.broadcast %225 : vector<1x16xf32> to vector<128x16xf32>
    %227 = arith.addf %224, %226 : vector<128x16xf32>
    %cst_197 = arith.constant dense<0.000000e+00> : vector<16xf32>
    %228 = vector.multi_reduction <add>, %227, %cst_197 [0] : vector<128x16xf32> to vector<16xf32>
    %229 = vector.shape_cast %228 : vector<16xf32> to vector<1x16xf32>
    %230 = arith.mulf %227, %227 : vector<128x16xf32>
    %cst_198 = arith.constant dense<0.000000e+00> : vector<16xf32>
    %231 = vector.multi_reduction <add>, %230, %cst_198 [0] : vector<128x16xf32> to vector<16xf32>
    %232 = vector.shape_cast %231 : vector<16xf32> to vector<1x16xf32>
    %cst_199 = arith.constant 7.812500e-03 : f32
    %233 = vector.broadcast %cst_199 : f32 to vector<1x16xf32>
    %234 = arith.mulf %229, %233 : vector<1x16xf32>
    %cst_200 = arith.constant 7.812500e-03 : f32
    %235 = vector.broadcast %cst_200 : f32 to vector<1x16xf32>
    %236 = arith.mulf %232, %235 : vector<1x16xf32>
    %237 = arith.mulf %234, %234 : vector<1x16xf32>
    %238 = arith.subf %236, %237 : vector<1x16xf32>
    %cst_201 = arith.constant 0.000000e+00 : f32
    %239 = vector.broadcast %cst_201 : f32 to vector<1x16xf32>
    %240 = arith.maximumf %238, %239 : vector<1x16xf32>
    %241 = vector.broadcast %234 : vector<1x16xf32> to vector<128x16xf32>
    %242 = arith.subf %227, %241 : vector<128x16xf32>
    %cst_202 = arith.constant 9.99999974E-6 : f32
    %243 = vector.broadcast %cst_202 : f32 to vector<1x16xf32>
    %244 = arith.addf %240, %243 : vector<1x16xf32>
    %245 = math.rsqrt %244 : vector<1x16xf32>
    %c0_203 = arith.constant 0 : index
    %c0_204 = arith.constant 0 : index
    %246 = vector.load %arg21[%c0_203, %c0_204] : memref<1x16xf32, #tpu.memory_space<vmem>>, vector<1x16xf32>
    %247 = arith.mulf %245, %246 : vector<1x16xf32>
    %248 = vector.broadcast %247 : vector<1x16xf32> to vector<128x16xf32>
    %249 = arith.mulf %242, %248 : vector<128x16xf32>
    %c0_205 = arith.constant 0 : index
    %c0_206 = arith.constant 0 : index
    %250 = vector.load %arg22[%c0_205, %c0_206] : memref<1x16xf32, #tpu.memory_space<vmem>>, vector<1x16xf32>
    %251 = vector.broadcast %250 : vector<1x16xf32> to vector<128x16xf32>
    %252 = arith.addf %249, %251 : vector<128x16xf32>
    %cst_207 = arith.constant 0.000000e+00 : f32
    %253 = vector.broadcast %cst_207 : f32 to vector<128x16xf32>
    %254 = arith.maximumf %252, %253 : vector<128x16xf32>
    %c0_208 = arith.constant 0 : index
    %c0_209 = arith.constant 0 : index
    %255 = vector.load %arg23[%c0_208, %c0_209] : memref<16x36xf32, #tpu.memory_space<vmem>>, vector<16x36xf32>
    %cst_210 = arith.constant dense<0.000000e+00> : vector<128x36xf32>
    %256 = tpu.matmul %254, %255, %cst_210 {dimension_numbers = #tpu.dot_dimension_numbers<[1], [0], [0], [1], [0, 0, 1, 1], [], []>} : vector<128x16xf32>, vector<16x36xf32>, vector<128x36xf32> -> vector<128x36xf32>
    %257 = vector.shape_cast %256 : vector<128x36xf32> to vector<8x2x8x36xf32>
    %c1_211 = arith.constant 1 : index
    %c0_212 = arith.constant 0 : index
    %c1_213 = arith.constant 1 : index
    %c0_214 = arith.constant 0 : index
    %258 = vector.load %arg26[%c1_211, %c0_212, %c1_213, %c0_214] : memref<10x2x10x36xf32, #tpu.memory_space<vmem>>, vector<8x2x8x36xf32>
    tpu.vector_store %arg26[%c1_211, %c0_212, %c1_213, %c0_214], %257 {strides = array<i32>} : memref<10x2x10x36xf32, #tpu.memory_space<vmem>>, vector<8x2x8x36xf32>,
    %cst_215 = arith.constant 0.000000e+00 : f32
    %259 = vector.broadcast %cst_215 : f32 to vector<8x2x8x4xf32>
    %c0_216 = arith.constant 0 : index
    %c0_217 = arith.constant 0 : index
    %c0_218 = arith.constant 0 : index
    %c0_219 = arith.constant 0 : index
    %260 = vector.load %arg26[%c0_216, %c0_217, %c0_218, %c0_219] : memref<10x2x10x36xf32, #tpu.memory_space<vmem>>, vector<8x2x10x4xf32>
    %c1_220 = arith.constant 1 : index
    %c0_221 = arith.constant 0 : index
    %c0_222 = arith.constant 0 : index
    %c4_223 = arith.constant 4 : index
    %261 = vector.load %arg26[%c1_220, %c0_221, %c0_222, %c4_223] : memref<10x2x10x36xf32, #tpu.memory_space<vmem>>, vector<8x2x10x4xf32>
    %262 = arith.addf %260, %261 : vector<8x2x10x4xf32>
    %c2_224 = arith.constant 2 : index
    %c0_225 = arith.constant 0 : index
    %c0_226 = arith.constant 0 : index
    %c8_227 = arith.constant 8 : index
    %263 = vector.load %arg26[%c2_224, %c0_225, %c0_226, %c8_227] : memref<10x2x10x36xf32, #tpu.memory_space<vmem>>, vector<8x2x10x4xf32>
    %264 = arith.addf %262, %263 : vector<8x2x10x4xf32>
    %265 = vector.extract_strided_slice %264 {offsets = [0, 0, 0, 0], sizes = [8, 2, 8, 4], strides = [1, 1, 1, 1]} : vector<8x2x10x4xf32> to vector<8x2x8x4xf32>
    %266 = arith.addf %259, %265 : vector<8x2x8x4xf32>
    %c0_228 = arith.constant 0 : index
    %c0_229 = arith.constant 0 : index
    %c0_230 = arith.constant 0 : index
    %c12_231 = arith.constant 12 : index
    %267 = vector.load %arg26[%c0_228, %c0_229, %c0_230, %c12_231] : memref<10x2x10x36xf32, #tpu.memory_space<vmem>>, vector<8x2x10x4xf32>
    %c1_232 = arith.constant 1 : index
    %c0_233 = arith.constant 0 : index
    %c0_234 = arith.constant 0 : index
    %c16_235 = arith.constant 16 : index
    %268 = vector.load %arg26[%c1_232, %c0_233, %c0_234, %c16_235] : memref<10x2x10x36xf32, #tpu.memory_space<vmem>>, vector<8x2x10x4xf32>
    %269 = arith.addf %267, %268 : vector<8x2x10x4xf32>
    %c2_236 = arith.constant 2 : index
    %c0_237 = arith.constant 0 : index
    %c0_238 = arith.constant 0 : index
    %c20_239 = arith.constant 20 : index
    %270 = vector.load %arg26[%c2_236, %c0_237, %c0_238, %c20_239] : memref<10x2x10x36xf32, #tpu.memory_space<vmem>>, vector<8x2x10x4xf32>
    %271 = arith.addf %269, %270 : vector<8x2x10x4xf32>
    %272 = vector.extract_strided_slice %271 {offsets = [0, 0, 1, 0], sizes = [8, 2, 8, 4], strides = [1, 1, 1, 1]} : vector<8x2x10x4xf32> to vector<8x2x8x4xf32>
    %273 = arith.addf %266, %272 : vector<8x2x8x4xf32>
    %c0_240 = arith.constant 0 : index
    %c0_241 = arith.constant 0 : index
    %c0_242 = arith.constant 0 : index
    %c24_243 = arith.constant 24 : index
    %274 = vector.load %arg26[%c0_240, %c0_241, %c0_242, %c24_243] : memref<10x2x10x36xf32, #tpu.memory_space<vmem>>, vector<8x2x10x4xf32>
    %c1_244 = arith.constant 1 : index
    %c0_245 = arith.constant 0 : index
    %c0_246 = arith.constant 0 : index
    %c28_247 = arith.constant 28 : index
    %275 = vector.load %arg26[%c1_244, %c0_245, %c0_246, %c28_247] : memref<10x2x10x36xf32, #tpu.memory_space<vmem>>, vector<8x2x10x4xf32>
    %276 = arith.addf %274, %275 : vector<8x2x10x4xf32>
    %c2_248 = arith.constant 2 : index
    %c0_249 = arith.constant 0 : index
    %c0_250 = arith.constant 0 : index
    %c32_251 = arith.constant 32 : index
    %277 = vector.load %arg26[%c2_248, %c0_249, %c0_250, %c32_251] : memref<10x2x10x36xf32, #tpu.memory_space<vmem>>, vector<8x2x10x4xf32>
    %278 = arith.addf %276, %277 : vector<8x2x10x4xf32>
    %279 = vector.extract_strided_slice %278 {offsets = [0, 0, 2, 0], sizes = [8, 2, 8, 4], strides = [1, 1, 1, 1]} : vector<8x2x10x4xf32> to vector<8x2x8x4xf32>
    %280 = arith.addf %273, %279 : vector<8x2x8x4xf32>
    %c0_252 = arith.constant 0 : index
    %c0_253 = arith.constant 0 : index
    %281 = vector.load %arg24[%c0_252, %c0_253] : memref<1x4xf32, #tpu.memory_space<vmem>>, vector<1x4xf32>
    %282 = vector.shape_cast %281 : vector<1x4xf32> to vector<1x1x1x4xf32>
    %283 = vector.broadcast %282 : vector<1x1x1x4xf32> to vector<8x2x8x4xf32>
    %284 = arith.addf %280, %283 : vector<8x2x8x4xf32>
    %c0_254 = arith.constant 0 : index
    %c0_255 = arith.constant 0 : index
    %c0_256 = arith.constant 0 : index
    %c12_257 = arith.constant 12 : index
    %285 = vector.load %arg25[%c0_254, %c0_255, %c0_256, %c12_257] : memref<8x2x8x16xf32, #tpu.memory_space<vmem>>, vector<8x2x8x4xf32>
    tpu.vector_store %arg25[%c0_254, %c0_255, %c0_256, %c12_257], %284 {strides = array<i32>} : memref<8x2x8x16xf32, #tpu.memory_space<vmem>>, vector<8x2x8x4xf32>,
    return
  }
}

</mosaic_0001>

<bundles_post_ra>
// kernel: tpu_custom_call.1
= control target key start
LH: loop header
LB: loop body
LE: loop exit
PB: predicated region body
PF: predicated region fallthrough
CT: control target
= control target key end

     0   :  { %s7257_s0 = inlined_call_operand.vmem [shape: f32[8,2,8,4], index: 0, kind: input, shape index: {}]   ;;  %s7258_s1 = inlined_call_operand.vmem [shape: f32[1,4], index: 1, kind: input, shape index: {}]   ;;  %s7259_s2 = inlined_call_operand.vmem [shape: f32[1,4], index: 2, kind: input, shape index: {}]   ;;  %s7260_s3 = inlined_call_operand.vmem [shape: f32[4,16], index: 3, kind: input, shape index: {}]   ;;  %s7261_s4 = inlined_call_operand.vmem [shape: f32[1,16], index: 4, kind: input, shape index: {}]   ;;  %s7262_s5 = inlined_call_operand.vmem [shape: f32[1,16], index: 5, kind: input, shape index: {}]   ;;  %s7263_s6 = inlined_call_operand.vmem [shape: f32[1,16], index: 6, kind: input, shape index: {}]   ;;  %s7264_s7 = inlined_call_operand.vmem [shape: f32[16,36], index: 7, kind: input, shape index: {}]   ;;  %s7265_s8 = inlined_call_operand.vmem [shape: f32[1,4], index: 8, kind: input, shape index: {}]   ;;  %s7266_s9 = inlined_call_operand.vmem [shape: f32[1,8], index: 9, kind: input, shape index: {}]   ;;  %s7267_s10 = inlined_call_operand.vmem [shape: f32[1,8], index: 10, kind: input, shape index: {}]   ;;  %s7268_s11 = inlined_call_operand.vmem [shape: f32[8,16], index: 11, kind: input, shape index: {}]   ;;  %s7269_s12 = inlined_call_operand.vmem [shape: f32[1,16], index: 12, kind: input, shape index: {}]   ;;  %s7270_s13 = inlined_call_operand.vmem [shape: f32[1,16], index: 13, kind: input, shape index: {}]   ;;  %s7271_s14 = inlined_call_operand.vmem [shape: f32[1,16], index: 14, kind: input, shape index: {}]   ;;  %s7272_s15 = inlined_call_operand.vmem [shape: f32[16,36], index: 15, kind: input, shape index: {}]   ;;  %s7273_s16 = inlined_call_operand.vmem [shape: f32[1,4], index: 16, kind: input, shape index: {}]   ;;  %s7274_s17 = inlined_call_operand.vmem [shape: f32[1,12], index: 17, kind: input, shape index: {}]   ;;  %s7275_s18 = inlined_call_operand.vmem [shape: f32[1,12], index: 18, kind: input, shape index: {}]   ;;  %s7276_s19 = inlined_call_operand.vmem [shape: f32[12,16], index: 19, kind: input, shape index: {}]   ;;  %s7277_s20 = inlined_call_operand.vmem [shape: f32[1,16], index: 20, kind: input, shape index: {}]   ;;  %s7278_s21 = inlined_call_operand.vmem [shape: f32[1,16], index: 21, kind: input, shape index: {}]   ;;  %s7279_s22 = inlined_call_operand.vmem [shape: f32[1,16], index: 22, kind: input, shape index: {}]   ;;  %s7280_s23 = inlined_call_operand.vmem [shape: f32[16,36], index: 23, kind: input, shape index: {}]   ;;  %s7281_s24 = inlined_call_operand.vmem [shape: f32[1,4], index: 24, kind: input, shape index: {}]   ;;  %s7282_s25 = inlined_call_operand.hbm [shape: f32[8,2,8,16], index: 25, kind: output, shape index: {}]  }
   0x1   :  { %7285 = sst [smem:[#allocation6_spill]] %s7257_s0 }
   0x2   :  { %7286 = sst [smem:[#allocation7_spill]] %s7258_s1 }
   0x3   :  { %7287 = sst [smem:[#allocation8_spill]] %s7259_s2 }
   0x4   :  { %7288 = sst [smem:[#allocation9_spill]] %s7260_s3 }
   0x5   :  { %7289 = sst [smem:[#allocation10_spill]] %s7261_s4 }
   0x6   :  { %7290 = sst [smem:[#allocation11_spill]] %s7262_s5 }
   0x7   :  { %7291 = sst [smem:[#allocation12_spill]] %s7263_s6 }
   0x8   :  { %7292 = sst [smem:[#allocation13_spill]] %s7264_s7 }
   0x9   :  { %7293 = sst [smem:[#allocation14_spill]] %s7265_s8 }
   0xa   :  { %7294 = sst [smem:[#allocation15_spill]] %s7266_s9 }
   0xb   :  { %s7295_s6 = sld [smem:[#allocation9_spill]]  ;;  %vm412_vm0 = vcmask 1043456   ;;  %vm97_vm1 = vcmask 31744  }
   0xc   :  { %s7296_s3 = sld [smem:[#allocation6_spill]] }
  0x11   :  { %v359_v0 = vld [vmem:[%s7295_s6] sm:$0xf] }
  0x12   :  { %v81_v1 = vld [vmem:[%s7296_s3] sm:$0xff]  ;;  %v82_v2 = vld [vmem:[%s7296_s3 + $0x8] sm:$0xff]  ;;  %4423 = vmatpush.msk.msra.mxu0 %vm412_vm0, %v359_v0  ;;  %v83_v3 = vld [vmem:[%s7296_s3 + $0x10] sm:$0xff]  ;;  %4521 = vmatpush.msk.msra.mxu1 %vm412_vm0, %v359_v0 }
  0x13   :  { %v84_v4 = vld [vmem:[%s7296_s3 + $0x18] sm:$0xff]  ;;  %98 = vst.msk [vmem:[#allocation3] sm:$0xff] %vm97_vm1, %v81_v1  ;;  %v85_v5 = vld [vmem:[%s7296_s3 + $0x20] sm:$0xff]  ;;  %v86_v6 = vld [vmem:[%s7296_s3 + $0x28] sm:$0xff] }
  0x14   :  { %99 = vst.msk [vmem:[#allocation3 + $0x8] sm:$0xff] %vm97_vm1, %v82_v2  ;;  %v87_v7 = vld [vmem:[%s7296_s3 + $0x30] sm:$0xff]  ;;  %v88_v8 = vld [vmem:[%s7296_s3 + $0x38] sm:$0xff]  ;;  %v89_v9 = vld [vmem:[%s7296_s3 + $0x40] sm:$0xff] }
  0x15   :  { %100 = vst.msk [vmem:[#allocation3 + $0x10] sm:$0xff] %vm97_vm1, %v83_v3  ;;  %v90_v10 = vld [vmem:[%s7296_s3 + $0x48] sm:$0xff]  ;;  %v91_v11 = vld [vmem:[%s7296_s3 + $0x50] sm:$0xff]  ;;  %v92_v12 = vld [vmem:[%s7296_s3 + $0x58] sm:$0xff] }
  0x16   :  { %101 = vst.msk [vmem:[#allocation3 + $0x18] sm:$0xff] %vm97_vm1, %v84_v4  ;;  %v93_v13 = vld [vmem:[%s7296_s3 + $0x60] sm:$0xff]  ;;  %v94_v15 = vld [vmem:[%s7296_s3 + $0x68] sm:$0xff]  ;;  %v95_v19 = vld [vmem:[%s7296_s3 + $0x70] sm:$0xff] }
  0x17   :  { %102 = vst.msk [vmem:[#allocation3 + $0x20] sm:$0xff] %vm97_vm1, %v85_v5  ;;  %v96_v32 = vld [vmem:[%s7296_s3 + $0x78] sm:$0xff] }
  0x18   :  { %103 = vst.msk [vmem:[#allocation3 + $0x28] sm:$0xff] %vm97_vm1, %v86_v6 }
  0x19   :  { %104 = vst.msk [vmem:[#allocation3 + $0x30] sm:$0xff] %vm97_vm1, %v87_v7 }
  0x1a   :  { %105 = vst.msk [vmem:[#allocation3 + $0x38] sm:$0xff] %vm97_vm1, %v88_v8  ;;  %v4775_v14 = vld [vmem:[#allocation3] sm:$0xff] }
  0x1b   :  { %106 = vst.msk [vmem:[#allocation3 + $0x40] sm:$0xff] %vm97_vm1, %v89_v9  ;;  %v4781_v16 = vld [vmem:[#allocation3 + $0x8] sm:$0xff]  ;;  %v182_v17 = vsel %vm97_vm1, %v4775_v14, 0.0  ;;  %v219_v18 = vmul.f32 %v4775_v14, %v4775_v14 }
  0x1c   :  { %107 = vst.msk [vmem:[#allocation3 + $0x48] sm:$0xff] %vm97_vm1, %v90_v10  ;;  %v4791_v20 = vld [vmem:[#allocation3 + $0x10] sm:$0xff]  ;;  %v183_v21 = vsel %vm97_vm1, %v4781_v16, 0.0  ;;  %v220_v22 = vmul.f32 %v4781_v16, %v4781_v16 }
  0x1d   :  { %108 = vst.msk [vmem:[#allocation3 + $0x50] sm:$0xff] %vm97_vm1, %v91_v11  ;;  %v4798_v23 = vld [vmem:[#allocation3 + $0x18] sm:$0xff]  ;;  %v184_v24 = vadd.f32 %v183_v21, %v182_v17  ;;  %v185_v25 = vsel %vm97_vm1, %v4791_v20, 0.0  ;;  %v221_v26 = vmul.f32 %v4791_v20, %v4791_v20  ;;  %v235_v27 = vsel %vm97_vm1, %v219_v18, 0.0 }
  0x1e   :  { %109 = vst.msk [vmem:[#allocation3 + $0x58] sm:$0xff] %vm97_vm1, %v92_v12  ;;  %v4806_v28 = vld [vmem:[#allocation3 + $0x20] sm:$0xff]  ;;  %v187_v29 = vsel %vm97_vm1, %v4798_v23, 0.0  ;;  %v222_v30 = vmul.f32 %v4798_v23, %v4798_v23  ;;  %v236_v31 = vsel %vm97_vm1, %v220_v22, 0.0 }
  0x1f   :  { %110 = vst.msk [vmem:[#allocation3 + $0x60] sm:$0xff] %vm97_vm1, %v93_v13  ;;  %v4817_v33 = vld [vmem:[#allocation3 + $0x28] sm:$0xff]  ;;  %v186_v34 = vadd.f32 %v185_v25, %v184_v24  ;;  %v223_v35 = vmul.f32 %v4806_v28, %v4806_v28  ;;  %v237_v36 = vadd.f32 %v236_v31, %v235_v27  ;;  %v189_v38 = vsel %vm97_vm1, %v4806_v28, 0.0 }
  0x20   :  { %111 = vst.msk [vmem:[#allocation3 + $0x68] sm:$0xff] %vm97_vm1, %v94_v15  ;;  %v4822_v37 = vld [vmem:[#allocation3 + $0x30] sm:$0xff]  ;;  %v224_v39 = vmul.f32 %v4817_v33, %v4817_v33  ;;  %v238_v40 = vsel %vm97_vm1, %v221_v26, 0.0  ;;  %v240_v41 = vsel %vm97_vm1, %v222_v30, 0.0 }
  0x21   :  { %112 = vst.msk [vmem:[#allocation3 + $0x70] sm:$0xff] %vm97_vm1, %v95_v19  ;;  %v4831_v42 = vld [vmem:[#allocation3 + $0x38] sm:$0xff]  ;;  %v188_v43 = vadd.f32 %v187_v29, %v186_v34  ;;  %v239_v44 = vadd.f32 %v238_v40, %v237_v36 }
  0x22   :  { %30 = vsyncpa [#allocation4], 0  ;;  %113 = vst.msk [vmem:[#allocation3 + $0x78] sm:$0xff] %vm97_vm1, %v96_v32  ;;  %v191_v45 = vsel %vm97_vm1, %v4817_v33, 0.0  ;;  %v225_v46 = vmul.f32 %v4822_v37, %v4822_v37  ;;  %v242_v47 = vsel %vm97_vm1, %v223_v35, 0.0  ;;  %v4839_v48 = vld [vmem:[#allocation3 + $0x40] sm:$0xff]  ;;  %v226_v52 = vmul.f32 %v4831_v42, %v4831_v42 }
  0x23   :  { %v190_v49 = vadd.f32 %v189_v38, %v188_v43  ;;  %v241_v50 = vadd.f32 %v240_v41, %v239_v44  ;;  %v193_v51 = vsel %vm97_vm1, %v4822_v37, 0.0  ;;  %v244_v53 = vsel %vm97_vm1, %v224_v39, 0.0  ;;  %v4846_v54 = vld [vmem:[#allocation3 + $0x48] sm:$0xff]  ;;  %s7297_s27 = sld [smem:[#allocation7_spill]]  ;;  %s4585_s5 = smov 124  }
  0x24   :  { %v195_v57 = vsel %vm97_vm1, %v4831_v42, 0.0  ;;  %v227_v58 = vmul.f32 %v4839_v48, %v4839_v48  ;;  %v246_v59 = vsel %vm97_vm1, %v225_v46, 0.0  ;;  %v4853_v60 = vld [vmem:[#allocation3 + $0x50] sm:$0xff]  ;;  %v197_v63 = vsel %vm97_vm1, %v4839_v48, 0.0  ;;  %s7298_s9 = sld [smem:[#allocation8_spill]]  ;;  %s4586_s0 = smov 116  }
  0x25   :  { %v192_v55 = vadd.f32 %v191_v45, %v190_v49  ;;  %v243_v56 = vadd.f32 %v242_v47, %v241_v50  ;;  %v228_v0 = vmul.f32 %v4846_v54, %v4846_v54  ;;  %v248_v1 = vsel %vm97_vm1, %v226_v52, 0.0  ;;  %v4860_v2 = vld [vmem:[#allocation3 + $0x58] sm:$0xff]  ;;  %s7299_s29 = sld [smem:[#allocation10_spill]]  ;;  %s4588_s7 = smov 4  }
  0x26   :  { %v199_v5 = vsel %vm97_vm1, %v4846_v54, 0.0  ;;  %v229_v6 = vmul.f32 %v4853_v60, %v4853_v60  ;;  %v250_v7 = vsel %vm97_vm1, %v227_v58, 0.0  ;;  %v4867_v8 = vld [vmem:[#allocation3 + $0x60] sm:$0xff]  ;;  %v201_v11 = vsel %vm97_vm1, %v4853_v60, 0.0  ;;  %s7300_s30 = sld [smem:[#allocation13_spill]]  ;;  %s4592_s1 = smov 128  }
  0x27   :  { %v194_v61 = vadd.f32 %v193_v51, %v192_v55  ;;  %v245_v62 = vadd.f32 %v244_v53, %v243_v56  ;;  %v230_v12 = vmul.f32 %v4860_v2, %v4860_v2  ;;  %v252_v13 = vsel %vm97_vm1, %v228_v0, 0.0  ;;  %v4874_v15 = vld [vmem:[#allocation3 + $0x68] sm:$0xff]  ;;  %s7301_s8 = sld [smem:[#allocation11_spill]] }
  0x28   :  { %v203_v19 = vsel %vm97_vm1, %v4860_v2, 0.0  ;;  %v231_v21 = vmul.f32 %v4867_v8, %v4867_v8  ;;  %v254_v22 = vsel %vm97_vm1, %v229_v6, 0.0  ;;  %v4881_v24 = vld [vmem:[#allocation3 + $0x70] sm:$0xff]  ;;  %v205_v27 = vsel %vm97_vm1, %v4867_v8, 0.0  ;;  %s7302_s28 = sld [smem:[#allocation12_spill]] }
  0x29   :  { %v196_v3 = vadd.f32 %v195_v57, %v194_v61  ;;  %v247_v4 = vadd.f32 %v246_v59, %v245_v62  ;;  %v232_v29 = vmul.f32 %v4874_v15, %v4874_v15  ;;  %v256_v30 = vsel %vm97_vm1, %v230_v12, 0.0  ;;  %v4888_v31 = vld [vmem:[#allocation3 + $0x78] sm:$0xff] }
  0x2a   :  { %v207_v35 = vsel %vm97_vm1, %v4874_v15, 0.0  ;;  %v233_v36 = vmul.f32 %v4881_v24, %v4881_v24  ;;  %v258_v38 = vsel %vm97_vm1, %v231_v21, 0.0  ;;  %v209_v41 = vsel %vm97_vm1, %v4881_v24, 0.0 }
  0x2b   :  { %v198_v9 = vadd.f32 %v197_v63, %v196_v3  ;;  %v249_v10 = vadd.f32 %v248_v1, %v247_v4  ;;  %v234_v43 = vmul.f32 %v4888_v31, %v4888_v31  ;;  %v260_v44 = vsel %vm97_vm1, %v232_v29, 0.0 }
  0x2c   :  { %v211_v47 = vsel %vm97_vm1, %v4888_v31, 0.0  ;;  %v262_v49 = vsel %vm97_vm1, %v233_v36, 0.0  ;;  %vm481_vm5 = vcmask 130048   ;;  %vm116_vm9 = vcmask 287744  }
  0x2d   :  { %v200_v17 = vadd.f32 %v199_v5, %v198_v9  ;;  %v251_v18 = vadd.f32 %v250_v7, %v249_v10  ;;  %v264_v52 = vsel %vm97_vm1, %v234_v43, 0.0  ;;  %vm125_vm10 = vcmask 286720  }
  0x2e   :  { %vm114_vm11 = vcmask 293888   ;;  %vm1256_vm12 = vcmask 1046528   ;;  %vm1369_vm13 = vcmask 1045504   ;;  %vm1566_vm14 = vcmask 64544  }
  0x2f   :  { %v202_v25 = vadd.f32 %v201_v11, %v200_v17  ;;  %v253_v26 = vadd.f32 %v252_v13, %v251_v18  ;;  %vm1599_vm15 = vcmask 64512  }
  0x31   :  { %v204_v32 = vadd.f32 %v203_v19, %v202_v25  ;;  %v255_v34 = vadd.f32 %v254_v22, %v253_v26  ;;  %v304_v26 = vld [vmem:[%s7297_s27] sm:$0x1] }
  0x33   :  { %v206_v39 = vadd.f32 %v205_v27, %v204_v32  ;;  %v257_v40 = vadd.f32 %v256_v30, %v255_v34 }
  0x35   :  { %v208_v45 = vadd.f32 %v207_v35, %v206_v39  ;;  %v259_v46 = vadd.f32 %v258_v38, %v257_v40  ;;  %v4920_v35 = vld [vmem:[%s7298_s9] ss:$0 sm:$0xff]  ;;  %s4584_s9 = smov 120  }
  0x37   :  { %v210_v50 = vadd.f32 %v209_v41, %v208_v45  ;;  %v261_v51 = vadd.f32 %v260_v44, %v259_v46 }
  0x39   :  { %v212_v53 = vadd.f32 %v211_v47, %v210_v50  ;;  %v263_v55 = vadd.f32 %v262_v49, %v261_v51 }
  0x3b   :  { %v213_v56 = vrot.slane %v212_v53, 4  ;;  %v265_v57 = vadd.f32 %v264_v52, %v263_v55 }
  0x3d   :  { %v214_v58 = vadd.f32 %v213_v56, %v212_v53  ;;  %v266_v59 = vrot.slane %v265_v57, 4 }
  0x3f   :  { %v215_v61 = vrot.slane %v214_v58, 2  ;;  %v267_v62 = vadd.f32 %v266_v59, %v265_v57 }
  0x41   :  { %v216_v63 = vadd.f32 %v215_v61, %v214_v58  ;;  %v268_v0 = vrot.slane %v267_v62, 2 }
  0x43   :  { %v217_v1 = vrot.slane %v216_v63, 1  ;;  %v269_v3 = vadd.f32 %v268_v0, %v267_v62 }
  0x45   :  { %v218_v4 = vadd.f32 %v217_v1, %v216_v63  ;;  %v270_v5 = vrot.slane %v269_v3, 1 }
  0x47   :  { %v271_v6 = vadd.f32 %v270_v5, %v269_v3  ;;  %v4904_v7 = vmul.f32 0.0078125, %v218_v4 }
  0x49   :  { %v273_v9 = vmul.f32 0.0078125, %v271_v6  ;;  %v274_v10 = vmul.f32 %v4904_v7, %v4904_v7  ;;  %v277_v29 = vsub.f32 %v4775_v14, %v4904_v7  ;;  %v285_v32 = vsub.f32 %v4839_v48, %v4904_v7 }
  0x4a   :  { %v278_v36 = vsub.f32 %v4781_v16, %v4904_v7  ;;  %v286_v38 = vsub.f32 %v4846_v54, %v4904_v7  ;;  %v279_v16 = vsub.f32 %v4791_v20, %v4904_v7  ;;  %v287_v47 = vsub.f32 %v4853_v60, %v4904_v7 }
  0x4b   :  { %v275_v11 = vsub.f32 %v273_v9, %v274_v10  ;;  %v280_v20 = vsub.f32 %v4798_v23, %v4904_v7  ;;  %v288_v60 = vsub.f32 %v4860_v2, %v4904_v7  ;;  %v281_v23 = vsub.f32 %v4806_v28, %v4904_v7 }
  0x4c   :  { %v289_v2 = vsub.f32 %v4867_v8, %v4904_v7  ;;  %v282_v28 = vsub.f32 %v4817_v33, %v4904_v7  ;;  %v290_v8 = vsub.f32 %v4874_v15, %v4904_v7  ;;  %v291_v15 = vsub.f32 %v4881_v24, %v4904_v7 }
  0x4d   :  { %v276_v12 = vmax.f32 %v275_v11, 0.0  ;;  %v292_v24 = vsub.f32 %v4888_v31, %v4904_v7 }
  0x4f   :  { %v293_v13 = vadd.f32 1e-05, %v276_v12  ;;  %v283_v12 = vsub.f32 %v4822_v37, %v4904_v7  ;;  %v284_v37 = vsub.f32 %v4831_v42, %v4904_v7 }
  0x51   :  { %4545 = vrsqrt.f32 %v293_v13  ;;  %vm300_vm2 = vweird.f32 %v293_v13 }
  0x57   :  { %v4546_v17 = vpop.eup %4545 }
  0x58   :  { %v295_v18 = vmul.f32 %v4546_v17, %v293_v13  ;;  %vm301_vm3 = vweird.f32 %v4546_v17 }
  0x59   :  { %vm302_vm4 = vmor %vm300_vm2, %vm301_vm3 }
  0x5a   :  { %v296_v19 = vmul.f32 %v4546_v17, %v295_v18 }
  0x5c   :  { %v297_v21 = vmul.f32 0.5, %v296_v19 }
  0x5e   :  { %v298_v22 = vsub.f32 1.5, %v297_v21 }
  0x60   :  { %v299_v25 = vmul.f32 %v4546_v17, %v298_v22 }
  0x62   :  { %v303_v27 = vsel %vm302_vm4, %v4546_v17, %v299_v25 }
  0x63   :  { %v305_v30 = vmul.f32 %v304_v26, %v303_v27 }
  0x65   :  { %v4915_v34 = vperm.slane %v305_v30, 0 }
  0x67   :  { %v307_v39 = vmul.f32 %v4915_v34, %v277_v29  ;;  %v315_v14 = vmul.f32 %v4915_v34, %v285_v32  ;;  %v308_v48 = vmul.f32 %v4915_v34, %v278_v36  ;;  %v316_v43 = vmul.f32 %v4915_v34, %v286_v38 }
  0x68   :  { %v309_v50 = vmul.f32 %v4915_v34, %v279_v16  ;;  %v317_v52 = vmul.f32 %v4915_v34, %v287_v47  ;;  %v310_v57 = vmul.f32 %v4915_v34, %v280_v20  ;;  %v318_v59 = vmul.f32 %v4915_v34, %v288_v60 }
  0x69   :  { %v327_v40 = vadd.f32 %v4920_v35, %v307_v39  ;;  %v335_v41 = vadd.f32 %v4920_v35, %v315_v14  ;;  %v328_v54 = vadd.f32 %v4920_v35, %v308_v48  ;;  %v336_v46 = vadd.f32 %v4920_v35, %v316_v43 }
  0x6a   :  { %v329_v53 = vadd.f32 %v4920_v35, %v309_v50  ;;  %v337_v55 = vadd.f32 %v4920_v35, %v317_v52  ;;  %v330_v61 = vadd.f32 %v4920_v35, %v310_v57  ;;  %v338_v62 = vadd.f32 %v4920_v35, %v318_v59  ;;  %v660_v52 = vld [vmem:[%s7300_s30 + $0x8] sm:$0xff] }
  0x6b   :  { %v343_v44 = vmax.f32 %v327_v40, 0.0  ;;  %v351_v45 = vmax.f32 %v335_v41, 0.0  ;;  %v344_v49 = vmax.f32 %v328_v54, 0.0  ;;  %v352_v51 = vmax.f32 %v336_v46, 0.0  ;;  %723 = vmatpush.msrb.mxu1 %v660_v52 }
  0x6c   :  { %v345_v56 = vmax.f32 %v329_v53, 0.0  ;;  %v353_v58 = vmax.f32 %v337_v55, 0.0  ;;  %v311_v63 = vmul.f32 %v4915_v34, %v281_v23  ;;  %v346_v0 = vmax.f32 %v330_v61, 0.0 }
  0x6d   :  { %4424 = vmatmul.msk.f32.vlgmr.msra.gmra.mxu0 %vm97_vm1, %v343_v44  ;;  %4432 = vmatmul.msk.f32.vlgmr.msra.gmra.mxu1 %vm97_vm1, %v351_v45  ;;  %v354_v1 = vmax.f32 %v338_v62, 0.0  ;;  %v319_v3 = vmul.f32 %v4915_v34, %v289_v2  ;;  %v312_v9 = vmul.f32 %v4915_v34, %v282_v28  ;;  %v320_v11 = vmul.f32 %v4915_v34, %v290_v8 }
  0x6e   :  { %v331_v4 = vadd.f32 %v4920_v35, %v311_v63  ;;  %v313_v17 = vmul.f32 %v4915_v34, %v283_v12  ;;  %v321_v21 = vmul.f32 %v4915_v34, %v291_v15  ;;  %v314_v27 = vmul.f32 %v4915_v34, %v284_v37 }
  0x6f   :  { %v339_v5 = vadd.f32 %v4920_v35, %v319_v3  ;;  %v332_v33 = vadd.f32 %v4920_v35, %v312_v9  ;;  %v340_v13 = vadd.f32 %v4920_v35, %v320_v11  ;;  %v322_v30 = vmul.f32 %v4915_v34, %v292_v24 }
  0x70   :  { %v347_v6 = vmax.f32 %v331_v4, 0.0  ;;  %v333_v22 = vadd.f32 %v4920_v35, %v313_v17  ;;  %v341_v25 = vadd.f32 %v4920_v35, %v321_v21  ;;  %v334_v32 = vadd.f32 %v4920_v35, %v314_v27 }
  0x71   :  { %v355_v10 = vmax.f32 %v339_v5, 0.0  ;;  %v348_v18 = vmax.f32 %v332_v33, 0.0  ;;  %v356_v19 = vmax.f32 %v340_v13, 0.0  ;;  %v342_v42 = vadd.f32 %v4920_v35, %v322_v30  ;;  %v5003_v35 = vld [vmem:[%s7299_s29] ss:$0 sm:$0xff]  ;;  %s4587_s29 = smov 104  }
  0x72   :  { %v349_v26 = vmax.f32 %v333_v22, 0.0  ;;  %v357_v29 = vmax.f32 %v341_v25, 0.0  ;;  %v350_v36 = vmax.f32 %v334_v32, 0.0 }
  0x73   :  { %v358_v38 = vmax.f32 %v342_v42, 0.0 }
  0x75   :  { %4425 = vmatmul.msk.f32.gmra.mxu0 %vm97_vm1, %v344_v49  ;;  %4433 = vmatmul.msk.f32.gmra.mxu1 %vm97_vm1, %v352_v51 }
  0x7d   :  { %4426 = vmatmul.msk.f32.gmra.mxu0 %vm97_vm1, %v345_v56  ;;  %4434 = vmatmul.msk.f32.gmra.mxu1 %vm97_vm1, %v353_v58 }
  0x85   :  { %4427 = vmatmul.msk.f32.gmra.mxu0 %vm97_vm1, %v346_v0  ;;  %4435 = vmatmul.msk.f32.gmra.mxu1 %vm97_vm1, %v354_v1 }
  0x8d   :  { %4428 = vmatmul.msk.f32.gmra.mxu0 %vm97_vm1, %v347_v6  ;;  %4436 = vmatmul.msk.f32.gmra.mxu1 %vm97_vm1, %v355_v10 }
  0x95   :  { %4429 = vmatmul.msk.f32.gmra.mxu0 %vm97_vm1, %v348_v18  ;;  %4437 = vmatmul.msk.f32.gmra.mxu1 %vm97_vm1, %v356_v19 }
  0x9d   :  { %4430 = vmatmul.msk.f32.gmra.mxu0 %vm97_vm1, %v349_v26  ;;  %4438 = vmatmul.msk.f32.gmra.mxu1 %vm97_vm1, %v357_v29 }
  0xa5   :  { %4431 = vmatmul.msk.f32.gmra.mxu0 %vm97_vm1, %v350_v36  ;;  %4439 = vmatmul.msk.f32.gmra.mxu1 %vm97_vm1, %v358_v38 }
  0xea   :  { %v433_v31 = vpop.f32.mrf.mxu0  ;;  %v457_v7 = vpop.f32.mrf.mxu1 }
  0xeb   :  { %v5009_v16 = vadd.f32 %v5003_v35, %v433_v31  ;;  %v5063_v17 = vadd.f32 %v5003_v35, %v457_v7 }
  0xed   :  { %v519_v50 = vmul.f32 %v5009_v16, %v5009_v16  ;;  %v482_v60 = vsel %vm481_vm5, %v5009_v16, 0.0  ;;  %v527_v32 = vmul.f32 %v5063_v17, %v5063_v17  ;;  %v497_v7 = vsel %vm481_vm5, %v5063_v17, 0.0 }
  0xef   :  { %v535_v23 = vsel %vm481_vm5, %v519_v50, 0.0 }
  0xf2   :  { %v436_v39 = vpop.f32.mrf.mxu0  ;;  %v460_v14 = vpop.f32.mrf.mxu1 }
  0xf3   :  { %v5006_v45 = vadd.f32 %v5003_v35, %v436_v39  ;;  %v5069_v25 = vadd.f32 %v5003_v35, %v460_v14 }
  0xf5   :  { %v520_v47 = vmul.f32 %v5006_v45, %v5006_v45  ;;  %v483_v20 = vsel %vm481_vm5, %v5006_v45, 0.0  ;;  %v528_v39 = vmul.f32 %v5069_v25, %v5069_v25 }
  0xf6   :  { %v484_v61 = vadd.f32 %v483_v20, %v482_v60 }
  0xf7   :  { %v536_v56 = vsel %vm481_vm5, %v520_v47, 0.0  ;;  %v499_v47 = vsel %vm481_vm5, %v5069_v25, 0.0 }
  0xf8   :  { %v537_v3 = vadd.f32 %v536_v56, %v535_v23 }
  0xfa   :  { %v439_v40 = vpop.f32.mrf.mxu0  ;;  %v463_v34 = vpop.f32.mrf.mxu1 }
  0xfb   :  { %v5012_v46 = vadd.f32 %v5003_v35, %v439_v40  ;;  %v5076_v27 = vadd.f32 %v5003_v35, %v463_v34 }
  0xfd   :  { %v521_v53 = vmul.f32 %v5012_v46, %v5012_v46  ;;  %v485_v57 = vsel %vm481_vm5, %v5012_v46, 0.0  ;;  %v529_v34 = vmul.f32 %v5076_v27, %v5076_v27  ;;  %v501_v60 = vsel %vm481_vm5, %v5076_v27, 0.0 }
  0xfe   :  { %v486_v4 = vadd.f32 %v485_v57, %v484_v61 }
  0xff   :  { %v538_v2 = vsel %vm481_vm5, %v521_v53, 0.0  ;;  %v552_v53 = vsel %vm481_vm5, %v528_v39, 0.0 }
 0x100   :  { %v539_v6 = vadd.f32 %v538_v2, %v537_v3 }
 0x102   :  { %v442_v48 = vpop.f32.mrf.mxu0  ;;  %v466_v41 = vpop.f32.mrf.mxu1 }
 0x103   :  { %v5017_v49 = vadd.f32 %v5003_v35, %v442_v48  ;;  %v5089_v14 = vadd.f32 %v5003_v35, %v466_v41 }
 0x105   :  { %v522_v58 = vmul.f32 %v5017_v49, %v5017_v49  ;;  %v487_v63 = vsel %vm481_vm5, %v5017_v49, 0.0  ;;  %v530_v56 = vmul.f32 %v5089_v14, %v5089_v14  ;;  %v503_v61 = vsel %vm481_vm5, %v5089_v14, 0.0 }
 0x106   :  { %v488_v9 = vadd.f32 %v487_v63, %v486_v4 }
 0x107   :  { %v540_v28 = vsel %vm481_vm5, %v522_v58, 0.0  ;;  %v554_v58 = vsel %vm481_vm5, %v529_v34, 0.0 }
 0x108   :  { %v541_v33 = vadd.f32 %v540_v28, %v539_v6 }
 0x10a   :  { %v445_v43 = vpop.f32.mrf.mxu0  ;;  %v4998_v44 = vpop.f32.mrf.mxu1 }
 0x10b   :  { %v5031_v55 = vadd.f32 %v5003_v35, %v445_v43  ;;  %v5099_v50 = vadd.f32 %v5003_v35, %v4998_v44 }
 0x10d   :  { %v523_v0 = vmul.f32 %v5031_v55, %v5031_v55  ;;  %v489_v5 = vsel %vm481_vm5, %v5031_v55, 0.0  ;;  %v505_v4 = vsel %vm481_vm5, %v5099_v50, 0.0 }
 0x10e   :  { %v490_v13 = vadd.f32 %v489_v5, %v488_v9 }
 0x10f   :  { %v542_v10 = vsel %vm481_vm5, %v523_v0, 0.0 }
 0x110   :  { %v543_v21 = vadd.f32 %v542_v10, %v541_v33 }
 0x112   :  { %v448_v54 = vpop.f32.mrf.mxu0  ;;  %v5021_v51 = vpop.f32.mrf.mxu1 }
 0x113   :  { %v5041_v59 = vadd.f32 %v5003_v35, %v448_v54  ;;  %v550_v54 = vsel %vm481_vm5, %v527_v32, 0.0  ;;  %v5108_v57 = vadd.f32 %v5003_v35, %v5021_v51  ;;  %v556_v51 = vsel %vm481_vm5, %v530_v56, 0.0 }
 0x115   :  { %v524_v8 = vmul.f32 %v5041_v59, %v5041_v59  ;;  %v491_v11 = vsel %vm481_vm5, %v5041_v59, 0.0  ;;  %v532_v28 = vmul.f32 %v5108_v57, %v5108_v57  ;;  %v507_v9 = vsel %vm481_vm5, %v5108_v57, 0.0 }
 0x116   :  { %v492_v22 = vadd.f32 %v491_v11, %v490_v13 }
 0x117   :  { %v544_v18 = vsel %vm481_vm5, %v524_v8, 0.0  ;;  %v560_v33 = vsel %vm481_vm5, %v532_v28, 0.0 }
 0x118   :  { %v545_v29 = vadd.f32 %v544_v18, %v543_v21 }
 0x11a   :  { %v451_v62 = vpop.f32.mrf.mxu0  ;;  %v475_v15 = vpop.f32.mrf.mxu1 }
 0x11b   :  { %v5050_v1 = vadd.f32 %v5003_v35, %v451_v62  ;;  %v531_v62 = vmul.f32 %v5099_v50, %v5099_v50  ;;  %v5116_v2 = vadd.f32 %v5003_v35, %v475_v15 }
 0x11d   :  { %v525_v12 = vmul.f32 %v5050_v1, %v5050_v1  ;;  %v493_v19 = vsel %vm481_vm5, %v5050_v1, 0.0  ;;  %v558_v6 = vsel %vm481_vm5, %v531_v62, 0.0  ;;  %v509_v13 = vsel %vm481_vm5, %v5116_v2, 0.0 }
 0x11e   :  { %v494_v30 = vadd.f32 %v493_v19, %v492_v22 }
 0x11f   :  { %v546_v24 = vsel %vm481_vm5, %v525_v12, 0.0 }
 0x120   :  { %v547_v38 = vadd.f32 %v546_v24, %v545_v29 }
 0x122   :  { %v454_v37 = vpop.f32.mrf.mxu0  ;;  %v478_v41 = vpop.f32.mrf.mxu1 }
 0x123   :  { %v5073_v26 = vadd.f32 %v5003_v35, %v454_v37  ;;  %v5119_v63 = vadd.f32 %v5003_v35, %v478_v41  ;;  %v533_v35 = vmul.f32 %v5116_v2, %v5116_v2 }
 0x125   :  { %v495_v42 = vsel %vm481_vm5, %v5073_v26, 0.0  ;;  %v526_v36 = vmul.f32 %v5073_v26, %v5073_v26  ;;  %v534_v10 = vmul.f32 %v5119_v63, %v5119_v63  ;;  %v511_v15 = vsel %vm481_vm5, %v5119_v63, 0.0 }
 0x126   :  { %v496_v31 = vadd.f32 %v495_v42, %v494_v30  ;;  %v562_v21 = vsel %vm481_vm5, %v533_v35, 0.0 }
 0x127   :  { %v548_v40 = vsel %vm481_vm5, %v526_v36, 0.0  ;;  %v564_v22 = vsel %vm481_vm5, %v534_v10, 0.0 }
 0x128   :  { %v498_v48 = vadd.f32 %v497_v7, %v496_v31  ;;  %v549_v43 = vadd.f32 %v548_v40, %v547_v38 }
 0x12a   :  { %v500_v52 = vadd.f32 %v499_v47, %v498_v48  ;;  %v551_v20 = vadd.f32 %v550_v54, %v549_v43  ;;  %v659_v43 = vld [vmem:[%s7300_s30] sm:$0xff]  ;;  %s7303_s30 = sld [smem:[#allocation14_spill]] }
 0x12b   :  { %724 = vmatpush.msrb.mxu1 %v659_v43 }
 0x12c   :  { %v553_v23 = vadd.f32 %v552_v53, %v551_v20  ;;  %v502_v44 = vadd.f32 %v501_v60, %v500_v52 }
 0x12e   :  { %v504_v0 = vadd.f32 %v503_v61, %v502_v44  ;;  %v555_v3 = vadd.f32 %v554_v58, %v553_v23 }
 0x130   :  { %v506_v5 = vadd.f32 %v505_v4, %v504_v0  ;;  %v557_v8 = vadd.f32 %v556_v51, %v555_v3 }
 0x132   :  { %v508_v11 = vadd.f32 %v507_v9, %v506_v5  ;;  %v559_v12 = vadd.f32 %v558_v6, %v557_v8  ;;  %v4535_v9 = vld [vmem:[%s7302_s28] ss:$0 sm:$0xff] }
 0x134   :  { %v561_v18 = vadd.f32 %v560_v33, %v559_v12  ;;  %v510_v19 = vadd.f32 %v509_v13, %v508_v11 }
 0x136   :  { %v563_v37 = vadd.f32 %v562_v21, %v561_v18  ;;  %v512_v24 = vadd.f32 %v511_v15, %v510_v19 }
 0x138   :  { %v513_v29 = vrot.slane %v512_v24, 4  ;;  %v565_v30 = vadd.f32 %v564_v22, %v563_v37 }
 0x13a   :  { %v514_v32 = vadd.f32 %v513_v29, %v512_v24  ;;  %v566_v42 = vrot.slane %v565_v30, 4 }
 0x13c   :  { %v515_v36 = vrot.slane %v514_v32, 2  ;;  %v567_v38 = vadd.f32 %v566_v42, %v565_v30 }
 0x13e   :  { %v516_v31 = vadd.f32 %v515_v36, %v514_v32  ;;  %v568_v7 = vrot.slane %v567_v38, 2 }
 0x140   :  { %v517_v39 = vrot.slane %v516_v31, 1  ;;  %v569_v40 = vadd.f32 %v568_v7, %v567_v38 }
 0x142   :  { %v518_v34 = vadd.f32 %v517_v39, %v516_v31  ;;  %v570_v48 = vrot.slane %v569_v40, 1 }
 0x144   :  { %v571_v54 = vadd.f32 %v570_v48, %v569_v40  ;;  %v5143_v47 = vmul.f32 0.0078125, %v518_v34 }
 0x146   :  { %v573_v52 = vmul.f32 0.0078125, %v571_v54  ;;  %v574_v20 = vmul.f32 %v5143_v47, %v5143_v47  ;;  %v592_v41 = vsub.f32 %v5119_v63, %v5143_v47  ;;  %v582_v60 = vsub.f32 %v5041_v59, %v5143_v47 }
 0x147   :  { %v583_v56 = vsub.f32 %v5050_v1, %v5143_v47  ;;  %v584_v58 = vsub.f32 %v5073_v26, %v5143_v47  ;;  %v589_v44 = vsub.f32 %v5099_v50, %v5143_v47  ;;  %v590_v61 = vsub.f32 %v5108_v57, %v5143_v47  ;;  %v604_v50 = vld [vmem:[%s7301_s8] sm:$0x1]  ;;  %s7304_s8 = sld [smem:[#allocation15_spill]] }
 0x148   :  { %v575_v53 = vsub.f32 %v573_v52, %v574_v20  ;;  %v591_v62 = vsub.f32 %v5116_v2, %v5143_v47  ;;  %v577_v2 = vsub.f32 %v5009_v16, %v5143_v47  ;;  %v578_v35 = vsub.f32 %v5006_v45, %v5143_v47 }
 0x149   :  { %v585_v33 = vsub.f32 %v5063_v17, %v5143_v47  ;;  %v586_v15 = vsub.f32 %v5069_v25, %v5143_v47  ;;  %v587_v16 = vsub.f32 %v5076_v27, %v5143_v47  ;;  %v588_v18 = vsub.f32 %v5089_v14, %v5143_v47 }
 0x14a   :  { %v576_v23 = vmax.f32 %v575_v53, 0.0  ;;  %v579_v7 = vsub.f32 %v5012_v46, %v5143_v47  ;;  %v580_v48 = vsub.f32 %v5017_v49, %v5143_v47  ;;  %v581_v20 = vsub.f32 %v5031_v55, %v5143_v47 }
 0x14b   :  { %v4583_v26 = vmov 0.0  }
 0x14c   :  { %v593_v63 = vadd.f32 1e-05, %v576_v23  ;;  %124 = vst.msk [vmem:[#allocation2 + $0x138] sm:$0x3] %vm116_vm9, %v4583_v26 }
 0x14d   :  { %165 = vst.msk [vmem:[#allocation2 + $0x139] sm:$0x1] %vm125_vm10, %v4583_v26 }
 0x14e   :  { %4547 = vrsqrt.f32 %v593_v63  ;;  %vm600_vm7 = vweird.f32 %v593_v63  ;;  %115 = vst.msk [vmem:[#allocation2] sm:$0xff] %vm114_vm11, %v4583_v26 }
 0x14f   :  { %117 = vst.msk [vmem:[#allocation2 + $0x8] sm:$0x3] %vm116_vm9, %v4583_v26 }
 0x150   :  { %118 = vst.msk [vmem:[#allocation2 + $0x10] sm:$0xff] %vm114_vm11, %v4583_v26 }
 0x151   :  { %119 = vst.msk [vmem:[#allocation2 + $0x18] sm:$0x3] %vm116_vm9, %v4583_v26 }
 0x152   :  { %121 = vst.msk [vmem:[#allocation2 + $0x120] sm:$0xff] %vm114_vm11, %v4583_v26 }
 0x153   :  { %122 = vst.msk [vmem:[#allocation2 + $0x128] sm:$0x3] %vm116_vm9, %v4583_v26  ;;  %vm3008_vm9 = vcmask 97280  }
 0x154   :  { %v4548_v0 = vpop.eup %4547  ;;  %123 = vst.msk [vmem:[#allocation2 + $0x130] sm:$0xff] %vm114_vm11, %v4583_v26 }
 0x155   :  { %v595_v3 = vmul.f32 %v4548_v0, %v593_v63  ;;  %vm601_vm6 = vweird.f32 %v4548_v0  ;;  %128 = vst.msk [vmem:[#allocation2 + $0x20] sm:$0x1] %vm125_vm10, %v4583_v26 }
 0x156   :  { %vm602_vm8 = vmor %vm600_vm7, %vm601_vm6  ;;  %129 = vst.msk [vmem:[#allocation2 + $0x30] sm:$0x1] %vm125_vm10, %v4583_v26 }
 0x157   :  { %v596_v51 = vmul.f32 %v4548_v0, %v595_v3  ;;  %130 = vst.msk [vmem:[#allocation2 + $0x40] sm:$0x1] %vm125_vm10, %v4583_v26 }
 0x158   :  { %131 = vst.msk [vmem:[#allocation2 + $0x50] sm:$0x1] %vm125_vm10, %v4583_v26 }
 0x159   :  { %v597_v4 = vmul.f32 0.5, %v596_v51  ;;  %132 = vst.msk [vmem:[#allocation2 + $0x60] sm:$0x1] %vm125_vm10, %v4583_v26 }
 0x15a   :  { %133 = vst.msk [vmem:[#allocation2 + $0x70] sm:$0x1] %vm125_vm10, %v4583_v26 }
 0x15b   :  { %v598_v28 = vsub.f32 1.5, %v597_v4  ;;  %134 = vst.msk [vmem:[#allocation2 + $0x80] sm:$0x1] %vm125_vm10, %v4583_v26 }
 0x15c   :  { %135 = vst.msk [vmem:[#allocation2 + $0x90] sm:$0x1] %vm125_vm10, %v4583_v26 }
 0x15d   :  { %v599_v5 = vmul.f32 %v4548_v0, %v598_v28  ;;  %136 = vst.msk [vmem:[#allocation2 + $0xa0] sm:$0x1] %vm125_vm10, %v4583_v26 }
 0x15e   :  { %137 = vst.msk [vmem:[#allocation2 + $0xb0] sm:$0x1] %vm125_vm10, %v4583_v26 }
 0x15f   :  { %v603_v8 = vsel %vm602_vm8, %v4548_v0, %v599_v5  ;;  %138 = vst.msk [vmem:[#allocation2 + $0xc0] sm:$0x1] %vm125_vm10, %v4583_v26  ;;  %vm2975_vm8 = vcmask 97344  }
 0x160   :  { %v605_v57 = vmul.f32 %v604_v50, %v603_v8  ;;  %139 = vst.msk [vmem:[#allocation2 + $0xd0] sm:$0x1] %vm125_vm10, %v4583_v26 }
 0x161   :  { %140 = vst.msk [vmem:[#allocation2 + $0xe0] sm:$0x1] %vm125_vm10, %v4583_v26 }
 0x162   :  { %v606_v6 = vperm.slane %v605_v57, 0  ;;  %141 = vst.msk [vmem:[#allocation2 + $0xf0] sm:$0x1] %vm125_vm10, %v4583_v26 }
 0x163   :  { %142 = vst.msk [vmem:[#allocation2 + $0x100] sm:$0x1] %vm125_vm10, %v4583_v26 }
 0x164   :  { %v607_v10 = vmul.f32 %v606_v6, %v577_v2  ;;  %v608_v11 = vmul.f32 %v606_v6, %v578_v35  ;;  %v615_v45 = vmul.f32 %v606_v6, %v585_v33  ;;  %v616_v21 = vmul.f32 %v606_v6, %v586_v15  ;;  %143 = vst.msk [vmem:[#allocation2 + $0x110] sm:$0x1] %vm125_vm10, %v4583_v26 }
 0x165   :  { %v617_v22 = vmul.f32 %v606_v6, %v587_v16  ;;  %v618_v37 = vmul.f32 %v606_v6, %v588_v18  ;;  %v619_v24 = vmul.f32 %v606_v6, %v589_v44  ;;  %v620_v29 = vmul.f32 %v606_v6, %v590_v61  ;;  %148 = vst.msk [vmem:[#allocation2 + $0x29] sm:$0x1] %vm125_vm10, %v4583_v26 }
 0x166   :  { %v627_v12 = vadd.f32 %v4535_v9, %v607_v10  ;;  %v628_v19 = vadd.f32 %v4535_v9, %v608_v11  ;;  %v621_v17 = vmul.f32 %v606_v6, %v591_v62  ;;  %v622_v30 = vmul.f32 %v606_v6, %v592_v41  ;;  %149 = vst.msk [vmem:[#allocation2 + $0x39] sm:$0x1] %vm125_vm10, %v4583_v26 }
 0x167   :  { %v635_v32 = vadd.f32 %v4535_v9, %v615_v45  ;;  %v636_v42 = vadd.f32 %v4535_v9, %v616_v21  ;;  %v637_v25 = vadd.f32 %v4535_v9, %v617_v22  ;;  %v638_v36 = vadd.f32 %v4535_v9, %v618_v37  ;;  %150 = vst.msk [vmem:[#allocation2 + $0x49] sm:$0x1] %vm125_vm10, %v4583_v26 }
 0x168   :  { %v643_v13 = vmax.f32 %v627_v12, 0.0  ;;  %v639_v38 = vadd.f32 %v4535_v9, %v619_v24  ;;  %v5180_v27 = vadd.f32 %v4535_v9, %v620_v29  ;;  %v5182_v31 = vadd.f32 %v4535_v9, %v621_v17  ;;  %151 = vst.msk [vmem:[#allocation2 + $0x59] sm:$0x1] %vm125_vm10, %v4583_v26 }
 0x169   :  { %v5184_v14 = vadd.f32 %v4535_v9, %v622_v30  ;;  %v644_v39 = vmax.f32 %v628_v19, 0.0  ;;  %v609_v40 = vmul.f32 %v606_v6, %v579_v7  ;;  %v610_v54 = vmul.f32 %v606_v6, %v580_v48  ;;  %152 = vst.msk [vmem:[#allocation2 + $0x69] sm:$0x1] %vm125_vm10, %v4583_v26 }
 0x16a   :  { %4440 = vmatmul.msk.f32.vlgmr.msrb.gmra.mxu1 %vm481_vm5, %v643_v13  ;;  %v611_v53 = vmul.f32 %v606_v6, %v581_v20  ;;  %v612_v44 = vmul.f32 %v606_v6, %v582_v60  ;;  %v613_v62 = vmul.f32 %v606_v6, %v583_v56  ;;  %v614_v0 = vmul.f32 %v606_v6, %v584_v58  ;;  %v1143_v58 = vld [vmem:[#allocation2 + $0x138] sm:$0x3] }
 0x16b   :  { %v629_v34 = vadd.f32 %v4535_v9, %v609_v40  ;;  %v630_v52 = vadd.f32 %v4535_v9, %v610_v54  ;;  %v651_v3 = vmax.f32 %v635_v32, 0.0  ;;  %v652_v51 = vmax.f32 %v636_v42, 0.0  ;;  %1190 = vrot.lane.b32.xlu0 %v1143_v58, %s4584_s9  ;;  %153 = vst.msk [vmem:[#allocation2 + $0x79] sm:$0x1] %vm125_vm10, %v4583_v26 }
 0x16c   :  { %v631_v46 = vadd.f32 %v4535_v9, %v611_v53  ;;  %v632_v49 = vadd.f32 %v4535_v9, %v612_v44  ;;  %v633_v55 = vadd.f32 %v4535_v9, %v613_v62  ;;  %v634_v59 = vadd.f32 %v4535_v9, %v614_v0  ;;  %154 = vst.msk [vmem:[#allocation2 + $0x89] sm:$0x1] %vm125_vm10, %v4583_v26 }
 0x16d   :  { %v645_v43 = vmax.f32 %v629_v34, 0.0  ;;  %v646_v41 = vmax.f32 %v630_v52, 0.0  ;;  %v653_v1 = vmax.f32 %v637_v25, 0.0  ;;  %v654_v56 = vmax.f32 %v638_v36, 0.0  ;;  %155 = vst.msk [vmem:[#allocation2 + $0x99] sm:$0x1] %vm125_vm10, %v4583_v26 }
 0x16e   :  { %v647_v23 = vmax.f32 %v631_v46, 0.0  ;;  %v648_v61 = vmax.f32 %v632_v49, 0.0  ;;  %v649_v63 = vmax.f32 %v633_v55, 0.0  ;;  %v650_v60 = vmax.f32 %v634_v59, 0.0  ;;  %156 = vst.msk [vmem:[#allocation2 + $0xa9] sm:$0x1] %vm125_vm10, %v4583_v26 }
 0x16f   :  { %v655_v47 = vmax.f32 %v639_v38, 0.0  ;;  %v656_v4 = vmax.f32 %v5180_v27, 0.0  ;;  %v657_v28 = vmax.f32 %v5182_v31, 0.0  ;;  %v658_v5 = vmax.f32 %v5184_v14, 0.0  ;;  %157 = vst.msk [vmem:[#allocation2 + $0xb9] sm:$0x1] %vm125_vm10, %v4583_v26 }
 0x170   :  { %158 = vst.msk [vmem:[#allocation2 + $0xc9] sm:$0x1] %vm125_vm10, %v4583_v26 }
 0x171   :  { %159 = vst.msk [vmem:[#allocation2 + $0xd9] sm:$0x1] %vm125_vm10, %v4583_v26 }
 0x172   :  { %4441 = vmatmul.msk.f32.gmra.mxu1 %vm481_vm5, %v644_v39  ;;  %160 = vst.msk [vmem:[#allocation2 + $0xe9] sm:$0x1] %vm125_vm10, %v4583_v26 }
 0x173   :  { %161 = vst.msk [vmem:[#allocation2 + $0xf9] sm:$0x1] %vm125_vm10, %v4583_v26 }
 0x174   :  { %162 = vst.msk [vmem:[#allocation2 + $0x109] sm:$0x1] %vm125_vm10, %v4583_v26 }
 0x175   :  { %163 = vst.msk [vmem:[#allocation2 + $0x119] sm:$0x1] %vm125_vm10, %v4583_v26 }
 0x176   :  { %164 = vst.msk [vmem:[#allocation2 + $0x129] sm:$0x1] %vm125_vm10, %v4583_v26 }
 0x177   :  { %126 = vst.msk [vmem:[#allocation2] sm:$0x1] %vm125_vm10, %v4583_v26 }
 0x178   :  { %127 = vst.msk [vmem:[#allocation2 + $0x10] sm:$0x1] %vm125_vm10, %v4583_v26 }
 0x179   :  { %144 = vst.msk [vmem:[#allocation2 + $0x120] sm:$0x1] %vm125_vm10, %v4583_v26 }
 0x17a   :  { %4442 = vmatmul.msk.f32.gmra.mxu1 %vm481_vm5, %v645_v43  ;;  %145 = vst.msk [vmem:[#allocation2 + $0x130] sm:$0x1] %vm125_vm10, %v4583_v26 }
 0x17b   :  { %146 = vst.msk [vmem:[#allocation2 + $0x9] sm:$0x1] %vm125_vm10, %v4583_v26 }
 0x17c   :  { %147 = vst.msk [vmem:[#allocation2 + $0x19] sm:$0x1] %vm125_vm10, %v4583_v26 }
 0x17d   :  { %v1142_v6 = vld [vmem:[#allocation2 + $0x128] sm:$0x3] }
 0x17e   :  { %1188 = vrot.lane.b32.xlu1 %v1142_v6, %s4584_s9 }
 0x180   :  { %v918_v9 = vld [vmem:[#allocation2 + $0x120] sm:$0xff] }
 0x181   :  { %964 = vrot.lane.b32.xlu2 %v918_v9, %s4584_s9  ;;  %v919_v12 = vld [vmem:[#allocation2 + $0x130] sm:$0xff] }
 0x182   :  { %4443 = vmatmul.msk.f32.gmra.mxu1 %vm481_vm5, %v646_v41 }
 0x189   :  { %966 = vrot.lane.b32.xlu2 %v919_v12, %s4584_s9 }
 0x18a   :  { %4444 = vmatmul.msk.f32.gmra.mxu1 %vm481_vm5, %v647_v23 }
 0x192   :  { %4445 = vmatmul.msk.f32.gmra.mxu1 %vm481_vm5, %v648_v61 }
 0x19a   :  { %4446 = vmatmul.msk.f32.gmra.mxu1 %vm481_vm5, %v649_v63 }
 0x1a2   :  { %4447 = vmatmul.msk.f32.gmra.mxu1 %vm481_vm5, %v650_v60 }
 0x1aa   :  { %4448 = vmatmul.msk.f32.gmra.mxu1 %vm481_vm5, %v651_v3 }
 0x1b2   :  { %4449 = vmatmul.msk.f32.gmra.mxu1 %vm481_vm5, %v652_v51 }
 0x1ba   :  { %4450 = vmatmul.msk.f32.gmra.mxu1 %vm481_vm5, %v653_v1 }
 0x1c2   :  { %4451 = vmatmul.msk.f32.gmra.mxu1 %vm481_vm5, %v654_v56 }
 0x1ca   :  { %4452 = vmatmul.msk.f32.gmra.mxu1 %vm481_vm5, %v655_v47 }
 0x1d2   :  { %4453 = vmatmul.msk.f32.gmra.mxu1 %vm481_vm5, %v656_v4 }
 0x1da   :  { %4454 = vmatmul.msk.f32.gmra.mxu1 %vm481_vm5, %v657_v28 }
 0x1db   :  { %v5399_v46 = vpop.permute.xlu2 %964 }
 0x1dd   :  { %v5408_v62 = vpop.permute.xlu0 %1190 }
 0x1e2   :  { %4455 = vmatmul.msk.f32.gmra.mxu1 %vm481_vm5, %v658_v5 }
 0x1e3   :  { %v5406_v61 = vpop.permute.xlu2 %966 }
 0x1e7   :  { %v726_v50 = vpop.f32.mrf.mxu1 }
 0x1e8   :  { %775 = vst.msk [vmem:[#allocation2 + $0x21] sm:$0xff] %vm114_vm11, %v726_v50 }
 0x1ef   :  { %v729_v8 = vpop.f32.mrf.mxu1  ;;  %v5299_v57 = vld [vmem:[#allocation2 + $0x20] sm:$0xff]  ;;  %v1032_v35 = vld [vmem:[#allocation2 + $0x28] sm:$0x3] }
 0x1f0   :  { %839 = vrot.lane.b32.xlu0 %v5299_v57, %s4585_s5  ;;  %776 = vst.msk [vmem:[#allocation2 + $0x31] sm:$0xff] %vm114_vm11, %v729_v8  ;;  %1064 = vrot.lane.b32.xlu1 %v1032_v35, %s4585_s5  ;;  %v5423_v1 = vpop.permute.xlu1 %1188 }
 0x1f7   :  { %v732_v2 = vpop.f32.mrf.mxu1  ;;  %v5321_v10 = vld [vmem:[#allocation2 + $0x30] sm:$0xff]  ;;  %v1033_v33 = vld [vmem:[#allocation2 + $0x38] sm:$0x3] }
 0x1f8   :  { %777 = vst.msk [vmem:[#allocation2 + $0x41] sm:$0xff] %vm114_vm11, %v732_v2  ;;  %841 = vrot.lane.b32.xlu0 %v5321_v10, %s4585_s5  ;;  %1066 = vrot.lane.b32.xlu1 %v1033_v33, %s4585_s5 }
 0x1ff   :  { %v735_v11 = vpop.f32.mrf.mxu1  ;;  %v5331_v16 = vld [vmem:[#allocation2 + $0x40] sm:$0xff]  ;;  %v1034_v18 = vld [vmem:[#allocation2 + $0x48] sm:$0x3] }
 0x200   :  { %778 = vst.msk [vmem:[#allocation2 + $0x51] sm:$0xff] %vm114_vm11, %v735_v11  ;;  %843 = vrot.lane.b32.xlu2 %v5331_v16, %s4585_s5  ;;  %1068 = vrot.lane.b32.xlu1 %v1034_v18, %s4585_s5  ;;  %v1128_v37 = vld [vmem:[#allocation2 + $0x48] sm:$0x3] }
 0x207   :  { %v738_v13 = vpop.f32.mrf.mxu1  ;;  %v5328_v15 = vld [vmem:[#allocation2 + $0x50] sm:$0xff]  ;;  %v1129_v45 = vld [vmem:[#allocation2 + $0x58] sm:$0x3] }
 0x208   :  { %779 = vst.msk [vmem:[#allocation2 + $0x61] sm:$0xff] %vm114_vm11, %v738_v13  ;;  %938 = vrot.lane.b32.xlu0 %v5328_v15, %s4584_s9  ;;  %936 = vrot.lane.b32.xlu2 %v5331_v16, %s4584_s9  ;;  %v1035_v22 = vld [vmem:[#allocation2 + $0x58] sm:$0x3] }
 0x209   :  { %845 = vrot.lane.b32.xlu1 %v5328_v15, %s4585_s5 }
 0x20f   :  { %v741_v19 = vpop.f32.mrf.mxu1  ;;  %v1130_v24 = vld [vmem:[#allocation2 + $0x68] sm:$0x3]  ;;  %v5354_v30 = vld [vmem:[#allocation2 + $0x60] sm:$0xff] }
 0x210   :  { %780 = vst.msk [vmem:[#allocation2 + $0x71] sm:$0xff] %vm114_vm11, %v741_v19  ;;  %1162 = vrot.lane.b32.xlu0 %v1129_v45, %s4584_s9  ;;  %1160 = vrot.lane.b32.xlu2 %v1128_v37, %s4584_s9  ;;  %v1036_v32 = vld [vmem:[#allocation2 + $0x68] sm:$0x3] }
 0x211   :  { %1164 = vrot.lane.b32.xlu1 %v1130_v24, %s4584_s9 }
 0x217   :  { %v744_v21 = vpop.f32.mrf.mxu1  ;;  %v5348_v17 = vld [vmem:[#allocation2 + $0x70] sm:$0xff]  ;;  %v1131_v27 = vld [vmem:[#allocation2 + $0x78] sm:$0x3] }
 0x218   :  { %781 = vst.msk [vmem:[#allocation2 + $0x81] sm:$0xff] %vm114_vm11, %v744_v21  ;;  %1070 = vrot.lane.b32.xlu0 %v1035_v22, %s4585_s5  ;;  %940 = vrot.lane.b32.xlu2 %v5354_v30, %s4584_s9  ;;  %v1037_v7 = vld [vmem:[#allocation2 + $0x78] sm:$0x3] }
 0x219   :  { %1072 = vrot.lane.b32.xlu1 %v1036_v32, %s4585_s5  ;;  %v791_v32 = vld [vmem:[#allocation2] sm:$0xff] }
 0x21f   :  { %v747_v29 = vpop.f32.mrf.mxu1  ;;  %v5364_v25 = vld [vmem:[#allocation2 + $0x80] sm:$0xff]  ;;  %v1132_v38 = vld [vmem:[#allocation2 + $0x88] sm:$0x3] }
 0x220   :  { %782 = vst.msk [vmem:[#allocation2 + $0x91] sm:$0xff] %vm114_vm11, %v747_v29  ;;  %942 = vrot.lane.b32.xlu0 %v5348_v17, %s4584_s9  ;;  %847 = vrot.lane.b32.xlu2 %v5354_v30, %s4585_s5  ;;  %v1038_v14 = vld [vmem:[#allocation2 + $0x88] sm:$0x3] }
 0x221   :  { %944 = vrot.lane.b32.xlu1 %v5364_v25, %s4584_s9  ;;  %v1016_v29 = vld [vmem:[#allocation2 + $0x8] sm:$0x3] }
 0x227   :  { %v750_v42 = vpop.f32.mrf.mxu1  ;;  %v1133_v39 = vld [vmem:[#allocation2 + $0x98] sm:$0x3]  ;;  %v5382_v48 = vld [vmem:[#allocation2 + $0x90] sm:$0xff] }
 0x228   :  { %783 = vst.msk [vmem:[#allocation2 + $0xa1] sm:$0xff] %vm114_vm11, %v750_v42  ;;  %849 = vrot.lane.b32.xlu0 %v5348_v17, %s4585_s5  ;;  %1166 = vrot.lane.b32.xlu2 %v1131_v27, %s4584_s9  ;;  %v1039_v43 = vld [vmem:[#allocation2 + $0x98] sm:$0x3]  ;;  %v1018_v27 = vld [vmem:[#allocation2 + $0x28] sm:$0x3] }
 0x229   :  { %851 = vrot.lane.b32.xlu1 %v5364_v25, %s4585_s5 }
 0x22f   :  { %v753_v36 = vpop.f32.mrf.mxu1  ;;  %v5376_v34 = vld [vmem:[#allocation2 + $0xa0] sm:$0xff]  ;;  %v1134_v53 = vld [vmem:[#allocation2 + $0xa8] sm:$0x3] }
 0x230   :  { %784 = vst.msk [vmem:[#allocation2 + $0xb1] sm:$0xff] %vm114_vm11, %v753_v36  ;;  %1168 = vrot.lane.b32.xlu0 %v1132_v38, %s4584_s9  ;;  %1074 = vrot.lane.b32.xlu2 %v1037_v7, %s4585_s5  ;;  %v1040_v49 = vld [vmem:[#allocation2 + $0xa8] sm:$0x3]  ;;  %v1017_v7 = vld [vmem:[#allocation2 + $0x18] sm:$0x3] }
 0x231   :  { %1170 = vrot.lane.b32.xlu1 %v1133_v39, %s4584_s9 }
 0x237   :  { %v756_v31 = vpop.f32.mrf.mxu1  ;;  %v5392_v52 = vld [vmem:[#allocation2 + $0xb0] sm:$0xff]  ;;  %v1135_v41 = vld [vmem:[#allocation2 + $0xb8] sm:$0x3] }
 0x238   :  { %785 = vst.msk [vmem:[#allocation2 + $0xc1] sm:$0xff] %vm114_vm11, %v756_v31  ;;  %1076 = vrot.lane.b32.xlu0 %v1038_v14, %s4585_s5  ;;  %946 = vrot.lane.b32.xlu2 %v5382_v48, %s4584_s9  ;;  %v1041_v44 = vld [vmem:[#allocation2 + $0xb8] sm:$0x3] }
 0x239   :  { %1078 = vrot.lane.b32.xlu1 %v1039_v43, %s4585_s5 }
 0x23f   :  { %v759_v40 = vpop.f32.mrf.mxu1  ;;  %v1136_v55 = vld [vmem:[#allocation2 + $0xc8] sm:$0x3]  ;;  %v5416_v59 = vld [vmem:[#allocation2 + $0xc0] sm:$0xff] }
 0x240   :  { %786 = vst.msk [vmem:[#allocation2 + $0xd1] sm:$0xff] %vm114_vm11, %v759_v40  ;;  %948 = vrot.lane.b32.xlu0 %v5376_v34, %s4584_s9  ;;  %853 = vrot.lane.b32.xlu2 %v5382_v48, %s4585_s5  ;;  %v1042_v3 = vld [vmem:[#allocation2 + $0xc8] sm:$0x3] }
 0x241   :  { %950 = vrot.lane.b32.xlu1 %v5392_v52, %s4584_s9 }
 0x247   :  { %v762_v54 = vpop.f32.mrf.mxu1  ;;  %v5410_v0 = vld [vmem:[#allocation2 + $0xd0] sm:$0xff]  ;;  %v1137_v4 = vld [vmem:[#allocation2 + $0xd8] sm:$0x3] }
 0x248   :  { %787 = vst.msk [vmem:[#allocation2 + $0xe1] sm:$0xff] %vm114_vm11, %v762_v54  ;;  %855 = vrot.lane.b32.xlu0 %v5376_v34, %s4585_s5  ;;  %1172 = vrot.lane.b32.xlu2 %v1134_v53, %s4584_s9  ;;  %v1043_v6 = vld [vmem:[#allocation2 + $0xd8] sm:$0x3]  ;;  %v792_v54 = vld [vmem:[#allocation2 + $0x10] sm:$0xff] }
 0x249   :  { %857 = vrot.lane.b32.xlu1 %v5392_v52, %s4585_s5 }
 0x24f   :  { %v765_v20 = vpop.f32.mrf.mxu1  ;;  %v5427_v26 = vld [vmem:[#allocation2 + $0xe0] sm:$0xff]  ;;  %v1138_v47 = vld [vmem:[#allocation2 + $0xe8] sm:$0x3] }
 0x250   :  { %788 = vst.msk [vmem:[#allocation2 + $0xf1] sm:$0xff] %vm114_vm11, %v765_v20  ;;  %1174 = vrot.lane.b32.xlu0 %v1135_v41, %s4584_s9  ;;  %1080 = vrot.lane.b32.xlu2 %v1040_v49, %s4585_s5  ;;  %v1044_v50 = vld [vmem:[#allocation2 + $0xe8] sm:$0x3] }
 0x251   :  { %1176 = vrot.lane.b32.xlu1 %v1136_v55, %s4584_s9 }
 0x257   :  { %v768_v23 = vpop.f32.mrf.mxu1  ;;  %v1139_v35 = vld [vmem:[#allocation2 + $0xf8] sm:$0x3]  ;;  %v5439_v33 = vld [vmem:[#allocation2 + $0xf0] sm:$0xff] }
 0x258   :  { %789 = vst.msk [vmem:[#allocation2 + $0x101] sm:$0xff] %vm114_vm11, %v768_v23  ;;  %1082 = vrot.lane.b32.xlu0 %v1041_v44, %s4585_s5  ;;  %952 = vrot.lane.b32.xlu2 %v5416_v59, %s4584_s9  ;;  %v1045_v19 = vld [vmem:[#allocation2 + $0xf8] sm:$0x3] }
 0x259   :  { %1084 = vrot.lane.b32.xlu1 %v1042_v3, %s4585_s5 }
 0x25a   :  { %v844_v60 = vpop.permute.xlu2 %843 }
 0x25b   :  { %v889_v43 = vadd.f32 %v844_v60, %v5299_v57 }
 0x25f   :  { %v771_v63 = vpop.f32.mrf.mxu1  ;;  %v916_v11 = vld [vmem:[#allocation2 + $0x100] sm:$0xff]  ;;  %v1140_v36 = vld [vmem:[#allocation2 + $0x108] sm:$0x3] }
 0x260   :  { %790 = vst.msk [vmem:[#allocation2 + $0x111] sm:$0xff] %vm114_vm11, %v771_v63  ;;  %954 = vrot.lane.b32.xlu0 %v5410_v0, %s4584_s9  ;;  %859 = vrot.lane.b32.xlu2 %v5416_v59, %s4585_s5 }
 0x261   :  { %956 = vrot.lane.b32.xlu1 %v5427_v26, %s4584_s9 }
 0x262   :  { %v840_v51 = vpop.permute.xlu0 %839  ;;  %v937_v56 = vpop.permute.xlu2 %936 }
 0x263   :  { %v1065_v58 = vpop.permute.xlu1 %1064  ;;  %v887_v14 = vadd.f32 %v840_v51, %v791_v32  ;;  %v1046_v51 = vld [vmem:[#allocation2 + $0x108] sm:$0x3] }
 0x264   :  { %v1112_v31 = vadd.f32 %v1065_v58, %v1016_v29 }
 0x265   :  { %v5459_v44 = vadd.f32 %v937_v56, %v887_v14 }
 0x267   :  { %v917_v37 = vld [vmem:[#allocation2 + $0x110] sm:$0xff]  ;;  %v1141_v24 = vld [vmem:[#allocation2 + $0x118] sm:$0x3]  ;;  %v1370_v29 = vrot.slane %v5459_v44, 2 }
 0x268   :  { %861 = vrot.lane.b32.xlu0 %v5410_v0, %s4585_s5  ;;  %1178 = vrot.lane.b32.xlu2 %v1137_v4, %s4584_s9  ;;  %v1047_v53 = vld [vmem:[#allocation2 + $0x118] sm:$0x3] }
 0x269   :  { %863 = vrot.lane.b32.xlu1 %v5427_v26, %s4585_s5  ;;  %v1019_v4 = vld [vmem:[#allocation2 + $0x38] sm:$0x3] }
 0x26a   :  { %v842_v28 = vpop.permute.xlu0 %841  ;;  %v1161_v5 = vpop.permute.xlu2 %1160 }
 0x26b   :  { %v1067_v8 = vpop.permute.xlu1 %1066  ;;  %v1208_v20 = vadd.f32 %v1161_v5, %v1112_v31  ;;  %v888_v55 = vadd.f32 %v842_v28, %v792_v54 }
 0x26c   :  { %v1113_v23 = vadd.f32 %v1067_v8, %v1017_v7 }
 0x26d   :  { %v1258_v57 = vrot.slane %v1208_v20, 1 }
 0x270   :  { %1180 = vrot.lane.b32.xlu0 %v1138_v47, %s4584_s9  ;;  %1086 = vrot.lane.b32.xlu2 %v1043_v6, %s4585_s5 }
 0x271   :  { %1182 = vrot.lane.b32.xlu1 %v1139_v35, %s4584_s9 }
 0x272   :  { %v941_v9 = vpop.permute.xlu2 %940 }
 0x273   :  { %v1069_v12 = vpop.permute.xlu1 %1068  ;;  %v5461_v49 = vadd.f32 %v941_v9, %v889_v43 }
 0x274   :  { %v1114_v39 = vadd.f32 %v1069_v12, %v1018_v27 }
 0x275   :  { %v1263_v28 = vrot.slane %v5461_v49, 1 }
 0x278   :  { %1088 = vrot.lane.b32.xlu0 %v1044_v50, %s4585_s5  ;;  %958 = vrot.lane.b32.xlu2 %v5439_v33, %s4584_s9  ;;  %v1257_v50 = vrot.slane %v5459_v44, 1 }
 0x279   :  { %1090 = vrot.lane.b32.xlu1 %v1045_v19, %s4585_s5 }
 0x27a   :  { %v939_v2 = vpop.permute.xlu0 %938  ;;  %v5443_v18 = vpop.permute.xlu2 %847  ;;  %v1259_v9 = vsel %vm1256_vm12, %v1257_v50, %v1258_v57 }
 0x27b   :  { %v846_v45 = vpop.permute.xlu1 %845  ;;  %v5465_v58 = vadd.f32 %v939_v2, %v888_v55  ;;  %v891_v27 = vadd.f32 %v5443_v18, %v5331_v16 }
 0x27c   :  { %v890_v5 = vadd.f32 %v846_v45, %v5321_v10  ;;  %v1371_v45 = vrot.slane %v1208_v20, 2 }
 0x27d   :  { %v1260_v2 = vrot.slane %v5465_v58, 1  ;;  %v1373_v31 = vrot.slane %v5465_v58, 2 }
 0x280   :  { %960 = vrot.lane.b32.xlu0 %v916_v11, %s4584_s9  ;;  %865 = vrot.lane.b32.xlu2 %v5439_v33, %s4585_s5 }
 0x281   :  { %962 = vrot.lane.b32.xlu1 %v917_v37, %s4584_s9 }
 0x282   :  { %v1163_v13 = vpop.permute.xlu0 %1162  ;;  %v1167_v22 = vpop.permute.xlu2 %1166 }
 0x283   :  { %v1165_v42 = vpop.permute.xlu1 %1164  ;;  %v1209_v63 = vadd.f32 %v1163_v13, %v1113_v23 }
 0x284   :  { %v5455_v41 = vadd.f32 %v1165_v42, %v1114_v39 }
 0x285   :  { %v1261_v6 = vrot.slane %v1209_v63, 1  ;;  %v1374_v42 = vrot.slane %v1209_v63, 2  ;;  %v1376_v63 = vrot.slane %v5461_v49, 2 }
 0x286   :  { %v1264_v60 = vrot.slane %v5455_v41, 1  ;;  %v1377_v20 = vrot.slane %v5455_v41, 2  ;;  %v1021_v41 = vld [vmem:[#allocation2 + $0x58] sm:$0x3] }
 0x287   :  { %v1262_v13 = vsel %vm1256_vm12, %v1260_v2, %v1261_v6  ;;  %v1375_v43 = vsel %vm1369_vm13, %v1373_v31, %v1374_v42 }
 0x288   :  { %867 = vrot.lane.b32.xlu0 %v916_v11, %s4585_s5  ;;  %1184 = vrot.lane.b32.xlu2 %v1140_v36, %s4584_s9  ;;  %v1265_v11 = vsel %vm1256_vm12, %v1263_v28, %v1264_v60  ;;  %v1378_v60 = vsel %vm1369_vm13, %v1376_v63, %v1377_v20 }
 0x289   :  { %869 = vrot.lane.b32.xlu1 %v917_v37, %s4585_s5 }
 0x28a   :  { %v1071_v21 = vpop.permute.xlu0 %1070  ;;  %v5452_v40 = vpop.permute.xlu2 %1074 }
 0x28b   :  { %v1073_v3 = vpop.permute.xlu1 %1072  ;;  %v1115_v56 = vadd.f32 %v1071_v21, %v1019_v4 }
 0x28d   :  { %v1211_v10 = vadd.f32 %v1167_v22, %v1115_v56  ;;  %v1372_v22 = vsel %vm1369_vm13, %v1370_v29, %v1371_v45  ;;  %v1117_v56 = vadd.f32 %v5452_v40, %v1021_v41 }
 0x28f   :  { %v1267_v37 = vrot.slane %v1211_v10, 1  ;;  %v1380_v23 = vrot.slane %v1211_v10, 2 }
 0x290   :  { %1186 = vrot.lane.b32.xlu0 %v1141_v24, %s4584_s9  ;;  %1092 = vrot.lane.b32.xlu2 %v1046_v51, %s4585_s5  ;;  %v1020_v24 = vld [vmem:[#allocation2 + $0x48] sm:$0x3] }
 0x291   :  { %1305 = vrot.lane.b32.xlu1 %v1259_v9, %s4586_s0  ;;  %v1116_v36 = vadd.f32 %v1073_v3, %v1020_v24 }
 0x292   :  { %v943_v38 = vpop.permute.xlu0 %942  ;;  %v947_v8 = vpop.permute.xlu2 %946 }
 0x293   :  { %v5471_v35 = vadd.f32 %v943_v38, %v890_v5  ;;  %v945_v12 = vpop.permute.xlu1 %944 }
 0x294   :  { %v5490_v7 = vadd.f32 %v945_v12, %v891_v27 }
 0x295   :  { %v1266_v21 = vrot.slane %v5471_v35, 1  ;;  %v1379_v16 = vrot.slane %v5471_v35, 2 }
 0x296   :  { %v1269_v57 = vrot.slane %v5490_v7, 1  ;;  %v1382_v45 = vrot.slane %v5490_v7, 2 }
 0x297   :  { %v1268_v38 = vsel %vm1256_vm12, %v1266_v21, %v1267_v37  ;;  %v1381_v4 = vsel %vm1369_vm13, %v1379_v16, %v1380_v23 }
 0x298   :  { %1094 = vrot.lane.b32.xlu0 %v1047_v53, %s4585_s5  ;;  %1307 = vrot.lane.b32.xlu2 %v1262_v13, %s4586_s0  ;;  %v1022_v53 = vld [vmem:[#allocation2 + $0x68] sm:$0x3] }
 0x299   :  { %1418 = vrot.lane.b32.xlu1 %v1372_v22, %s4587_s29 }
 0x29a   :  { %v850_v47 = vpop.permute.xlu0 %849  ;;  %v5481_v32 = vpop.permute.xlu2 %853 }
 0x29b   :  { %v852_v39 = vpop.permute.xlu1 %851  ;;  %v892_v55 = vadd.f32 %v5328_v15, %v850_v47 }
 0x29c   :  { %v893_v47 = vadd.f32 %v5354_v30, %v852_v39  ;;  %v894_v39 = vadd.f32 %v5348_v17, %v5481_v32 }
 0x29d   :  { %v5505_v15 = vadd.f32 %v947_v8, %v892_v55 }
 0x29f   :  { %v1272_v10 = vrot.slane %v5505_v15, 1  ;;  %v1385_v22 = vrot.slane %v5505_v15, 2 }
 0x2a0   :  { %1309 = vrot.lane.b32.xlu0 %v1265_v11, %s4586_s0  ;;  %1420 = vrot.lane.b32.xlu2 %v1375_v43, %s4587_s29 }
 0x2a1   :  { %1422 = vrot.lane.b32.xlu1 %v1378_v60, %s4587_s29  ;;  %v1025_v60 = vld [vmem:[#allocation2 + $0x98] sm:$0x3] }
 0x2a2   :  { %v1169_v19 = vpop.permute.xlu0 %1168  ;;  %v1173_v3 = vpop.permute.xlu2 %1172 }
 0x2a3   :  { %v1212_v14 = vadd.f32 %v1169_v19, %v1116_v36  ;;  %v1171_v28 = vpop.permute.xlu1 %1170 }
 0x2a4   :  { %v1213_v9 = vadd.f32 %v1171_v28, %v1117_v56  ;;  %v1024_v56 = vld [vmem:[#allocation2 + $0x88] sm:$0x3] }
 0x2a5   :  { %v1270_v18 = vrot.slane %v1212_v14, 1  ;;  %v1383_v40 = vrot.slane %v1212_v14, 2  ;;  %v1023_v14 = vld [vmem:[#allocation2 + $0x78] sm:$0x3] }
 0x2a6   :  { %v1273_v2 = vrot.slane %v1213_v9, 1  ;;  %v1386_v29 = vrot.slane %v1213_v9, 2 }
 0x2a7   :  { %v1271_v5 = vsel %vm1256_vm12, %v1269_v57, %v1270_v18  ;;  %v1384_v37 = vsel %vm1369_vm13, %v1382_v45, %v1383_v40 }
 0x2a8   :  { %1311 = vrot.lane.b32.xlu0 %v1268_v38, %s4586_s0  ;;  %1313 = vrot.lane.b32.xlu2 %v1271_v5, %s4586_s0  ;;  %v1274_v8 = vsel %vm1256_vm12, %v1272_v10, %v1273_v2  ;;  %v1387_v27 = vsel %vm1369_vm13, %v1385_v22, %v1386_v29 }
 0x2a9   :  { %1315 = vrot.lane.b32.xlu1 %v1274_v8, %s4586_s0 }
 0x2aa   :  { %v1077_v54 = vpop.permute.xlu0 %1076  ;;  %v1081_v13 = vpop.permute.xlu2 %1080 }
 0x2ab   :  { %v1118_v51 = vadd.f32 %v1077_v54, %v1022_v53  ;;  %v1079_v21 = vpop.permute.xlu1 %1078 }
 0x2ac   :  { %v1119_v43 = vadd.f32 %v1079_v21, %v1023_v14 }
 0x2ad   :  { %v1214_v50 = vadd.f32 %v1173_v3, %v1118_v51 }
 0x2af   :  { %v1276_v12 = vrot.slane %v1214_v50, 1  ;;  %v1389_v36 = vrot.slane %v1214_v50, 2 }
 0x2b0   :  { %1424 = vrot.lane.b32.xlu0 %v1381_v4, %s4587_s29  ;;  %1426 = vrot.lane.b32.xlu2 %v1384_v37, %s4587_s29 }
 0x2b1   :  { %1428 = vrot.lane.b32.xlu1 %v1387_v27, %s4587_s29  ;;  %v1026_v27 = vld [vmem:[#allocation2 + $0xa8] sm:$0x3] }
 0x2b2   :  { %v949_v6 = vpop.permute.xlu0 %948  ;;  %v953_v38 = vpop.permute.xlu2 %952 }
 0x2b3   :  { %v5509_v11 = vadd.f32 %v949_v6, %v893_v47  ;;  %v951_v54 = vpop.permute.xlu1 %950  ;;  %v1120_v47 = vadd.f32 %v1081_v13, %v1024_v56 }
 0x2b4   :  { %v5528_v16 = vadd.f32 %v951_v54, %v894_v39 }
 0x2b5   :  { %v1275_v19 = vrot.slane %v5509_v11, 1  ;;  %v1388_v42 = vrot.slane %v5509_v11, 2 }
 0x2b6   :  { %v1278_v55 = vrot.slane %v5528_v16, 1  ;;  %v1391_v41 = vrot.slane %v5528_v16, 2 }
 0x2b7   :  { %v1277_v30 = vsel %vm1256_vm12, %v1275_v19, %v1276_v12  ;;  %v1390_v31 = vsel %vm1369_vm13, %v1388_v42, %v1389_v36 }
 0x2b8   :  { %1317 = vrot.lane.b32.xlu0 %v1277_v30, %s4586_s0 }
 0x2ba   :  { %v856_v24 = vpop.permute.xlu0 %855  ;;  %v860_v53 = vpop.permute.xlu2 %859 }
 0x2bb   :  { %v858_v3 = vpop.permute.xlu1 %857  ;;  %v895_v17 = vadd.f32 %v5364_v25, %v856_v24 }
 0x2bc   :  { %v896_v28 = vadd.f32 %v5382_v48, %v858_v3 }
 0x2bd   :  { %v5537_v50 = vadd.f32 %v953_v38, %v895_v17 }
 0x2bf   :  { %v1281_v19 = vrot.slane %v5537_v50, 1  ;;  %v1394_v42 = vrot.slane %v5537_v50, 2 }
 0x2c0   :  { %1430 = vrot.lane.b32.xlu0 %v1390_v31, %s4587_s29  ;;  %v897_v31 = vadd.f32 %v5376_v34, %v860_v53 }
 0x2c2   :  { %v1175_v20 = vpop.permute.xlu0 %1174  ;;  %v1179_v32 = vpop.permute.xlu2 %1178 }
 0x2c3   :  { %v1215_v18 = vadd.f32 %v1175_v20, %v1119_v43  ;;  %v1177_v9 = vpop.permute.xlu1 %1176 }
 0x2c4   :  { %v1216_v10 = vadd.f32 %v1177_v9, %v1120_v47 }
 0x2c5   :  { %v1279_v23 = vrot.slane %v1215_v18, 1  ;;  %v1392_v57 = vrot.slane %v1215_v18, 2 }
 0x2c6   :  { %v1282_v25 = vrot.slane %v1216_v10, 1  ;;  %v1395_v37 = vrot.slane %v1216_v10, 2 }
 0x2c7   :  { %v1280_v63 = vsel %vm1256_vm12, %v1278_v55, %v1279_v23  ;;  %v1393_v5 = vsel %vm1369_vm13, %v1391_v41, %v1392_v57  ;;  %v1027_v41 = vld [vmem:[#allocation2 + $0xb8] sm:$0x3] }
 0x2c8   :  { %1319 = vrot.lane.b32.xlu2 %v1280_v63, %s4586_s0  ;;  %v1283_v45 = vsel %vm1256_vm12, %v1281_v19, %v1282_v25  ;;  %v1396_v22 = vsel %vm1369_vm13, %v1394_v42, %v1395_v37 }
 0x2c9   :  { %1321 = vrot.lane.b32.xlu1 %v1283_v45, %s4586_s0 }
 0x2ca   :  { %v1083_v51 = vpop.permute.xlu0 %1082  ;;  %v1087_v8 = vpop.permute.xlu2 %1086 }
 0x2cb   :  { %v1121_v4 = vadd.f32 %v1083_v51, %v1025_v60  ;;  %v1085_v48 = vpop.permute.xlu1 %1084  ;;  %v1028_v60 = vld [vmem:[#allocation2 + $0xc8] sm:$0x3] }
 0x2cc   :  { %v1122_v14 = vadd.f32 %v1085_v48, %v1026_v27 }
 0x2cd   :  { %v1217_v6 = vadd.f32 %v1179_v32, %v1121_v4 }
 0x2cf   :  { %v1285_v40 = vrot.slane %v1217_v6, 1  ;;  %v1398_v29 = vrot.slane %v1217_v6, 2 }
 0x2d0   :  { %1432 = vrot.lane.b32.xlu2 %v1393_v5, %s4587_s29  ;;  %v1123_v5 = vadd.f32 %v1087_v8, %v1027_v41 }
 0x2d1   :  { %1434 = vrot.lane.b32.xlu1 %v1396_v22, %s4587_s29 }
 0x2d2   :  { %v955_v2 = vpop.permute.xlu0 %954  ;;  %v959_v36 = vpop.permute.xlu2 %958 }
 0x2d3   :  { %v5540_v12 = vadd.f32 %v955_v2, %v896_v28  ;;  %v957_v39 = vpop.permute.xlu1 %956 }
 0x2d4   :  { %v5555_v54 = vadd.f32 %v957_v39, %v897_v31  ;;  %v1029_v39 = vld [vmem:[#allocation2 + $0xd8] sm:$0x3] }
 0x2d5   :  { %v1284_v30 = vrot.slane %v5540_v12, 1  ;;  %v1397_v24 = vrot.slane %v5540_v12, 2 }
 0x2d6   :  { %v1287_v55 = vrot.slane %v5555_v54, 1  ;;  %v1400_v32 = vrot.slane %v5555_v54, 2 }
 0x2d7   :  { %v1286_v13 = vsel %vm1256_vm12, %v1284_v30, %v1285_v40  ;;  %v1399_v38 = vsel %vm1369_vm13, %v1397_v24, %v1398_v29 }
 0x2d8   :  { %1323 = vrot.lane.b32.xlu0 %v1286_v13, %s4586_s0  ;;  %v1030_v13 = vld [vmem:[#allocation2 + $0xe8] sm:$0x3] }
 0x2da   :  { %v862_v21 = vpop.permute.xlu0 %861  ;;  %v866_v18 = vpop.permute.xlu2 %865 }
 0x2db   :  { %v864_v3 = vpop.permute.xlu1 %863  ;;  %v898_v34 = vadd.f32 %v5392_v52, %v862_v21 }
 0x2dc   :  { %v899_v47 = vadd.f32 %v5416_v59, %v864_v3 }
 0x2dd   :  { %v5564_v56 = vadd.f32 %v959_v36, %v898_v34 }
 0x2df   :  { %v1290_v25 = vrot.slane %v5564_v56, 1  ;;  %v1403_v36 = vrot.slane %v5564_v56, 2 }
 0x2e0   :  { %1436 = vrot.lane.b32.xlu0 %v1399_v38, %s4587_s29 }
 0x2e2   :  { %v1181_v43 = vpop.permute.xlu0 %1180  ;;  %v1185_v53 = vpop.permute.xlu2 %1184 }
 0x2e3   :  { %v1218_v20 = vadd.f32 %v1181_v43, %v1122_v14  ;;  %v1183_v6 = vpop.permute.xlu1 %1182 }
 0x2e4   :  { %v1219_v2 = vadd.f32 %v1183_v6, %v1123_v5 }
 0x2e5   :  { %v1288_v23 = vrot.slane %v1218_v20, 1  ;;  %v1401_v57 = vrot.slane %v1218_v20, 2 }
 0x2e6   :  { %v1291_v52 = vrot.slane %v1219_v2, 1  ;;  %v1404_v21 = vrot.slane %v1219_v2, 2 }
 0x2e7   :  { %v1289_v63 = vsel %vm1256_vm12, %v1287_v55, %v1288_v23  ;;  %v1402_v4 = vsel %vm1369_vm13, %v1400_v32, %v1401_v57 }
 0x2e8   :  { %1325 = vrot.lane.b32.xlu2 %v1289_v63, %s4586_s0  ;;  %v1292_v45 = vsel %vm1256_vm12, %v1290_v25, %v1291_v52  ;;  %v1405_v31 = vsel %vm1369_vm13, %v1403_v36, %v1404_v21 }
 0x2e9   :  { %1327 = vrot.lane.b32.xlu1 %v1292_v45, %s4586_s0 }
 0x2ea   :  { %v1089_v51 = vpop.permute.xlu0 %1088  ;;  %v1093_v40 = vpop.permute.xlu2 %1092 }
 0x2eb   :  { %v1124_v17 = vadd.f32 %v1089_v51, %v1028_v60  ;;  %v1091_v59 = vpop.permute.xlu1 %1090  ;;  %v1126_v37 = vadd.f32 %v1093_v40, %v1030_v13 }
 0x2ec   :  { %v1125_v43 = vadd.f32 %v1091_v59, %v1029_v39 }
 0x2ed   :  { %v1220_v28 = vadd.f32 %v1185_v53, %v1124_v17  ;;  %v1222_v27 = vadd.f32 %v5423_v1, %v1126_v37 }
 0x2ef   :  { %v1294_v19 = vrot.slane %v1220_v28, 1  ;;  %v1407_v42 = vrot.slane %v1220_v28, 2  ;;  %v1413_v5 = vrot.slane %v1222_v27, 2 }
 0x2f0   :  { %1438 = vrot.lane.b32.xlu2 %v1402_v4, %s4587_s29 }
 0x2f1   :  { %1440 = vrot.lane.b32.xlu1 %v1405_v31, %s4587_s29 }
 0x2f2   :  { %v961_v9 = vpop.permute.xlu0 %960  ;;  %v1308_v22 = vpop.permute.xlu2 %1307 }
 0x2f3   :  { %v5567_v10 = vadd.f32 %v961_v9, %v899_v47  ;;  %v963_v23 = vpop.permute.xlu1 %962 }
 0x2f5   :  { %v1293_v30 = vrot.slane %v5567_v10, 1  ;;  %v1406_v29 = vrot.slane %v5567_v10, 2 }
 0x2f7   :  { %v1295_v8 = vsel %vm1256_vm12, %v1293_v30, %v1294_v19  ;;  %v1408_v14 = vsel %vm1369_vm13, %v1406_v29, %v1407_v42  ;;  %v1354_v19 = vadd.f32 %v1308_v22, %v5465_v58 }
 0x2f8   :  { %1329 = vrot.lane.b32.xlu0 %v1295_v8, %s4586_s0 }
 0x2fa   :  { %v868_v48 = vpop.permute.xlu0 %867  ;;  %v1421_v3 = vpop.permute.xlu2 %1420 }
 0x2fb   :  { %v901_v24 = vadd.f32 %v5427_v26, %v868_v48  ;;  %v900_v26 = vadd.f32 %v5410_v0, %v866_v18  ;;  %v870_v0 = vpop.permute.xlu1 %869  ;;  %v1031_v18 = vld [vmem:[#allocation2 + $0xf8] sm:$0x3]  ;;  %v1467_v40 = vadd.f32 %v1421_v3, %v1354_v19 }
 0x2fc   :  { %v902_v17 = vadd.f32 %v5439_v33, %v870_v0 }
 0x2fd   :  { %v5579_v38 = vadd.f32 %v5399_v46, %v901_v24  ;;  %v1300_v46 = vrot.slane %v1222_v27, 1  ;;  %v5588_v63 = vadd.f32 %v963_v23, %v900_v26 }
 0x2fe   :  { %v5598_v47 = vadd.f32 %v5406_v61, %v902_v17 }
 0x2ff   :  { %v1299_v20 = vrot.slane %v5579_v38, 1  ;;  %v1296_v60 = vrot.slane %v5588_v63, 1  ;;  %v1412_v41 = vrot.slane %v5579_v38, 2  ;;  %v1409_v9 = vrot.slane %v5588_v63, 2 }
 0x300   :  { %1442 = vrot.lane.b32.xlu0 %v1408_v14, %s4587_s29  ;;  %v1302_v33 = vrot.slane %v5598_v47, 1  ;;  %v1415_v59 = vrot.slane %v5598_v47, 2 }
 0x301   :  { %v1301_v57 = vsel %vm1256_vm12, %v1299_v20, %v1300_v46  ;;  %v1414_v52 = vsel %vm1369_vm13, %v1412_v41, %v1413_v5 }
 0x302   :  { %v1187_v55 = vpop.permute.xlu0 %1186  ;;  %1333 = vrot.lane.b32.xlu1 %v1301_v57, %s4586_s0  ;;  %v1314_v28 = vpop.permute.xlu2 %1313 }
 0x303   :  { %v1221_v1 = vadd.f32 %v1187_v55, %v1125_v43  ;;  %v1306_v30 = vpop.permute.xlu1 %1305  ;;  %v1357_v21 = vadd.f32 %v1314_v28, %v5490_v7 }
 0x304   :  { %v1353_v37 = vadd.f32 %v1306_v30, %v5459_v44 }
 0x305   :  { %v1297_v51 = vrot.slane %v1221_v1, 1  ;;  %v1410_v32 = vrot.slane %v1221_v1, 2 }
 0x307   :  { %v1298_v34 = vsel %vm1256_vm12, %v1296_v60, %v1297_v51  ;;  %v1411_v25 = vsel %vm1369_vm13, %v1409_v9, %v1410_v32 }
 0x308   :  { %1331 = vrot.lane.b32.xlu2 %v1298_v34, %s4586_s0 }
 0x30a   :  { %v1095_v53 = vpop.permute.xlu0 %1094  ;;  %1446 = vrot.lane.b32.xlu1 %v1414_v52, %s4587_s29  ;;  %v1427_v13 = vpop.permute.xlu2 %1426 }
 0x30b   :  { %v1127_v4 = vadd.f32 %v1095_v53, %v1031_v18  ;;  %v1470_v24 = vadd.f32 %v1427_v13, %v1357_v21  ;;  %v1419_v29 = vpop.permute.xlu1 %1418 }
 0x30c   :  { %v1466_v36 = vadd.f32 %v1419_v29, %v1353_v37 }
 0x30d   :  { %v1223_v6 = vadd.f32 %v5408_v62, %v1127_v4  ;;  %v5612_v62 = vld [vmem:[%s7303_s30] ss:$0 sm:$0xff] }
 0x30e   :  { %v1487_v58 = vadd.f32 %v5612_v62, %v1467_v40  ;;  %v1486_v22 = vadd.f32 %v5612_v62, %v1466_v36  ;;  %v1490_v27 = vadd.f32 %v5612_v62, %v1470_v24 }
 0x30f   :  { %v1303_v2 = vrot.slane %v1223_v6, 1  ;;  %v1416_v8 = vrot.slane %v1223_v6, 2 }
 0x310   :  { %1444 = vrot.lane.b32.xlu2 %v1411_v25, %s4587_s29 }
 0x311   :  { %v1304_v61 = vsel %vm1256_vm12, %v1302_v33, %v1303_v2  ;;  %v1417_v48 = vsel %vm1369_vm13, %v1415_v59, %v1416_v8 }
 0x312   :  { %v1310_v45 = vpop.permute.xlu0 %1309  ;;  %1335 = vrot.lane.b32.xlu0 %v1304_v61, %s4586_s0  ;;  %1520 = vrot.lane.b32.xlu1 %v1487_v58, %s4588_s7 }
 0x313   :  { %v1355_v31 = vadd.f32 %v1310_v45, %v5461_v49  ;;  %v1423_v7 = vpop.permute.xlu1 %1422 }
 0x315   :  { %v1468_v26 = vadd.f32 %v1423_v7, %v1355_v31 }
 0x317   :  { %v1488_v20 = vadd.f32 %v5612_v62, %v1468_v26 }
 0x318   :  { %1448 = vrot.lane.b32.xlu2 %v1417_v48, %s4587_s29 }
 0x31a   :  { %v1312_v42 = vpop.permute.xlu0 %1311  ;;  %1518 = vrot.lane.b32.xlu0 %v1486_v22, %s4588_s7  ;;  %1526 = vrot.lane.b32.xlu1 %v1490_v27, %s4588_s7 }
 0x31b   :  { %v1356_v14 = vadd.f32 %v1312_v42, %v5471_v35  ;;  %v1316_v55 = vpop.permute.xlu1 %1315 }
 0x31c   :  { %v1358_v51 = vadd.f32 %v1316_v55, %v5505_v15 }
 0x320   :  { %1522 = vrot.lane.b32.xlu2 %v1488_v20, %s4588_s7 }
 0x322   :  { %v1320_v39 = vpop.permute.xlu2 %1319  ;;  %v1425_v44 = vpop.permute.xlu0 %1424 }
 0x323   :  { %v1469_v43 = vadd.f32 %v1425_v44, %v1356_v14  ;;  %v1360_v49 = vadd.f32 %v1320_v39, %v5528_v16  ;;  %v1429_v57 = vpop.permute.xlu1 %1428 }
 0x324   :  { %v1471_v34 = vadd.f32 %v1429_v57, %v1358_v51 }
 0x325   :  { %v1489_v23 = vadd.f32 %v5612_v62, %v1469_v43 }
 0x326   :  { %v1491_v53 = vadd.f32 %v5612_v62, %v1471_v34 }
 0x327   :  { %1524 = vrot.lane.b32.xlu0 %v1489_v23, %s4588_s7 }
 0x328   :  { %1528 = vrot.lane.b32.xlu2 %v1491_v53, %s4588_s7 }
 0x32a   :  { %v1433_v46 = vpop.permute.xlu2 %1432  ;;  %v1318_v3 = vpop.permute.xlu0 %1317 }
 0x32b   :  { %v1473_v1 = vadd.f32 %v1433_v46, %v1360_v49  ;;  %v1359_v60 = vadd.f32 %v1318_v3, %v5509_v11 }
 0x32d   :  { %v1493_v35 = vadd.f32 %v5612_v62, %v1473_v1 }
 0x32f   :  { %1532 = vrot.lane.b32.xlu1 %v1493_v35, %s4588_s7 }
 0x332   :  { %v1431_v0 = vpop.permute.xlu0 %1430 }
 0x333   :  { %v1472_v18 = vadd.f32 %v1431_v0, %v1359_v60 }
 0x335   :  { %v1492_v16 = vadd.f32 %v5612_v62, %v1472_v18 }
 0x337   :  { %1530 = vrot.lane.b32.xlu0 %v1492_v16, %s4588_s7 }
 0x33b   :  { %v1322_v4 = vpop.permute.xlu1 %1321 }
 0x33c   :  { %v1361_v28 = vadd.f32 %v1322_v4, %v5537_v50 }
 0x342   :  { %v1326_v17 = vpop.permute.xlu2 %1325 }
 0x343   :  { %v1363_v32 = vadd.f32 %v1326_v17, %v5555_v54  ;;  %v1435_v6 = vpop.permute.xlu1 %1434 }
 0x344   :  { %v1474_v2 = vadd.f32 %v1435_v6, %v1361_v28 }
 0x346   :  { %v1494_v33 = vadd.f32 %v5612_v62, %v1474_v2 }
 0x348   :  { %1534 = vrot.lane.b32.xlu2 %v1494_v33, %s4588_s7 }
 0x34a   :  { %v1439_v41 = vpop.permute.xlu2 %1438  ;;  %v1324_v5 = vpop.permute.xlu0 %1323 }
 0x34b   :  { %v1476_v15 = vadd.f32 %v1439_v41, %v1363_v32  ;;  %v1362_v9 = vadd.f32 %v1324_v5, %v5540_v12 }
 0x34d   :  { %v1496_v11 = vadd.f32 %v5612_v62, %v1476_v15 }
 0x34f   :  { %1538 = vrot.lane.b32.xlu1 %v1496_v11, %s4588_s7 }
 0x352   :  { %v1437_v52 = vpop.permute.xlu0 %1436 }
 0x353   :  { %v1475_v25 = vadd.f32 %v1437_v52, %v1362_v9 }
 0x355   :  { %v1495_v54 = vadd.f32 %v5612_v62, %v1475_v25 }
 0x357   :  { %1536 = vrot.lane.b32.xlu0 %v1495_v54, %s4588_s7 }
 0x35b   :  { %v1328_v61 = vpop.permute.xlu1 %1327 }
 0x35c   :  { %v1364_v8 = vadd.f32 %v1328_v61, %v5564_v56 }
 0x362   :  { %v1332_v19 = vpop.permute.xlu2 %1331 }
 0x363   :  { %v1366_v40 = vadd.f32 %v1332_v19, %v5588_v63  ;;  %v1441_v58 = vpop.permute.xlu1 %1440 }
 0x364   :  { %v1477_v48 = vadd.f32 %v1441_v58, %v1364_v8 }
 0x366   :  { %v1497_v37 = vadd.f32 %v5612_v62, %v1477_v48  ;;  %v1777_v48 = vld [vmem:[%s7268_s11] sm:$0xff]  ;;  %s4589_s11 = smov 8  }
 0x367   :  { %1845 = vmatpush.msra.mxu2 %v1777_v48  ;;  %4522 = vmatpush.msra.mxu3 %v1777_v48 }
 0x368   :  { %1540 = vrot.lane.b32.xlu2 %v1497_v37, %s4588_s7 }
 0x36a   :  { %v1330_v30 = vpop.permute.xlu0 %1329  ;;  %v1445_v50 = vpop.permute.xlu2 %1444 }
 0x36b   :  { %v1479_v45 = vadd.f32 %v1445_v50, %v1366_v40  ;;  %v1365_v59 = vadd.f32 %v1330_v30, %v5567_v10 }
 0x36d   :  { %v1499_v12 = vadd.f32 %v5612_v62, %v1479_v45 }
 0x36f   :  { %1544 = vrot.lane.b32.xlu1 %v1499_v12, %s4588_s7 }
 0x372   :  { %v1443_v13 = vpop.permute.xlu0 %1442  ;;  %v1449_v63 = vpop.permute.xlu2 %1448 }
 0x373   :  { %v1478_v21 = vadd.f32 %v1443_v13, %v1365_v59 }
 0x374   :  { %v1334_v29 = vpop.permute.xlu1 %1333 }
 0x375   :  { %v1498_v24 = vadd.f32 %v5612_v62, %v1478_v21  ;;  %v1367_v42 = vadd.f32 %v1334_v29, %v5579_v38 }
 0x377   :  { %1542 = vrot.lane.b32.xlu0 %v1498_v24, %s4588_s7 }
 0x37a   :  { %v1523_v56 = vpop.permute.xlu2 %1522 }
 0x37b   :  { %1569 = vst.msk [vmem:[#allocation3 + $0x10] sm:$0xff] %vm1566_vm14, %v1523_v56 }
 0x37c   :  { %v1447_v10 = vpop.permute.xlu1 %1446 }
 0x37d   :  { %v1480_v36 = vadd.f32 %v1447_v10, %v1367_v42 }
 0x37f   :  { %v1500_v27 = vadd.f32 %v5612_v62, %v1480_v36 }
 0x381   :  { %1546 = vrot.lane.b32.xlu2 %v1500_v27, %s4588_s7 }
 0x382   :  { %v1529_v38 = vpop.permute.xlu2 %1528  ;;  %v5687_v57 = vld [vmem:[#allocation3 + $0x10] sm:$0xff] }
 0x383   :  { %1572 = vst.msk [vmem:[#allocation3 + $0x28] sm:$0xff] %vm1566_vm14, %v1529_v38  ;;  %v1639_v53 = vmul.f32 %v5687_v57, %v5687_v57  ;;  %v1603_v4 = vsel %vm1599_vm15, %v5687_v57, 0.0 }
 0x384   :  { %v1336_v22 = vpop.permute.xlu0 %1335  ;;  %v1521_v39 = vpop.permute.xlu1 %1520 }
 0x385   :  { %v1368_v31 = vadd.f32 %v1336_v22, %v5598_v47  ;;  %1568 = vst.msk [vmem:[#allocation3 + $0x8] sm:$0xff] %vm1566_vm14, %v1521_v39  ;;  %v1656_v11 = vsel %vm1599_vm15, %v1639_v53, 0.0 }
 0x387   :  { %v1481_v7 = vadd.f32 %v1449_v63, %v1368_v31 }
 0x389   :  { %v1501_v14 = vadd.f32 %v5612_v62, %v1481_v7 }
 0x38a   :  { %v5709_v25 = vld [vmem:[#allocation3 + $0x28] sm:$0xff] }
 0x38b   :  { %1548 = vrot.lane.b32.xlu0 %v1501_v14, %s4588_s7  ;;  %v1642_v30 = vmul.f32 %v5709_v25, %v5709_v25  ;;  %v1609_v8 = vsel %vm1599_vm15, %v5709_v25, 0.0 }
 0x38c   :  { %v1519_v26 = vpop.permute.xlu0 %1518  ;;  %v1527_v44 = vpop.permute.xlu1 %1526  ;;  %v5679_v1 = vld [vmem:[#allocation3 + $0x8] sm:$0xff] }
 0x38d   :  { %1567 = vst.msk [vmem:[#allocation3] sm:$0xff] %vm1566_vm14, %v1519_v26  ;;  %v1638_v51 = vmul.f32 %v5679_v1, %v5679_v1  ;;  %v1601_v34 = vsel %vm1599_vm15, %v5679_v1, 0.0  ;;  %v1662_v21 = vsel %vm1599_vm15, %v1642_v30, 0.0 }
 0x38e   :  { %1571 = vst.msk [vmem:[#allocation3 + $0x20] sm:$0xff] %vm1566_vm14, %v1527_v44 }
 0x38f   :  { %v1654_v17 = vsel %vm1599_vm15, %v1638_v51, 0.0 }
 0x394   :  { %v5676_v46 = vld [vmem:[#allocation3] sm:$0xff] }
 0x395   :  { %v1637_v3 = vmul.f32 %v5676_v46, %v5676_v46  ;;  %v1600_v35 = vsel %vm1599_vm15, %v5676_v46, 0.0  ;;  %v5703_v15 = vld [vmem:[#allocation3 + $0x20] sm:$0xff] }
 0x396   :  { %v1602_v18 = vadd.f32 %v1601_v34, %v1600_v35  ;;  %v1641_v2 = vmul.f32 %v5703_v15, %v5703_v15  ;;  %v1607_v61 = vsel %vm1599_vm15, %v5703_v15, 0.0 }
 0x397   :  { %v1653_v0 = vsel %vm1599_vm15, %v1637_v3, 0.0 }
 0x398   :  { %v1655_v32 = vadd.f32 %v1654_v17, %v1653_v0  ;;  %v1604_v5 = vadd.f32 %v1603_v4, %v1602_v18  ;;  %v1660_v45 = vsel %vm1599_vm15, %v1641_v2, 0.0 }
 0x399   :  { %v1525_v47 = vpop.permute.xlu0 %1524 }
 0x39a   :  { %1570 = vst.msk [vmem:[#allocation3 + $0x18] sm:$0xff] %vm1566_vm14, %v1525_v47  ;;  %v1657_v9 = vadd.f32 %v1656_v11, %v1655_v32 }
 0x3a1   :  { %v1533_v43 = vpop.permute.xlu1 %1532  ;;  %v5689_v60 = vld [vmem:[#allocation3 + $0x18] sm:$0xff] }
 0x3a2   :  { %1574 = vst.msk [vmem:[#allocation3 + $0x38] sm:$0xff] %vm1566_vm14, %v1533_v43  ;;  %v1535_v20 = vpop.permute.xlu2 %1534  ;;  %v1640_v16 = vmul.f32 %v5689_v60, %v5689_v60  ;;  %v1605_v41 = vsel %vm1599_vm15, %v5689_v60, 0.0 }
 0x3a3   :  { %1575 = vst.msk [vmem:[#allocation3 + $0x40] sm:$0xff] %vm1566_vm14, %v1535_v20  ;;  %v1606_v6 = vadd.f32 %v1605_v41, %v1604_v5 }
 0x3a4   :  { %v1658_v28 = vsel %vm1599_vm15, %v1640_v16, 0.0 }
 0x3a5   :  { %v1659_v54 = vadd.f32 %v1658_v28, %v1657_v9  ;;  %v1608_v40 = vadd.f32 %v1607_v61, %v1606_v6 }
 0x3a7   :  { %v1661_v12 = vadd.f32 %v1660_v45, %v1659_v54  ;;  %v1610_v13 = vadd.f32 %v1609_v8, %v1608_v40 }
 0x3a9   :  { %v1531_v62 = vpop.permute.xlu0 %1530  ;;  %v5726_v58 = vld [vmem:[#allocation3 + $0x38] sm:$0xff]  ;;  %v1663_v29 = vadd.f32 %v1662_v21, %v1661_v12 }
 0x3aa   :  { %1573 = vst.msk [vmem:[#allocation3 + $0x30] sm:$0xff] %vm1566_vm14, %v1531_v62  ;;  %v1644_v42 = vmul.f32 %v5726_v58, %v5726_v58  ;;  %v5736_v56 = vld [vmem:[#allocation3 + $0x40] sm:$0xff]  ;;  %v1613_v22 = vsel %vm1599_vm15, %v5726_v58, 0.0 }
 0x3ab   :  { %v1645_v31 = vmul.f32 %v5736_v56, %v5736_v56  ;;  %v1615_v38 = vsel %vm1599_vm15, %v5736_v56, 0.0 }
 0x3ac   :  { %v1666_v14 = vsel %vm1599_vm15, %v1644_v42, 0.0 }
 0x3ad   :  { %v1668_v43 = vsel %vm1599_vm15, %v1645_v31, 0.0 }
 0x3b1   :  { %v5711_v33 = vld [vmem:[#allocation3 + $0x30] sm:$0xff] }
 0x3b2   :  { %v1643_v50 = vmul.f32 %v5711_v33, %v5711_v33  ;;  %v1611_v59 = vsel %vm1599_vm15, %v5711_v33, 0.0 }
 0x3b3   :  { %v1612_v63 = vadd.f32 %v1611_v59, %v1610_v13 }
 0x3b4   :  { %v1664_v37 = vsel %vm1599_vm15, %v1643_v50, 0.0 }
 0x3b5   :  { %v1665_v36 = vadd.f32 %v1664_v37, %v1663_v29  ;;  %v1614_v27 = vadd.f32 %v1613_v22, %v1612_v63 }
 0x3b7   :  { %v1667_v39 = vadd.f32 %v1666_v14, %v1665_v36  ;;  %v1616_v47 = vadd.f32 %v1615_v38, %v1614_v27 }
 0x3c1   :  { %v1539_v23 = vpop.permute.xlu1 %1538 }
 0x3c2   :  { %1577 = vst.msk [vmem:[#allocation3 + $0x50] sm:$0xff] %vm1566_vm14, %v1539_v23  ;;  %v1541_v55 = vpop.permute.xlu2 %1540  ;;  %v1669_v23 = vadd.f32 %v1668_v43, %v1667_v39 }
 0x3c3   :  { %1578 = vst.msk [vmem:[#allocation3 + $0x58] sm:$0xff] %vm1566_vm14, %v1541_v55 }
 0x3c9   :  { %v1537_v49 = vpop.permute.xlu0 %1536  ;;  %v5751_v44 = vld [vmem:[#allocation3 + $0x50] sm:$0xff] }
 0x3ca   :  { %1576 = vst.msk [vmem:[#allocation3 + $0x48] sm:$0xff] %vm1566_vm14, %v1537_v49  ;;  %v1647_v49 = vmul.f32 %v5751_v44, %v5751_v44  ;;  %v5757_v55 = vld [vmem:[#allocation3 + $0x58] sm:$0xff]  ;;  %v1619_v51 = vsel %vm1599_vm15, %v5751_v44, 0.0 }
 0x3cb   :  { %v1648_v0 = vmul.f32 %v5757_v55, %v5757_v55  ;;  %v1621_v32 = vsel %vm1599_vm15, %v5757_v55, 0.0 }
 0x3cc   :  { %v1672_v53 = vsel %vm1599_vm15, %v1647_v49, 0.0 }
 0x3cd   :  { %v1674_v11 = vsel %vm1599_vm15, %v1648_v0, 0.0 }
 0x3d1   :  { %v5738_v10 = vld [vmem:[#allocation3 + $0x48] sm:$0xff] }
 0x3d2   :  { %v1646_v7 = vmul.f32 %v5738_v10, %v5738_v10  ;;  %v1617_v26 = vsel %vm1599_vm15, %v5738_v10, 0.0 }
 0x3d3   :  { %v1618_v20 = vadd.f32 %v1617_v26, %v1616_v47 }
 0x3d4   :  { %v1670_v62 = vsel %vm1599_vm15, %v1646_v7, 0.0 }
 0x3d5   :  { %v1671_v35 = vadd.f32 %v1670_v62, %v1669_v23  ;;  %v1620_v34 = vadd.f32 %v1619_v51, %v1618_v20 }
 0x3d7   :  { %v1673_v16 = vadd.f32 %v1672_v53, %v1671_v35  ;;  %v1622_v41 = vadd.f32 %v1621_v32, %v1620_v34 }
 0x3d9   :  { %v1675_v9 = vadd.f32 %v1674_v11, %v1673_v16 }
 0x3db   :  { %v1547_v52 = vpop.permute.xlu2 %1546 }
 0x3dc   :  { %1581 = vst.msk [vmem:[#allocation3 + $0x70] sm:$0xff] %vm1566_vm14, %v1547_v52 }
 0x3e1   :  { %v1545_v19 = vpop.permute.xlu1 %1544 }
 0x3e2   :  { %1580 = vst.msk [vmem:[#allocation3 + $0x68] sm:$0xff] %vm1566_vm14, %v1545_v19 }
 0x3e3   :  { %v5779_v52 = vld [vmem:[#allocation3 + $0x70] sm:$0xff] }
 0x3e4   :  { %v1651_v40 = vmul.f32 %v5779_v52, %v5779_v52  ;;  %v1627_v45 = vsel %vm1599_vm15, %v5779_v52, 0.0 }
 0x3e6   :  { %v1680_v59 = vsel %vm1599_vm15, %v1651_v40, 0.0 }
 0x3e9   :  { %v1543_v24 = vpop.permute.xlu0 %1542  ;;  %v5772_v4 = vld [vmem:[#allocation3 + $0x68] sm:$0xff] }
 0x3ea   :  { %1579 = vst.msk [vmem:[#allocation3 + $0x60] sm:$0xff] %vm1566_vm14, %v1543_v24  ;;  %v1650_v2 = vmul.f32 %v5772_v4, %v5772_v4  ;;  %v1625_v19 = vsel %vm1599_vm15, %v5772_v4, 0.0 }
 0x3ec   :  { %v1678_v30 = vsel %vm1599_vm15, %v1650_v2, 0.0 }
 0x3f1   :  { %v5759_v3 = vld [vmem:[#allocation3 + $0x60] sm:$0xff] }
 0x3f2   :  { %v1649_v18 = vmul.f32 %v5759_v3, %v5759_v3  ;;  %v1623_v17 = vsel %vm1599_vm15, %v5759_v3, 0.0 }
 0x3f3   :  { %v1624_v6 = vadd.f32 %v1623_v17, %v1622_v41  ;;  %v1722_v17 = vld [vmem:[%s7304_s8] sm:$0x1] }
 0x3f4   :  { %v1676_v5 = vsel %vm1599_vm15, %v1649_v18, 0.0 }
 0x3f5   :  { %v1677_v54 = vadd.f32 %v1676_v5, %v1675_v9  ;;  %v1626_v61 = vadd.f32 %v1625_v19, %v1624_v6 }
 0x3f7   :  { %v1679_v50 = vadd.f32 %v1678_v30, %v1677_v54  ;;  %v1628_v8 = vadd.f32 %v1627_v45, %v1626_v61 }
 0x3f9   :  { %v1681_v37 = vadd.f32 %v1680_v59, %v1679_v50 }
 0x3fd   :  { %v1549_v28 = vpop.permute.xlu0 %1548 }
 0x3fe   :  { %1582 = vst.msk [vmem:[#allocation3 + $0x78] sm:$0xff] %vm1566_vm14, %v1549_v28  ;;  %v5810_v28 = vld [vmem:[%s7267_s10] ss:$0 sm:$0xff] }
 0x405   :  { %v5788_v12 = vld [vmem:[#allocation3 + $0x78] sm:$0xff] }
 0x406   :  { %v1629_v13 = vsel %vm1599_vm15, %v5788_v12, 0.0  ;;  %v1652_v48 = vmul.f32 %v5788_v12, %v5788_v12 }
 0x407   :  { %v1630_v21 = vadd.f32 %v1629_v13, %v1628_v8 }
 0x408   :  { %v1682_v24 = vsel %vm1599_vm15, %v1652_v48, 0.0 }
 0x409   :  { %v1631_v63 = vrot.slane %v1630_v21, 4  ;;  %v1683_v29 = vadd.f32 %v1682_v24, %v1681_v37 }
 0x40b   :  { %v1632_v42 = vadd.f32 %v1631_v63, %v1630_v21  ;;  %v1684_v36 = vrot.slane %v1683_v29, 4 }
 0x40d   :  { %v1633_v22 = vrot.slane %v1632_v42, 2  ;;  %v1685_v27 = vadd.f32 %v1684_v36, %v1683_v29 }
 0x40f   :  { %v1634_v31 = vadd.f32 %v1633_v22, %v1632_v42  ;;  %v1686_v7 = vrot.slane %v1685_v27, 2 }
 0x411   :  { %v1635_v14 = vrot.slane %v1634_v31, 1  ;;  %v1687_v39 = vadd.f32 %v1686_v7, %v1685_v27 }
 0x413   :  { %v1636_v38 = vadd.f32 %v1635_v14, %v1634_v31  ;;  %v1688_v26 = vrot.slane %v1687_v39, 1 }
 0x415   :  { %v1689_v47 = vadd.f32 %v1688_v26, %v1687_v39  ;;  %v5796_v43 = vmul.f32 0.0078125, %v1636_v38 }
 0x417   :  { %v1691_v62 = vmul.f32 0.0078125, %v1689_v47  ;;  %v1692_v20 = vmul.f32 %v5796_v43, %v5796_v43  ;;  %v1695_v5 = vsub.f32 %v5676_v46, %v5796_v43  ;;  %v1703_v6 = vsub.f32 %v5736_v56, %v5796_v43 }
 0x418   :  { %v1696_v46 = vsub.f32 %v5679_v1, %v5796_v43  ;;  %v1704_v61 = vsub.f32 %v5738_v10, %v5796_v43  ;;  %v1697_v1 = vsub.f32 %v5687_v57, %v5796_v43  ;;  %v1705_v10 = vsub.f32 %v5751_v44, %v5796_v43 }
 0x419   :  { %v1693_v23 = vsub.f32 %v1691_v62, %v1692_v20  ;;  %v1698_v57 = vsub.f32 %v5689_v60, %v5796_v43  ;;  %v1706_v44 = vsub.f32 %v5757_v55, %v5796_v43  ;;  %v1699_v60 = vsub.f32 %v5703_v15, %v5796_v43 }
 0x41a   :  { %v1707_v55 = vsub.f32 %v5759_v3, %v5796_v43  ;;  %v1700_v15 = vsub.f32 %v5709_v25, %v5796_v43  ;;  %v1708_v3 = vsub.f32 %v5772_v4, %v5796_v43  ;;  %v1701_v25 = vsub.f32 %v5711_v33, %v5796_v43 }
 0x41b   :  { %v1694_v49 = vmax.f32 %v1693_v23, 0.0  ;;  %v1709_v4 = vsub.f32 %v5779_v52, %v5796_v43  ;;  %v1702_v33 = vsub.f32 %v5726_v58, %v5796_v43  ;;  %v1710_v52 = vsub.f32 %v5788_v12, %v5796_v43 }
 0x41d   :  { %v1711_v35 = vadd.f32 1e-05, %v1694_v49 }
 0x41f   :  { %4549 = vrsqrt.f32 %v1711_v35  ;;  %vm1718_vm2 = vweird.f32 %v1711_v35 }
 0x425   :  { %v4550_v51 = vpop.eup %4549 }
 0x426   :  { %v1713_v34 = vmul.f32 %v4550_v51, %v1711_v35  ;;  %vm1719_vm1 = vweird.f32 %v4550_v51 }
 0x427   :  { %vm1720_vm3 = vmor %vm1718_vm2, %vm1719_vm1 }
 0x428   :  { %v1714_v0 = vmul.f32 %v4550_v51, %v1713_v34 }
 0x42a   :  { %v1715_v18 = vmul.f32 0.5, %v1714_v0 }
 0x42c   :  { %v1716_v53 = vsub.f32 1.5, %v1715_v18 }
 0x42e   :  { %v1717_v16 = vmul.f32 %v4550_v51, %v1716_v53 }
 0x430   :  { %v1721_v32 = vsel %vm1720_vm3, %v4550_v51, %v1717_v16 }
 0x431   :  { %v1723_v41 = vmul.f32 %v1722_v17, %v1721_v32 }
 0x433   :  { %v5805_v11 = vperm.slane %v1723_v41, 0 }
 0x435   :  { %v1725_v9 = vmul.f32 %v5805_v11, %v1695_v5  ;;  %v1733_v2 = vmul.f32 %v5805_v11, %v1703_v6  ;;  %v1726_v50 = vmul.f32 %v5805_v11, %v1696_v46  ;;  %v1734_v56 = vmul.f32 %v5805_v11, %v1704_v61 }
 0x436   :  { %v1727_v48 = vmul.f32 %v5805_v11, %v1697_v1  ;;  %v1735_v21 = vmul.f32 %v5805_v11, %v1705_v10  ;;  %v1728_v42 = vmul.f32 %v5805_v11, %v1698_v57  ;;  %v1736_v36 = vmul.f32 %v5805_v11, %v1706_v44 }
 0x437   :  { %v1745_v54 = vadd.f32 %v5810_v28, %v1725_v9  ;;  %v1753_v19 = vadd.f32 %v5810_v28, %v1733_v2  ;;  %v1746_v45 = vadd.f32 %v5810_v28, %v1726_v50  ;;  %v1754_v8 = vadd.f32 %v5810_v28, %v1734_v56  ;;  %v5893_v50 = vld [vmem:[%s7269_s12] ss:$0 sm:$0xff] }
 0x438   :  { %v1747_v37 = vadd.f32 %v5810_v28, %v1727_v48  ;;  %v1755_v24 = vadd.f32 %v5810_v28, %v1735_v21  ;;  %v1748_v22 = vadd.f32 %v5810_v28, %v1728_v42  ;;  %v1756_v27 = vadd.f32 %v5810_v28, %v1736_v36 }
 0x439   :  { %v1761_v40 = vmax.f32 %v1745_v54, 0.0  ;;  %v1769_v30 = vmax.f32 %v1753_v19, 0.0  ;;  %v1762_v59 = vmax.f32 %v1746_v45, 0.0  ;;  %v1770_v13 = vmax.f32 %v1754_v8, 0.0 }
 0x43a   :  { %v1763_v63 = vmax.f32 %v1747_v37, 0.0  ;;  %v1771_v29 = vmax.f32 %v1755_v24, 0.0  ;;  %v1764_v31 = vmax.f32 %v1748_v22, 0.0  ;;  %v1772_v7 = vmax.f32 %v1756_v27, 0.0 }
 0x43b   :  { %4456 = vmatmul.msk.f32.vlgmr.msra.gmra.mxu2 %vm1599_vm15, %v1761_v40  ;;  %4464 = vmatmul.msk.f32.vlgmr.msra.gmra.mxu3 %vm1599_vm15, %v1769_v30  ;;  %v1729_v14 = vmul.f32 %v5805_v11, %v1699_v60  ;;  %v1737_v39 = vmul.f32 %v5805_v11, %v1707_v55  ;;  %v1730_v20 = vmul.f32 %v5805_v11, %v1700_v15 }
 0x43c   :  { %v1738_v23 = vmul.f32 %v5805_v11, %v1708_v3  ;;  %v1731_v0 = vmul.f32 %v5805_v11, %v1701_v25  ;;  %v1739_v18 = vmul.f32 %v5805_v11, %v1709_v4  ;;  %v1732_v41 = vmul.f32 %v5805_v11, %v1702_v33 }
 0x43d   :  { %v1749_v38 = vadd.f32 %v5810_v28, %v1729_v14  ;;  %v1757_v26 = vadd.f32 %v5810_v28, %v1737_v39  ;;  %v1750_v49 = vadd.f32 %v5810_v28, %v1730_v20  ;;  %v1740_v5 = vmul.f32 %v5805_v11, %v1710_v52 }
 0x43e   :  { %v1758_v35 = vadd.f32 %v5810_v28, %v1738_v23  ;;  %v1751_v53 = vadd.f32 %v5810_v28, %v1731_v0  ;;  %v1759_v16 = vadd.f32 %v5810_v28, %v1739_v18  ;;  %v1752_v6 = vadd.f32 %v5810_v28, %v1732_v41 }
 0x43f   :  { %v1765_v47 = vmax.f32 %v1749_v38, 0.0  ;;  %v1773_v62 = vmax.f32 %v1757_v26, 0.0  ;;  %v1766_v51 = vmax.f32 %v1750_v49, 0.0  ;;  %v1760_v9 = vadd.f32 %v5810_v28, %v1740_v5 }
 0x440   :  { %v1774_v34 = vmax.f32 %v1758_v35, 0.0  ;;  %v1767_v17 = vmax.f32 %v1751_v53, 0.0  ;;  %v1775_v32 = vmax.f32 %v1759_v16, 0.0  ;;  %v1768_v2 = vmax.f32 %v1752_v6, 0.0 }
 0x441   :  { %v1776_v54 = vmax.f32 %v1760_v9, 0.0 }
 0x443   :  { %4457 = vmatmul.msk.f32.gmra.mxu2 %vm1599_vm15, %v1762_v59  ;;  %4465 = vmatmul.msk.f32.gmra.mxu3 %vm1599_vm15, %v1770_v13 }
 0x44b   :  { %4458 = vmatmul.msk.f32.gmra.mxu2 %vm1599_vm15, %v1763_v63  ;;  %4466 = vmatmul.msk.f32.gmra.mxu3 %vm1599_vm15, %v1771_v29 }
 0x453   :  { %4459 = vmatmul.msk.f32.gmra.mxu2 %vm1599_vm15, %v1764_v31  ;;  %4467 = vmatmul.msk.f32.gmra.mxu3 %vm1599_vm15, %v1772_v7 }
 0x45b   :  { %4460 = vmatmul.msk.f32.gmra.mxu2 %vm1599_vm15, %v1765_v47  ;;  %4468 = vmatmul.msk.f32.gmra.mxu3 %vm1599_vm15, %v1773_v62 }
 0x463   :  { %4461 = vmatmul.msk.f32.gmra.mxu2 %vm1599_vm15, %v1766_v51  ;;  %4469 = vmatmul.msk.f32.gmra.mxu3 %vm1599_vm15, %v1774_v34 }
 0x46b   :  { %4462 = vmatmul.msk.f32.gmra.mxu2 %vm1599_vm15, %v1767_v17  ;;  %4470 = vmatmul.msk.f32.gmra.mxu3 %vm1599_vm15, %v1775_v32 }
 0x473   :  { %4463 = vmatmul.msk.f32.gmra.mxu2 %vm1599_vm15, %v1768_v2  ;;  %4471 = vmatmul.msk.f32.gmra.mxu3 %vm1599_vm15, %v1776_v54 }
 0x4be   :  { %v1847_v58 = vpop.f32.mrf.mxu2  ;;  %v1871_v12 = vpop.f32.mrf.mxu3 }
 0x4bf   :  { %v5901_v45 = vadd.f32 %v5893_v50, %v1847_v58  ;;  %v5950_v25 = vadd.f32 %v5893_v50, %v1871_v12 }
 0x4c1   :  { %v1932_v13 = vmul.f32 %v5901_v45, %v5901_v45  ;;  %v1895_v24 = vsel %vm481_vm5, %v5901_v45, 0.0  ;;  %v1940_v41 = vmul.f32 %v5950_v25, %v5950_v25  ;;  %v1910_v58 = vsel %vm481_vm5, %v5950_v25, 0.0 }
 0x4c3   :  { %v1948_v36 = vsel %vm481_vm5, %v1932_v13, 0.0 }
 0x4c6   :  { %v1850_v43 = vpop.f32.mrf.mxu2  ;;  %v1874_v19 = vpop.f32.mrf.mxu3 }
 0x4c7   :  { %v5898_v56 = vadd.f32 %v5893_v50, %v1850_v43  ;;  %v5956_v16 = vadd.f32 %v5893_v50, %v1874_v19 }
 0x4c9   :  { %v1933_v10 = vmul.f32 %v5898_v56, %v5898_v56  ;;  %v1896_v48 = vsel %vm481_vm5, %v5898_v56, 0.0  ;;  %v1941_v12 = vmul.f32 %v5956_v16, %v5956_v16 }
 0x4ca   :  { %v1897_v22 = vadd.f32 %v1896_v48, %v1895_v24 }
 0x4cb   :  { %v1949_v44 = vsel %vm481_vm5, %v1933_v10, 0.0 }
 0x4cc   :  { %v1950_v14 = vadd.f32 %v1949_v44, %v1948_v36 }
 0x4ce   :  { %v1853_v46 = vpop.f32.mrf.mxu2  ;;  %v1877_v11 = vpop.f32.mrf.mxu3 }
 0x4cf   :  { %v5904_v1 = vadd.f32 %v5893_v50, %v1853_v46  ;;  %v5965_v5 = vadd.f32 %v5893_v50, %v1877_v11 }
 0x4d1   :  { %v1934_v21 = vmul.f32 %v5904_v1, %v5904_v1  ;;  %v1898_v63 = vsel %vm481_vm5, %v5904_v1, 0.0 }
 0x4d2   :  { %v1899_v39 = vadd.f32 %v1898_v63, %v1897_v22 }
 0x4d3   :  { %v1951_v60 = vsel %vm481_vm5, %v1934_v21, 0.0  ;;  %v1914_v21 = vsel %vm481_vm5, %v5965_v5, 0.0 }
 0x4d4   :  { %v1952_v3 = vadd.f32 %v1951_v60, %v1950_v14 }
 0x4d6   :  { %v1856_v61 = vpop.f32.mrf.mxu2  ;;  %v1880_v40 = vpop.f32.mrf.mxu3 }
 0x4d7   :  { %v5909_v59 = vadd.f32 %v5893_v50, %v1856_v61  ;;  %v5976_v43 = vadd.f32 %v5893_v50, %v1880_v40  ;;  %v1963_v61 = vsel %vm481_vm5, %v1940_v41, 0.0  ;;  %v1965_v40 = vsel %vm481_vm5, %v1941_v12, 0.0 }
 0x4d9   :  { %v1935_v29 = vmul.f32 %v5909_v59, %v5909_v59  ;;  %v1900_v55 = vsel %vm481_vm5, %v5909_v59, 0.0  ;;  %v1943_v24 = vmul.f32 %v5976_v43, %v5976_v43 }
 0x4da   :  { %v1901_v47 = vadd.f32 %v1900_v55, %v1899_v39 }
 0x4db   :  { %v1953_v38 = vsel %vm481_vm5, %v1935_v29, 0.0  ;;  %v1969_v14 = vsel %vm481_vm5, %v1943_v24, 0.0 }
 0x4dc   :  { %v1954_v49 = vadd.f32 %v1953_v38, %v1952_v3 }
 0x4de   :  { %v1859_v30 = vpop.f32.mrf.mxu2  ;;  %v5895_v28 = vpop.f32.mrf.mxu3 }
 0x4df   :  { %v5918_v37 = vadd.f32 %v5893_v50, %v1859_v30  ;;  %v1912_v30 = vsel %vm481_vm5, %v5956_v16, 0.0  ;;  %v5986_v10 = vadd.f32 %v5893_v50, %v5895_v28  ;;  %v1916_v28 = vsel %vm481_vm5, %v5976_v43, 0.0 }
 0x4e1   :  { %v1936_v31 = vmul.f32 %v5918_v37, %v5918_v37  ;;  %v1902_v26 = vsel %vm481_vm5, %v5918_v37, 0.0 }
 0x4e2   :  { %v1903_v35 = vadd.f32 %v1902_v26, %v1901_v47 }
 0x4e3   :  { %v1955_v62 = vsel %vm481_vm5, %v1936_v31, 0.0 }
 0x4e4   :  { %v1956_v34 = vadd.f32 %v1955_v62, %v1954_v49 }
 0x4e6   :  { %v1862_v8 = vpop.f32.mrf.mxu2  ;;  %v1886_v57 = vpop.f32.mrf.mxu3 }
 0x4e7   :  { %v5928_v42 = vadd.f32 %v5893_v50, %v1862_v8  ;;  %v1942_v8 = vmul.f32 %v5965_v5, %v5965_v5  ;;  %v5994_v44 = vadd.f32 %v5893_v50, %v1886_v57  ;;  %v1918_v57 = vsel %vm481_vm5, %v5986_v10, 0.0 }
 0x4e9   :  { %v1937_v15 = vmul.f32 %v5928_v42, %v5928_v42  ;;  %v1904_v20 = vsel %vm481_vm5, %v5928_v42, 0.0  ;;  %v1967_v22 = vsel %vm481_vm5, %v1942_v8, 0.0  ;;  %v1945_v39 = vmul.f32 %v5994_v44, %v5994_v44 }
 0x4ea   :  { %v1905_v0 = vadd.f32 %v1904_v20, %v1903_v35  ;;  %v1920_v47 = vsel %vm481_vm5, %v5994_v44, 0.0 }
 0x4eb   :  { %v1957_v4 = vsel %vm481_vm5, %v1937_v15, 0.0  ;;  %v1973_v49 = vsel %vm481_vm5, %v1945_v39, 0.0 }
 0x4ec   :  { %v1958_v17 = vadd.f32 %v1957_v4, %v1956_v34 }
 0x4ee   :  { %v1865_v27 = vpop.f32.mrf.mxu2  ;;  %v1889_v18 = vpop.f32.mrf.mxu3 }
 0x4ef   :  { %v5937_v7 = vadd.f32 %v5893_v50, %v1865_v27  ;;  %v1944_v27 = vmul.f32 %v5986_v10, %v5986_v10  ;;  %v6002_v60 = vadd.f32 %v5893_v50, %v1889_v18 }
 0x4f1   :  { %v1938_v23 = vmul.f32 %v5937_v7, %v5937_v7  ;;  %v1906_v51 = vsel %vm481_vm5, %v5937_v7, 0.0  ;;  %v1971_v3 = vsel %vm481_vm5, %v1944_v27, 0.0  ;;  %v1946_v62 = vmul.f32 %v6002_v60, %v6002_v60 }
 0x4f2   :  { %v1907_v32 = vadd.f32 %v1906_v51, %v1905_v0  ;;  %v1922_v35 = vsel %vm481_vm5, %v6002_v60, 0.0 }
 0x4f3   :  { %v1959_v33 = vsel %vm481_vm5, %v1938_v23, 0.0  ;;  %v1975_v34 = vsel %vm481_vm5, %v1946_v62, 0.0  ;;  %v4539_v62 = vld [vmem:[%s7271_s14] ss:$0 sm:$0xff] }
 0x4f4   :  { %v1960_v2 = vadd.f32 %v1959_v33, %v1958_v17 }
 0x4f6   :  { %v1868_v53 = vpop.f32.mrf.mxu2  ;;  %v1892_v36 = vpop.f32.mrf.mxu3 }
 0x4f7   :  { %v5960_v52 = vadd.f32 %v5893_v50, %v1868_v53  ;;  %v6010_v38 = vadd.f32 %v5893_v50, %v1892_v36 }
 0x4f9   :  { %v1908_v6 = vsel %vm481_vm5, %v5960_v52, 0.0  ;;  %v1939_v9 = vmul.f32 %v5960_v52, %v5960_v52  ;;  %v1947_v50 = vmul.f32 %v6010_v38, %v6010_v38  ;;  %v1924_v0 = vsel %vm481_vm5, %v6010_v38, 0.0 }
 0x4fa   :  { %v1909_v54 = vadd.f32 %v1908_v6, %v1907_v32 }
 0x4fb   :  { %v1961_v19 = vsel %vm481_vm5, %v1939_v9, 0.0  ;;  %v1977_v33 = vsel %vm481_vm5, %v1947_v50, 0.0 }
 0x4fc   :  { %v1911_v46 = vadd.f32 %v1910_v58, %v1909_v54  ;;  %v1962_v11 = vadd.f32 %v1961_v19, %v1960_v2 }
 0x4fe   :  { %v1913_v13 = vadd.f32 %v1912_v30, %v1911_v46  ;;  %v1964_v48 = vadd.f32 %v1963_v61, %v1962_v11  ;;  %v2073_v61 = vld [vmem:[%s7272_s15 + $0x8] sm:$0xff]  ;;  %v2072_v30 = vld [vmem:[%s7272_s15] sm:$0xff] }
 0x4ff   :  { %2136 = vmatpush.msrb.mxu3 %v2073_v61 }
 0x500   :  { %v1915_v63 = vadd.f32 %v1914_v21, %v1913_v13  ;;  %v1966_v29 = vadd.f32 %v1965_v40, %v1964_v48 }
 0x501   :  { %2137 = vmatpush.msrb.mxu3 %v2072_v30 }
 0x502   :  { %v1968_v55 = vadd.f32 %v1967_v22, %v1966_v29  ;;  %v1917_v31 = vadd.f32 %v1916_v28, %v1915_v63 }
 0x504   :  { %v1919_v26 = vadd.f32 %v1918_v57, %v1917_v31  ;;  %v1970_v15 = vadd.f32 %v1969_v14, %v1968_v55 }
 0x506   :  { %v1921_v20 = vadd.f32 %v1920_v47, %v1919_v26  ;;  %v1972_v23 = vadd.f32 %v1971_v3, %v1970_v15 }
 0x508   :  { %v1923_v4 = vadd.f32 %v1922_v35, %v1921_v20  ;;  %v1974_v51 = vadd.f32 %v1973_v49, %v1972_v23 }
 0x50a   :  { %v1925_v18 = vadd.f32 %v1924_v0, %v1923_v4  ;;  %v1976_v53 = vadd.f32 %v1975_v34, %v1974_v51 }
 0x50c   :  { %v1926_v17 = vrot.slane %v1925_v18, 4  ;;  %v1978_v32 = vadd.f32 %v1977_v33, %v1976_v53 }
 0x50e   :  { %v1927_v41 = vadd.f32 %v1926_v17, %v1925_v18  ;;  %v1979_v6 = vrot.slane %v1978_v32, 4 }
 0x510   :  { %v1928_v9 = vrot.slane %v1927_v41, 2  ;;  %v1980_v2 = vadd.f32 %v1979_v6, %v1978_v32 }
 0x512   :  { %v1929_v54 = vadd.f32 %v1928_v9, %v1927_v41  ;;  %v1981_v58 = vrot.slane %v1980_v2, 2 }
 0x514   :  { %v1930_v12 = vrot.slane %v1929_v54, 1  ;;  %v1982_v19 = vadd.f32 %v1981_v58, %v1980_v2 }
 0x516   :  { %v1931_v46 = vadd.f32 %v1930_v12, %v1929_v54  ;;  %v1983_v11 = vrot.slane %v1982_v19, 1 }
 0x518   :  { %v1984_v8 = vadd.f32 %v1983_v11, %v1982_v19  ;;  %v6032_v13 = vmul.f32 0.0078125, %v1931_v46 }
 0x51a   :  { %v1986_v48 = vmul.f32 0.0078125, %v1984_v8  ;;  %v1987_v40 = vmul.f32 %v6032_v13, %v6032_v13  ;;  %v2005_v21 = vsub.f32 %v6010_v38, %v6032_v13  ;;  %v1995_v63 = vsub.f32 %v5928_v42, %v6032_v13 }
 0x51b   :  { %v1996_v29 = vsub.f32 %v5937_v7, %v6032_v13  ;;  %v1997_v36 = vsub.f32 %v5960_v52, %v6032_v13  ;;  %v2002_v28 = vsub.f32 %v5986_v10, %v6032_v13  ;;  %v2003_v27 = vsub.f32 %v5994_v44, %v6032_v13  ;;  %v2017_v10 = vld [vmem:[%s7270_s13] sm:$0x1] }
 0x51c   :  { %v1988_v24 = vsub.f32 %v1986_v48, %v1987_v40  ;;  %v2004_v55 = vsub.f32 %v6002_v60, %v6032_v13  ;;  %v1990_v60 = vsub.f32 %v5901_v45, %v6032_v13  ;;  %v1991_v20 = vsub.f32 %v5898_v56, %v6032_v13  ;;  %v2329_v52 = vld [vmem:[#allocation2 + $0x120] sm:$0xff] }
 0x51d   :  { %v1998_v50 = vsub.f32 %v5950_v25, %v6032_v13  ;;  %v1999_v51 = vsub.f32 %v5956_v16, %v6032_v13  ;;  %v2000_v45 = vsub.f32 %v5965_v5, %v6032_v13  ;;  %v2001_v34 = vsub.f32 %v5976_v43, %v6032_v13  ;;  %2375 = vrot.lane.b32.xlu0 %v2329_v52, %s4584_s9 }
 0x51e   :  { %v1989_v22 = vmax.f32 %v1988_v24, 0.0  ;;  %v1992_v43 = vsub.f32 %v5904_v1, %v6032_v13  ;;  %v1993_v61 = vsub.f32 %v5909_v59, %v6032_v13  ;;  %v1994_v40 = vsub.f32 %v5918_v37, %v6032_v13 }
 0x520   :  { %v2006_v31 = vadd.f32 1e-05, %v1989_v22 }
 0x522   :  { %4551 = vrsqrt.f32 %v2006_v31  ;;  %vm2013_vm6 = vweird.f32 %v2006_v31 }
 0x528   :  { %v4552_v14 = vpop.eup %4551 }
 0x529   :  { %v2008_v57 = vmul.f32 %v4552_v14, %v2006_v31  ;;  %vm2014_vm4 = vweird.f32 %v4552_v14 }
 0x52a   :  { %vm2015_vm7 = vmor %vm2013_vm6, %vm2014_vm4 }
 0x52b   :  { %v2009_v39 = vmul.f32 %v4552_v14, %v2008_v57 }
 0x52d   :  { %v2010_v38 = vmul.f32 0.5, %v2009_v39 }
 0x52f   :  { %v2011_v26 = vsub.f32 1.5, %v2010_v38  ;;  %v2330_v38 = vld [vmem:[#allocation2 + $0x130] sm:$0xff] }
 0x530   :  { %2377 = vrot.lane.b32.xlu0 %v2330_v38, %s4584_s9 }
 0x531   :  { %v2012_v15 = vmul.f32 %v4552_v14, %v2011_v26 }
 0x533   :  { %v2016_v3 = vsel %vm2015_vm7, %v4552_v14, %v2012_v15  ;;  %v2553_v15 = vld [vmem:[#allocation2 + $0x128] sm:$0x3] }
 0x534   :  { %v2018_v44 = vmul.f32 %v2017_v10, %v2016_v3  ;;  %2599 = vrot.lane.b32.xlu2 %v2553_v15, %s4584_s9 }
 0x536   :  { %v2019_v47 = vperm.slane %v2018_v44, 0 }
 0x538   :  { %v2020_v23 = vmul.f32 %v2019_v47, %v1990_v60  ;;  %v2021_v49 = vmul.f32 %v2019_v47, %v1991_v20  ;;  %v2028_v56 = vmul.f32 %v2019_v47, %v1998_v50  ;;  %v2029_v18 = vmul.f32 %v2019_v47, %v1999_v51 }
 0x539   :  { %v2030_v53 = vmul.f32 %v2019_v47, %v2000_v45  ;;  %v2031_v33 = vmul.f32 %v2019_v47, %v2001_v34  ;;  %v2032_v17 = vmul.f32 %v2019_v47, %v2002_v28  ;;  %v2033_v32 = vmul.f32 %v2019_v47, %v2003_v27 }
 0x53a   :  { %v2040_v35 = vadd.f32 %v4539_v62, %v2020_v23  ;;  %v2041_v0 = vadd.f32 %v4539_v62, %v2021_v49  ;;  %v2034_v25 = vmul.f32 %v2019_v47, %v2004_v55  ;;  %v2035_v41 = vmul.f32 %v2019_v47, %v2005_v21 }
 0x53b   :  { %v2048_v6 = vadd.f32 %v4539_v62, %v2028_v56  ;;  %v2049_v9 = vadd.f32 %v4539_v62, %v2029_v18  ;;  %v2050_v16 = vadd.f32 %v4539_v62, %v2030_v53  ;;  %v2051_v2 = vadd.f32 %v4539_v62, %v2031_v33 }
 0x53c   :  { %v2056_v4 = vmax.f32 %v2040_v35, 0.0  ;;  %v2052_v54 = vadd.f32 %v4539_v62, %v2032_v17  ;;  %v2053_v5 = vadd.f32 %v4539_v62, %v2033_v32  ;;  %v2054_v58 = vadd.f32 %v4539_v62, %v2034_v25 }
 0x53d   :  { %v2055_v12 = vadd.f32 %v4539_v62, %v2035_v41  ;;  %v2057_v19 = vmax.f32 %v2041_v0, 0.0  ;;  %v2022_v46 = vmul.f32 %v2019_v47, %v1992_v43  ;;  %v2023_v8 = vmul.f32 %v2019_v47, %v1993_v61 }
 0x53e   :  { %4472 = vmatmul.msk.f32.vlgmr.msrb.gmra.mxu3 %vm481_vm5, %v2056_v4  ;;  %v2024_v24 = vmul.f32 %v2019_v47, %v1994_v40  ;;  %v2025_v28 = vmul.f32 %v2019_v47, %v1995_v63  ;;  %v2026_v55 = vmul.f32 %v2019_v47, %v1996_v29  ;;  %v2027_v14 = vmul.f32 %v2019_v47, %v1997_v36  ;;  %v2554_v36 = vld [vmem:[#allocation2 + $0x138] sm:$0x3] }
 0x53f   :  { %v2042_v11 = vadd.f32 %v4539_v62, %v2022_v46  ;;  %v2043_v48 = vadd.f32 %v4539_v62, %v2023_v8  ;;  %v2064_v57 = vmax.f32 %v2048_v6, 0.0  ;;  %v2065_v39 = vmax.f32 %v2049_v9, 0.0  ;;  %2601 = vrot.lane.b32.xlu1 %v2554_v36, %s4584_s9 }
 0x540   :  { %v2044_v1 = vadd.f32 %v4539_v62, %v2024_v24  ;;  %v2045_v59 = vadd.f32 %v4539_v62, %v2025_v28  ;;  %v2046_v37 = vadd.f32 %v4539_v62, %v2026_v55  ;;  %v2047_v42 = vadd.f32 %v4539_v62, %v2027_v14 }
 0x541   :  { %v2058_v30 = vmax.f32 %v2042_v11, 0.0  ;;  %v2059_v21 = vmax.f32 %v2043_v48, 0.0  ;;  %v2066_v7 = vmax.f32 %v2050_v16, 0.0  ;;  %v2067_v29 = vmax.f32 %v2051_v2, 0.0 }
 0x542   :  { %v2060_v22 = vmax.f32 %v2044_v1, 0.0  ;;  %v2061_v27 = vmax.f32 %v2045_v59, 0.0  ;;  %v2062_v31 = vmax.f32 %v2046_v37, 0.0  ;;  %v2063_v63 = vmax.f32 %v2047_v42, 0.0 }
 0x543   :  { %v2068_v13 = vmax.f32 %v2052_v54, 0.0  ;;  %v2069_v26 = vmax.f32 %v2053_v5, 0.0  ;;  %v2070_v10 = vmax.f32 %v2054_v58, 0.0  ;;  %v2071_v3 = vmax.f32 %v2055_v12, 0.0 }
 0x546   :  { %4473 = vmatmul.msk.f32.gmra.mxu3 %vm481_vm5, %v2057_v19 }
 0x54e   :  { %4474 = vmatmul.msk.f32.gmra.mxu3 %vm481_vm5, %v2058_v30 }
 0x556   :  { %4475 = vmatmul.msk.f32.gmra.mxu3 %vm481_vm5, %v2059_v21 }
 0x55e   :  { %4476 = vmatmul.msk.f32.gmra.mxu3 %vm481_vm5, %v2060_v22 }
 0x566   :  { %4477 = vmatmul.msk.f32.gmra.mxu3 %vm481_vm5, %v2061_v27 }
 0x56e   :  { %4478 = vmatmul.msk.f32.gmra.mxu3 %vm481_vm5, %v2062_v31 }
 0x576   :  { %4479 = vmatmul.msk.f32.gmra.mxu3 %vm481_vm5, %v2063_v63 }
 0x57e   :  { %4480 = vmatmul.msk.f32.gmra.mxu3 %vm481_vm5, %v2064_v57 }
 0x586   :  { %4481 = vmatmul.msk.f32.gmra.mxu3 %vm481_vm5, %v2065_v39 }
 0x58e   :  { %4482 = vmatmul.msk.f32.gmra.mxu3 %vm481_vm5, %v2066_v7  ;;  %v6184_v21 = vpop.permute.xlu2 %2599 }
 0x58f   :  { %v6196_v59 = vpop.permute.xlu0 %2375 }
 0x596   :  { %4483 = vmatmul.msk.f32.gmra.mxu3 %vm481_vm5, %v2067_v29 }
 0x59e   :  { %4484 = vmatmul.msk.f32.gmra.mxu3 %vm481_vm5, %v2068_v13 }
 0x5a2   :  { %v6207_v39 = vpop.permute.xlu0 %2377 }
 0x5a6   :  { %4485 = vmatmul.msk.f32.gmra.mxu3 %vm481_vm5, %v2069_v26 }
 0x5ae   :  { %4486 = vmatmul.msk.f32.gmra.mxu3 %vm481_vm5, %v2070_v10 }
 0x5b1   :  { %v6205_v14 = vpop.permute.xlu1 %2601 }
 0x5b6   :  { %4487 = vmatmul.msk.f32.gmra.mxu3 %vm481_vm5, %v2071_v3 }
 0x5c1   :  { %v2139_v44 = vpop.f32.mrf.mxu3 }
 0x5c2   :  { %2187 = vst.msk [vmem:[#allocation2 + $0x21] sm:$0xff] %vm114_vm11, %v2139_v44 }
 0x5c9   :  { %v2142_v47 = vpop.f32.mrf.mxu3  ;;  %v2443_v60 = vld [vmem:[#allocation2 + $0x28] sm:$0x3]  ;;  %v6104_v62 = vld [vmem:[#allocation2 + $0x20] sm:$0xff] }
 0x5ca   :  { %2188 = vst.msk [vmem:[#allocation2 + $0x31] sm:$0xff] %vm114_vm11, %v2142_v47  ;;  %2475 = vrot.lane.b32.xlu0 %v2443_v60, %s4585_s5  ;;  %2251 = vrot.lane.b32.xlu1 %v6104_v62, %s4585_s5 }
 0x5d1   :  { %v2145_v20 = vpop.f32.mrf.mxu3  ;;  %v2444_v23 = vld [vmem:[#allocation2 + $0x38] sm:$0x3]  ;;  %v6110_v49 = vld [vmem:[#allocation2 + $0x30] sm:$0xff] }
 0x5d2   :  { %2189 = vst.msk [vmem:[#allocation2 + $0x41] sm:$0xff] %vm114_vm11, %v2145_v20  ;;  %2477 = vrot.lane.b32.xlu1 %v2444_v23, %s4585_s5  ;;  %2253 = vrot.lane.b32.xlu2 %v6110_v49, %s4585_s5 }
 0x5d9   :  { %v2148_v35 = vpop.f32.mrf.mxu3  ;;  %v6116_v50 = vld [vmem:[#allocation2 + $0x40] sm:$0xff]  ;;  %v2539_v51 = vld [vmem:[#allocation2 + $0x48] sm:$0x3] }
 0x5da   :  { %2190 = vst.msk [vmem:[#allocation2 + $0x51] sm:$0xff] %vm114_vm11, %v2148_v35  ;;  %2347 = vrot.lane.b32.xlu0 %v6116_v50, %s4584_s9  ;;  %2255 = vrot.lane.b32.xlu2 %v6116_v50, %s4585_s5  ;;  %v2445_v45 = vld [vmem:[#allocation2 + $0x48] sm:$0x3] }
 0x5e1   :  { %v2151_v4 = vpop.f32.mrf.mxu3  ;;  %v6123_v34 = vld [vmem:[#allocation2 + $0x50] sm:$0xff]  ;;  %v2540_v18 = vld [vmem:[#allocation2 + $0x58] sm:$0x3] }
 0x5e2   :  { %2191 = vst.msk [vmem:[#allocation2 + $0x61] sm:$0xff] %vm114_vm11, %v2151_v4  ;;  %2571 = vrot.lane.b32.xlu0 %v2539_v51, %s4584_s9  ;;  %2479 = vrot.lane.b32.xlu2 %v2445_v45, %s4585_s5  ;;  %v2446_v17 = vld [vmem:[#allocation2 + $0x58] sm:$0x3] }
 0x5e3   :  { %2349 = vrot.lane.b32.xlu1 %v6123_v34, %s4584_s9 }
 0x5e9   :  { %v2154_v0 = vpop.f32.mrf.mxu3  ;;  %v6130_v56 = vld [vmem:[#allocation2 + $0x60] sm:$0xff]  ;;  %v2541_v33 = vld [vmem:[#allocation2 + $0x68] sm:$0x3] }
 0x5ea   :  { %2192 = vst.msk [vmem:[#allocation2 + $0x71] sm:$0xff] %vm114_vm11, %v2154_v0  ;;  %2257 = vrot.lane.b32.xlu2 %v6123_v34, %s4585_s5  ;;  %2351 = vrot.lane.b32.xlu0 %v6130_v56, %s4584_s9  ;;  %v2447_v25 = vld [vmem:[#allocation2 + $0x68] sm:$0x3] }
 0x5eb   :  { %2573 = vrot.lane.b32.xlu1 %v2540_v18, %s4584_s9  ;;  %v2428_v18 = vld [vmem:[#allocation2 + $0x18] sm:$0x3] }
 0x5f1   :  { %v2157_v53 = vpop.f32.mrf.mxu3  ;;  %v2542_v41 = vld [vmem:[#allocation2 + $0x78] sm:$0x3]  ;;  %v6146_v6 = vld [vmem:[#allocation2 + $0x70] sm:$0xff] }
 0x5f2   :  { %2193 = vst.msk [vmem:[#allocation2 + $0x81] sm:$0xff] %vm114_vm11, %v2157_v53  ;;  %2575 = vrot.lane.b32.xlu2 %v2541_v33, %s4584_s9  ;;  %2259 = vrot.lane.b32.xlu0 %v6130_v56, %s4585_s5  ;;  %v2448_v16 = vld [vmem:[#allocation2 + $0x78] sm:$0x3] }
 0x5f3   :  { %2481 = vrot.lane.b32.xlu1 %v2446_v17, %s4585_s5 }
 0x5f9   :  { %v2160_v32 = vpop.f32.mrf.mxu3  ;;  %v6150_v2 = vld [vmem:[#allocation2 + $0x80] sm:$0xff]  ;;  %v2543_v58 = vld [vmem:[#allocation2 + $0x88] sm:$0x3] }
 0x5fa   :  { %2194 = vst.msk [vmem:[#allocation2 + $0x91] sm:$0xff] %vm114_vm11, %v2160_v32  ;;  %2483 = vrot.lane.b32.xlu2 %v2447_v25, %s4585_s5  ;;  %2577 = vrot.lane.b32.xlu0 %v2542_v41, %s4584_s9  ;;  %v2449_v19 = vld [vmem:[#allocation2 + $0x88] sm:$0x3]  ;;  %v2204_v32 = vld [vmem:[#allocation2 + $0x10] sm:$0xff] }
 0x5fb   :  { %2353 = vrot.lane.b32.xlu1 %v6146_v6, %s4584_s9 }
 0x601   :  { %v2163_v9 = vpop.f32.mrf.mxu3  ;;  %v6158_v5 = vld [vmem:[#allocation2 + $0x90] sm:$0xff]  ;;  %v2544_v43 = vld [vmem:[#allocation2 + $0x98] sm:$0x3] }
 0x602   :  { %2195 = vst.msk [vmem:[#allocation2 + $0xa1] sm:$0xff] %vm114_vm11, %v2163_v9  ;;  %2485 = vrot.lane.b32.xlu0 %v2448_v16, %s4585_s5  ;;  %2355 = vrot.lane.b32.xlu2 %v6150_v2, %s4584_s9  ;;  %v2450_v11 = vld [vmem:[#allocation2 + $0x98] sm:$0x3] }
 0x603   :  { %2261 = vrot.lane.b32.xlu1 %v6146_v6, %s4585_s5 }
 0x609   :  { %v2166_v54 = vpop.f32.mrf.mxu3  ;;  %v2545_v61 = vld [vmem:[#allocation2 + $0xa8] sm:$0x3]  ;;  %v6174_v30 = vld [vmem:[#allocation2 + $0xa0] sm:$0xff] }
 0x60a   :  { %2196 = vst.msk [vmem:[#allocation2 + $0xb1] sm:$0xff] %vm114_vm11, %v2166_v54  ;;  %2263 = vrot.lane.b32.xlu2 %v6150_v2, %s4585_s5  ;;  %2357 = vrot.lane.b32.xlu0 %v6158_v5, %s4584_s9  ;;  %v2451_v48 = vld [vmem:[#allocation2 + $0xa8] sm:$0x3] }
 0x60b   :  { %2579 = vrot.lane.b32.xlu1 %v2543_v58, %s4584_s9 }
 0x611   :  { %v2169_v12 = vpop.f32.mrf.mxu3  ;;  %v6178_v40 = vld [vmem:[#allocation2 + $0xb0] sm:$0xff]  ;;  %v2546_v22 = vld [vmem:[#allocation2 + $0xb8] sm:$0x3] }
 0x612   :  { %2197 = vst.msk [vmem:[#allocation2 + $0xc1] sm:$0xff] %vm114_vm11, %v2169_v12  ;;  %2581 = vrot.lane.b32.xlu2 %v2544_v43, %s4584_s9  ;;  %2265 = vrot.lane.b32.xlu0 %v6158_v5, %s4585_s5  ;;  %v2452_v37 = vld [vmem:[#allocation2 + $0xb8] sm:$0x3]  ;;  %v2427_v12 = vld [vmem:[#allocation2 + $0x8] sm:$0x3] }
 0x613   :  { %2487 = vrot.lane.b32.xlu1 %v2449_v19, %s4585_s5 }
 0x619   :  { %v2172_v46 = vpop.f32.mrf.mxu3  ;;  %v6188_v1 = vld [vmem:[#allocation2 + $0xc0] sm:$0xff]  ;;  %v2547_v55 = vld [vmem:[#allocation2 + $0xc8] sm:$0x3] }
 0x61a   :  { %2198 = vst.msk [vmem:[#allocation2 + $0xd1] sm:$0xff] %vm114_vm11, %v2172_v46  ;;  %2489 = vrot.lane.b32.xlu2 %v2450_v11, %s4585_s5  ;;  %2583 = vrot.lane.b32.xlu0 %v2545_v61, %s4584_s9  ;;  %v2453_v63 = vld [vmem:[#allocation2 + $0xc8] sm:$0x3]  ;;  %v2203_v61 = vld [vmem:[#allocation2] sm:$0xff] }
 0x61b   :  { %2359 = vrot.lane.b32.xlu1 %v6174_v30, %s4584_s9 }
 0x621   :  { %v2175_v8 = vpop.f32.mrf.mxu3  ;;  %v2548_v57 = vld [vmem:[#allocation2 + $0xd8] sm:$0x3]  ;;  %v6212_v7 = vld [vmem:[#allocation2 + $0xd0] sm:$0xff] }
 0x622   :  { %2199 = vst.msk [vmem:[#allocation2 + $0xe1] sm:$0xff] %vm114_vm11, %v2175_v8  ;;  %2491 = vrot.lane.b32.xlu0 %v2451_v48, %s4585_s5  ;;  %2361 = vrot.lane.b32.xlu2 %v6178_v40, %s4584_s9  ;;  %v2454_v52 = vld [vmem:[#allocation2 + $0xd8] sm:$0x3] }
 0x623   :  { %2267 = vrot.lane.b32.xlu1 %v6174_v30, %s4585_s5 }
 0x629   :  { %v2178_v24 = vpop.f32.mrf.mxu3  ;;  %v6218_v13 = vld [vmem:[#allocation2 + $0xe0] sm:$0xff]  ;;  %v2549_v10 = vld [vmem:[#allocation2 + $0xe8] sm:$0x3] }
 0x62a   :  { %2200 = vst.msk [vmem:[#allocation2 + $0xf1] sm:$0xff] %vm114_vm11, %v2178_v24  ;;  %2269 = vrot.lane.b32.xlu2 %v6178_v40, %s4585_s5  ;;  %2363 = vrot.lane.b32.xlu0 %v6188_v1, %s4584_s9  ;;  %v2455_v20 = vld [vmem:[#allocation2 + $0xe8] sm:$0x3] }
 0x62b   :  { %2585 = vrot.lane.b32.xlu1 %v2546_v22, %s4584_s9 }
 0x62c   :  { %v2254_v28 = vpop.permute.xlu2 %2253 }
 0x62d   :  { %v2300_v41 = vadd.f32 %v2254_v28, %v2204_v32 }
 0x631   :  { %v2181_v27 = vpop.f32.mrf.mxu3  ;;  %v6227_v15 = vld [vmem:[#allocation2 + $0xf0] sm:$0xff]  ;;  %v2550_v60 = vld [vmem:[#allocation2 + $0xf8] sm:$0x3] }
 0x632   :  { %2201 = vst.msk [vmem:[#allocation2 + $0x101] sm:$0xff] %vm114_vm11, %v2181_v27  ;;  %2587 = vrot.lane.b32.xlu2 %v2547_v55, %s4584_s9  ;;  %2271 = vrot.lane.b32.xlu0 %v6188_v1, %s4585_s5  ;;  %v2456_v51 = vld [vmem:[#allocation2 + $0xf8] sm:$0x3] }
 0x633   :  { %2493 = vrot.lane.b32.xlu1 %v2452_v37, %s4585_s5 }
 0x634   :  { %v6203_v31 = vpop.permute.xlu2 %2255 }
 0x639   :  { %v2184_v42 = vpop.f32.mrf.mxu3  ;;  %v2551_v45 = vld [vmem:[#allocation2 + $0x108] sm:$0x3]  ;;  %v2327_v0 = vld [vmem:[#allocation2 + $0x100] sm:$0xff] }
 0x63a   :  { %2202 = vst.msk [vmem:[#allocation2 + $0x111] sm:$0xff] %vm114_vm11, %v2184_v42  ;;  %2495 = vrot.lane.b32.xlu2 %v2453_v63, %s4585_s5  ;;  %2589 = vrot.lane.b32.xlu0 %v2548_v57, %s4584_s9  ;;  %v2457_v16 = vld [vmem:[#allocation2 + $0x108] sm:$0x3] }
 0x63b   :  { %2365 = vrot.lane.b32.xlu1 %v6212_v7, %s4584_s9 }
 0x63c   :  { %v6216_v29 = vpop.permute.xlu2 %2479  ;;  %v2252_v36 = vpop.permute.xlu1 %2251 }
 0x63d   :  { %v2476_v38 = vpop.permute.xlu0 %2475  ;;  %v2299_v24 = vadd.f32 %v2252_v36, %v2203_v61 }
 0x63e   :  { %v2523_v8 = vadd.f32 %v2476_v38, %v2427_v12  ;;  %v2431_v12 = vld [vmem:[#allocation2 + $0x48] sm:$0x3] }
 0x641   :  { %v2328_v54 = vld [vmem:[#allocation2 + $0x110] sm:$0xff]  ;;  %v2552_v27 = vld [vmem:[#allocation2 + $0x118] sm:$0x3] }
 0x642   :  { %2497 = vrot.lane.b32.xlu0 %v2454_v52, %s4585_s5  ;;  %2367 = vrot.lane.b32.xlu2 %v6218_v13, %s4584_s9 }
 0x643   :  { %2273 = vrot.lane.b32.xlu1 %v6212_v7, %s4585_s5 }
 0x644   :  { %v6225_v26 = vpop.permute.xlu2 %2257  ;;  %v2478_v47 = vpop.permute.xlu1 %2477 }
 0x645   :  { %v2524_v25 = vadd.f32 %v2478_v47, %v2428_v18  ;;  %v2429_v47 = vld [vmem:[#allocation2 + $0x28] sm:$0x3] }
 0x64a   :  { %2275 = vrot.lane.b32.xlu2 %v6218_v13, %s4585_s5  ;;  %2369 = vrot.lane.b32.xlu0 %v6227_v15, %s4584_s9 }
 0x64b   :  { %2591 = vrot.lane.b32.xlu1 %v2549_v10, %s4584_s9  ;;  %v2301_v10 = vadd.f32 %v6203_v31, %v6104_v62 }
 0x64c   :  { %v2348_v3 = vpop.permute.xlu0 %2347  ;;  %v6234_v44 = vpop.permute.xlu2 %2575 }
 0x64d   :  { %v6258_v55 = vadd.f32 %v2348_v3, %v2299_v24 }
 0x64f   :  { %v2667_v38 = vrot.slane %v6258_v55, 1 }
 0x652   :  { %2593 = vrot.lane.b32.xlu2 %v2550_v60, %s4584_s9  ;;  %2277 = vrot.lane.b32.xlu0 %v6227_v15, %s4585_s5 }
 0x653   :  { %2499 = vrot.lane.b32.xlu1 %v2455_v20, %s4585_s5  ;;  %v2525_v20 = vadd.f32 %v6216_v29, %v2429_v47  ;;  %v2779_v29 = vrot.slane %v6258_v55, 2 }
 0x654   :  { %v2572_v23 = vpop.permute.xlu0 %2571  ;;  %v6240_v35 = vpop.permute.xlu2 %2483 }
 0x655   :  { %v2350_v4 = vpop.permute.xlu1 %2349  ;;  %v2619_v22 = vadd.f32 %v2572_v23, %v2523_v8 }
 0x656   :  { %v6249_v58 = vadd.f32 %v2350_v4, %v2300_v41  ;;  %v2458_v4 = vld [vmem:[#allocation2 + $0x118] sm:$0x3] }
 0x657   :  { %v2668_v63 = vrot.slane %v2619_v22, 1  ;;  %v2780_v31 = vrot.slane %v2619_v22, 2 }
 0x658   :  { %v2670_v48 = vrot.slane %v6249_v58, 1  ;;  %v2782_v36 = vrot.slane %v6249_v58, 2 }
 0x659   :  { %v2669_v60 = vsel %vm1256_vm12, %v2667_v38, %v2668_v63 }
 0x65a   :  { %2501 = vrot.lane.b32.xlu2 %v2456_v51, %s4585_s5  ;;  %2595 = vrot.lane.b32.xlu0 %v2551_v45, %s4584_s9  ;;  %v2621_v51 = vadd.f32 %v6234_v44, %v2525_v20 }
 0x65b   :  { %2371 = vrot.lane.b32.xlu1 %v2327_v0, %s4584_s9 }
 0x65c   :  { %v2352_v53 = vpop.permute.xlu0 %2351  ;;  %v6245_v33 = vpop.permute.xlu2 %2355  ;;  %v2674_v32 = vrot.slane %v2621_v51, 1  ;;  %v2786_v22 = vrot.slane %v2621_v51, 2 }
 0x65d   :  { %v2574_v17 = vpop.permute.xlu1 %2573  ;;  %v6268_v23 = vadd.f32 %v2352_v53, %v2301_v10  ;;  %v2430_v53 = vld [vmem:[#allocation2 + $0x38] sm:$0x3] }
 0x65e   :  { %v2620_v9 = vadd.f32 %v2574_v17, %v2524_v25  ;;  %v2302_v17 = vadd.f32 %v6225_v26, %v6110_v49 }
 0x65f   :  { %v2673_v18 = vrot.slane %v6268_v23, 1 }
 0x660   :  { %v2671_v46 = vrot.slane %v2620_v9, 1  ;;  %v2783_v57 = vrot.slane %v2620_v9, 2  ;;  %v2781_v9 = vsel %vm1369_vm13, %v2779_v29, %v2780_v31 }
 0x662   :  { %2503 = vrot.lane.b32.xlu0 %v2457_v16, %s4585_s5  ;;  %2373 = vrot.lane.b32.xlu2 %v2328_v54, %s4584_s9  ;;  %v2672_v28 = vsel %vm1256_vm12, %v2670_v48, %v2671_v46  ;;  %v2784_v3 = vsel %vm1369_vm13, %v2782_v36, %v2783_v57  ;;  %v2527_v46 = vadd.f32 %v6240_v35, %v2431_v12  ;;  %v2432_v48 = vld [vmem:[#allocation2 + $0x58] sm:$0x3] }
 0x663   :  { %2279 = vrot.lane.b32.xlu1 %v2327_v0, %s4585_s5 }
 0x664   :  { %v2260_v43 = vpop.permute.xlu0 %2259  ;;  %v6252_v19 = vpop.permute.xlu2 %2263 }
 0x665   :  { %v2482_v11 = vpop.permute.xlu1 %2481  ;;  %v2303_v25 = vadd.f32 %v6116_v50, %v2260_v43  ;;  %v2785_v43 = vrot.slane %v6268_v23, 2  ;;  %v2305_v29 = vadd.f32 %v6130_v56, %v6252_v19 }
 0x666   :  { %v2526_v41 = vadd.f32 %v2482_v11, %v2430_v53 }
 0x667   :  { %v6289_v49 = vadd.f32 %v6245_v33, %v2303_v25  ;;  %v2787_v63 = vsel %vm1369_vm13, %v2785_v43, %v2786_v22 }
 0x669   :  { %v2679_v35 = vrot.slane %v6289_v49, 1  ;;  %v2791_v51 = vrot.slane %v6289_v49, 2 }
 0x66a   :  { %2281 = vrot.lane.b32.xlu2 %v2328_v54, %s4585_s5  ;;  %2717 = vrot.lane.b32.xlu0 %v2672_v28, %s4586_s0  ;;  %v2675_v54 = vsel %vm1256_vm12, %v2673_v18, %v2674_v32 }
 0x66b   :  { %2597 = vrot.lane.b32.xlu1 %v2552_v27, %s4584_s9 }
 0x66c   :  { %v2578_v37 = vpop.permute.xlu0 %2577  ;;  %v2582_v42 = vpop.permute.xlu2 %2581 }
 0x66d   :  { %v2354_v52 = vpop.permute.xlu1 %2353  ;;  %v2622_v44 = vadd.f32 %v2578_v37, %v2526_v41 }
 0x66e   :  { %v6282_v16 = vadd.f32 %v2354_v52, %v2302_v17 }
 0x66f   :  { %v2677_v61 = vrot.slane %v2622_v44, 1 }
 0x670   :  { %v2676_v8 = vrot.slane %v6282_v16, 1 }
 0x672   :  { %2715 = vrot.lane.b32.xlu2 %v2669_v60, %s4586_s0  ;;  %2829 = vrot.lane.b32.xlu0 %v2784_v3, %s4587_s29  ;;  %v2678_v57 = vsel %vm1256_vm12, %v2676_v8, %v2677_v61  ;;  %v2789_v60 = vrot.slane %v2622_v44, 2  ;;  %v2788_v3 = vrot.slane %v6282_v16, 2  ;;  %v2435_v8 = vld [vmem:[#allocation2 + $0x88] sm:$0x3] }
 0x673   :  { %2505 = vrot.lane.b32.xlu1 %v2458_v4, %s4585_s5 }
 0x674   :  { %v2486_v45 = vpop.permute.xlu0 %2485  ;;  %v6274_v62 = vpop.permute.xlu2 %2489  ;;  %v2790_v31 = vsel %vm1369_vm13, %v2788_v3, %v2789_v60 }
 0x675   :  { %v2262_v0 = vpop.permute.xlu1 %2261  ;;  %v2528_v28 = vadd.f32 %v2486_v45, %v2432_v48 }
 0x676   :  { %v2304_v27 = vadd.f32 %v6123_v34, %v2262_v0 }
 0x677   :  { %v2624_v38 = vadd.f32 %v2582_v42, %v2528_v28  ;;  %v2433_v42 = vld [vmem:[#allocation2 + $0x68] sm:$0x3]  ;;  %v2434_v28 = vld [vmem:[#allocation2 + $0x78] sm:$0x3] }
 0x679   :  { %v2683_v4 = vrot.slane %v2624_v38, 1  ;;  %v2795_v44 = vrot.slane %v2624_v38, 2 }
 0x67a   :  { %2827 = vrot.lane.b32.xlu2 %v2781_v9, %s4587_s29 }
 0x67b   :  { %2719 = vrot.lane.b32.xlu1 %v2675_v54, %s4586_s0 }
 0x67c   :  { %v2358_v26 = vpop.permute.xlu0 %2357  ;;  %v6291_v50 = vpop.permute.xlu2 %2361 }
 0x67d   :  { %v2580_v11 = vpop.permute.xlu1 %2579  ;;  %v6297_v33 = vadd.f32 %v2358_v26, %v2304_v27 }
 0x67e   :  { %v2623_v24 = vadd.f32 %v2580_v11, %v2527_v46 }
 0x67f   :  { %v2682_v10 = vrot.slane %v6297_v33, 1  ;;  %v2794_v32 = vrot.slane %v6297_v33, 2 }
 0x680   :  { %v2680_v37 = vrot.slane %v2623_v24, 1  ;;  %v2792_v20 = vrot.slane %v2623_v24, 2 }
 0x681   :  { %v2684_v45 = vsel %vm1256_vm12, %v2682_v10, %v2683_v4  ;;  %v2796_v46 = vsel %vm1369_vm13, %v2794_v32, %v2795_v44 }
 0x682   :  { %2831 = vrot.lane.b32.xlu2 %v2787_v63, %s4587_s29  ;;  %v2681_v52 = vsel %vm1256_vm12, %v2679_v35, %v2680_v37  ;;  %v2793_v0 = vsel %vm1369_vm13, %v2791_v51, %v2792_v20  ;;  %v2530_v35 = vadd.f32 %v6274_v62, %v2434_v28 }
 0x683   :  { %2721 = vrot.lane.b32.xlu1 %v2678_v57, %s4586_s0  ;;  %2723 = vrot.lane.b32.xlu0 %v2681_v52, %s4586_s0 }
 0x684   :  { %v2266_v36 = vpop.permute.xlu0 %2265  ;;  %v6305_v34 = vpop.permute.xlu2 %2269 }
 0x685   :  { %v2488_v47 = vpop.permute.xlu1 %2487  ;;  %v2306_v24 = vadd.f32 %v6146_v6, %v2266_v36 }
 0x686   :  { %v2529_v18 = vadd.f32 %v2488_v47, %v2433_v42 }
 0x687   :  { %v6335_v63 = vadd.f32 %v6291_v50, %v2306_v24 }
 0x689   :  { %v2688_v3 = vrot.slane %v6335_v63, 1 }
 0x68a   :  { %2725 = vrot.lane.b32.xlu2 %v2684_v45, %s4586_s0 }
 0x68b   :  { %2833 = vrot.lane.b32.xlu1 %v2790_v31, %s4587_s29  ;;  %2835 = vrot.lane.b32.xlu0 %v2793_v0, %s4587_s29  ;;  %v2800_v31 = vrot.slane %v6335_v63, 2 }
 0x68c   :  { %v2584_v53 = vpop.permute.xlu0 %2583  ;;  %v2588_v17 = vpop.permute.xlu2 %2587 }
 0x68d   :  { %v2625_v25 = vadd.f32 %v2584_v53, %v2529_v18  ;;  %v2360_v41 = vpop.permute.xlu1 %2359  ;;  %v2436_v18 = vld [vmem:[#allocation2 + $0x98] sm:$0x3] }
 0x68e   :  { %v6319_v9 = vadd.f32 %v2360_v41, %v2305_v29 }
 0x68f   :  { %v2686_v54 = vrot.slane %v2625_v25, 1  ;;  %v2798_v11 = vrot.slane %v2625_v25, 2 }
 0x690   :  { %v2685_v12 = vrot.slane %v6319_v9, 1  ;;  %v2797_v61 = vrot.slane %v6319_v9, 2 }
 0x692   :  { %2837 = vrot.lane.b32.xlu2 %v2796_v46, %s4587_s29  ;;  %v2687_v26 = vsel %vm1256_vm12, %v2685_v12, %v2686_v54  ;;  %v2799_v22 = vsel %vm1369_vm13, %v2797_v61, %v2798_v11 }
 0x693   :  { %2727 = vrot.lane.b32.xlu1 %v2687_v26, %s4586_s0 }
 0x694   :  { %v2492_v56 = vpop.permute.xlu0 %2491  ;;  %v6326_v19 = vpop.permute.xlu2 %2495 }
 0x695   :  { %v2268_v43 = vpop.permute.xlu1 %2267  ;;  %v2531_v48 = vadd.f32 %v2492_v56, %v2435_v8 }
 0x696   :  { %v2307_v37 = vadd.f32 %v6150_v2, %v2268_v43 }
 0x697   :  { %v2627_v27 = vadd.f32 %v2588_v17, %v2531_v48  ;;  %v2308_v17 = vadd.f32 %v6158_v5, %v6305_v34  ;;  %v2438_v34 = vld [vmem:[#allocation2 + $0xb8] sm:$0x3] }
 0x699   :  { %v2692_v6 = vrot.slane %v2627_v27, 1  ;;  %v2804_v42 = vrot.slane %v2627_v27, 2 }
 0x69b   :  { %2839 = vrot.lane.b32.xlu1 %v2799_v22, %s4587_s29  ;;  %v2437_v22 = vld [vmem:[#allocation2 + $0xa8] sm:$0x3] }
 0x69c   :  { %v2364_v57 = vpop.permute.xlu0 %2363  ;;  %v2368_v52 = vpop.permute.xlu2 %2367 }
 0x69d   :  { %v6337_v38 = vadd.f32 %v2364_v57, %v2307_v37  ;;  %v2586_v10 = vpop.permute.xlu1 %2585  ;;  %v2533_v37 = vadd.f32 %v6326_v19, %v2437_v22 }
 0x69e   :  { %v2626_v47 = vadd.f32 %v2586_v10, %v2530_v35 }
 0x69f   :  { %v2691_v36 = vrot.slane %v6337_v38, 1  ;;  %v2803_v4 = vrot.slane %v6337_v38, 2 }
 0x6a0   :  { %v2689_v60 = vrot.slane %v2626_v47, 1  ;;  %v2801_v45 = vrot.slane %v2626_v47, 2 }
 0x6a1   :  { %v2693_v2 = vsel %vm1256_vm12, %v2691_v36, %v2692_v6  ;;  %v2805_v0 = vsel %vm1369_vm13, %v2803_v4, %v2804_v42 }
 0x6a2   :  { %2731 = vrot.lane.b32.xlu2 %v2693_v2, %s4586_s0  ;;  %v2690_v62 = vsel %vm1256_vm12, %v2688_v3, %v2689_v60  ;;  %v2802_v29 = vsel %vm1369_vm13, %v2800_v31, %v2801_v45 }
 0x6a3   :  { %2729 = vrot.lane.b32.xlu0 %v2690_v62, %s4586_s0 }
 0x6a4   :  { %v2272_v50 = vpop.permute.xlu0 %2271  ;;  %v6345_v20 = vpop.permute.xlu2 %2275 }
 0x6a5   :  { %v2494_v51 = vpop.permute.xlu1 %2493  ;;  %v2309_v48 = vadd.f32 %v6174_v30, %v2272_v50 }
 0x6a6   :  { %v2532_v53 = vadd.f32 %v2494_v51, %v2436_v18 }
 0x6a7   :  { %v6368_v35 = vadd.f32 %v2368_v52, %v2309_v48 }
 0x6a9   :  { %v2697_v2 = vrot.slane %v6368_v35, 1  ;;  %v2809_v42 = vrot.slane %v6368_v35, 2 }
 0x6aa   :  { %2843 = vrot.lane.b32.xlu2 %v2805_v0, %s4587_s29  ;;  %v2439_v0 = vld [vmem:[#allocation2 + $0xc8] sm:$0x3] }
 0x6ab   :  { %2841 = vrot.lane.b32.xlu0 %v2802_v29, %s4587_s29 }
 0x6ac   :  { %v2590_v32 = vpop.permute.xlu0 %2589  ;;  %v2594_v25 = vpop.permute.xlu2 %2593 }
 0x6ad   :  { %v2628_v41 = vadd.f32 %v2590_v32, %v2532_v53  ;;  %v2366_v44 = vpop.permute.xlu1 %2365  ;;  %v2311_v53 = vadd.f32 %v6188_v1, %v6345_v20 }
 0x6ae   :  { %v6355_v54 = vadd.f32 %v2366_v44, %v2308_v17 }
 0x6af   :  { %v2695_v12 = vrot.slane %v2628_v41, 1  ;;  %v2807_v61 = vrot.slane %v2628_v41, 2 }
 0x6b0   :  { %v2694_v46 = vrot.slane %v6355_v54, 1  ;;  %v2806_v5 = vrot.slane %v6355_v54, 2 }
 0x6b2   :  { %v2696_v26 = vsel %vm1256_vm12, %v2694_v46, %v2695_v12  ;;  %v2808_v24 = vsel %vm1369_vm13, %v2806_v5, %v2807_v61 }
 0x6b3   :  { %2733 = vrot.lane.b32.xlu1 %v2696_v26, %s4586_s0 }
 0x6b4   :  { %v2498_v56 = vpop.permute.xlu0 %2497  ;;  %v6360_v43 = vpop.permute.xlu2 %2501 }
 0x6b5   :  { %v2274_v11 = vpop.permute.xlu1 %2273  ;;  %v2534_v8 = vadd.f32 %v2498_v56, %v2438_v34  ;;  %v2441_v56 = vld [vmem:[#allocation2 + $0xe8] sm:$0x3] }
 0x6b6   :  { %v2310_v27 = vadd.f32 %v6178_v40, %v2274_v11 }
 0x6b7   :  { %v2630_v28 = vadd.f32 %v2594_v25, %v2534_v8 }
 0x6b9   :  { %v2701_v60 = vrot.slane %v2630_v28, 1  ;;  %v2813_v45 = vrot.slane %v2630_v28, 2 }
 0x6bb   :  { %2845 = vrot.lane.b32.xlu1 %v2808_v24, %s4587_s29 }
 0x6bc   :  { %v2370_v57 = vpop.permute.xlu0 %2369  ;;  %v2374_v10 = vpop.permute.xlu2 %2373 }
 0x6bd   :  { %v6370_v47 = vadd.f32 %v2370_v57, %v2310_v27  ;;  %v2592_v6 = vpop.permute.xlu1 %2591  ;;  %v2440_v57 = vld [vmem:[#allocation2 + $0xd8] sm:$0x3] }
 0x6be   :  { %v2629_v36 = vadd.f32 %v2592_v6, %v2533_v37  ;;  %v2536_v6 = vadd.f32 %v6360_v43, %v2440_v57 }
 0x6bf   :  { %v2700_v30 = vrot.slane %v6370_v47, 1  ;;  %v2812_v50 = vrot.slane %v6370_v47, 2 }
 0x6c0   :  { %v2698_v3 = vrot.slane %v2629_v36, 1  ;;  %v2810_v51 = vrot.slane %v2629_v36, 2 }
 0x6c1   :  { %v2702_v40 = vsel %vm1256_vm12, %v2700_v30, %v2701_v60  ;;  %v2814_v31 = vsel %vm1369_vm13, %v2812_v50, %v2813_v45 }
 0x6c2   :  { %2737 = vrot.lane.b32.xlu2 %v2702_v40, %s4586_s0  ;;  %v2699_v19 = vsel %vm1256_vm12, %v2697_v2, %v2698_v3  ;;  %v2811_v18 = vsel %vm1369_vm13, %v2809_v42, %v2810_v51 }
 0x6c3   :  { %2735 = vrot.lane.b32.xlu0 %v2699_v19, %s4586_s0 }
 0x6c4   :  { %v2278_v52 = vpop.permute.xlu0 %2277  ;;  %v2282_v62 = vpop.permute.xlu2 %2281 }
 0x6c5   :  { %v2500_v4 = vpop.permute.xlu1 %2499  ;;  %v2312_v24 = vadd.f32 %v6212_v7, %v2278_v52  ;;  %v2314_v19 = vadd.f32 %v6227_v15, %v2282_v62 }
 0x6c6   :  { %v2535_v29 = vadd.f32 %v2500_v4, %v2439_v0  ;;  %v2442_v4 = vld [vmem:[#allocation2 + $0xf8] sm:$0x3] }
 0x6c7   :  { %v6402_v36 = vadd.f32 %v2374_v10, %v2312_v24  ;;  %v6415_v45 = vadd.f32 %v6207_v39, %v2314_v19 }
 0x6c9   :  { %v2706_v2 = vrot.slane %v6402_v36, 1  ;;  %v2818_v62 = vrot.slane %v6402_v36, 2 }
 0x6ca   :  { %2849 = vrot.lane.b32.xlu2 %v2814_v31, %s4587_s29 }
 0x6cb   :  { %2847 = vrot.lane.b32.xlu0 %v2811_v18, %s4587_s29  ;;  %v6422_v18 = vld [vmem:[%s7273_s16] ss:$0 sm:$0xff] }
 0x6cc   :  { %v2596_v17 = vpop.permute.xlu0 %2595  ;;  %v2716_v32 = vpop.permute.xlu2 %2715 }
 0x6cd   :  { %v2631_v25 = vadd.f32 %v2596_v17, %v2535_v29  ;;  %v2372_v41 = vpop.permute.xlu1 %2371  ;;  %v2712_v17 = vrot.slane %v6415_v45, 1 }
 0x6ce   :  { %v6386_v44 = vadd.f32 %v2372_v41, %v2311_v53 }
 0x6cf   :  { %v2704_v12 = vrot.slane %v2631_v25, 1  ;;  %v2816_v34 = vrot.slane %v2631_v25, 2 }
 0x6d0   :  { %v2703_v46 = vrot.slane %v6386_v44, 1  ;;  %v2815_v1 = vrot.slane %v6386_v44, 2 }
 0x6d2   :  { %v2705_v26 = vsel %vm1256_vm12, %v2703_v46, %v2704_v12  ;;  %v2817_v27 = vsel %vm1369_vm13, %v2815_v1, %v2816_v34 }
 0x6d3   :  { %2739 = vrot.lane.b32.xlu1 %v2705_v26, %s4586_s0  ;;  %v2824_v26 = vrot.slane %v6415_v45, 2 }
 0x6d4   :  { %v2504_v11 = vpop.permute.xlu0 %2503  ;;  %v2828_v20 = vpop.permute.xlu2 %2827 }
 0x6d5   :  { %v2537_v61 = vadd.f32 %v2504_v11, %v2441_v56  ;;  %v2280_v5 = vpop.permute.xlu1 %2279 }
 0x6d6   :  { %v2313_v8 = vadd.f32 %v6218_v13, %v2280_v5 }
 0x6d7   :  { %v2633_v48 = vadd.f32 %v6184_v21, %v2537_v61 }
 0x6d8   :  { %v6396_v22 = vadd.f32 %v6196_v59, %v2313_v8 }
 0x6d9   :  { %v2710_v28 = vrot.slane %v2633_v48, 1  ;;  %v2822_v60 = vrot.slane %v2633_v48, 2 }
 0x6da   :  { %v2709_v37 = vrot.slane %v6396_v22, 1  ;;  %v2821_v40 = vrot.slane %v6396_v22, 2 }
 0x6db   :  { %2851 = vrot.lane.b32.xlu1 %v2817_v27, %s4587_s29 }
 0x6dc   :  { %v2718_v13 = vpop.permute.xlu0 %2717  ;;  %v2711_v21 = vsel %vm1256_vm12, %v2709_v37, %v2710_v28  ;;  %v2832_v30 = vpop.permute.xlu2 %2831  ;;  %v2823_v52 = vsel %vm1369_vm13, %v2821_v40, %v2822_v60 }
 0x6dd   :  { %2743 = vrot.lane.b32.xlu2 %v2711_v21, %s4586_s0  ;;  %v2598_v7 = vpop.permute.xlu1 %2597  ;;  %v2764_v50 = vadd.f32 %v2718_v13, %v6249_v58 }
 0x6de   :  { %v2632_v59 = vadd.f32 %v2598_v7, %v2536_v6 }
 0x6e0   :  { %v2707_v3 = vrot.slane %v2632_v59, 1  ;;  %v2819_v42 = vrot.slane %v2632_v59, 2 }
 0x6e2   :  { %v2708_v43 = vsel %vm1256_vm12, %v2706_v2, %v2707_v3  ;;  %v2820_v53 = vsel %vm1369_vm13, %v2818_v62, %v2819_v42 }
 0x6e3   :  { %2741 = vrot.lane.b32.xlu0 %v2708_v43, %s4586_s0 }
 0x6e4   :  { %v2830_v10 = vpop.permute.xlu0 %2829  ;;  %v2726_v58 = vpop.permute.xlu2 %2725 }
 0x6e5   :  { %2855 = vrot.lane.b32.xlu2 %v2823_v52, %s4587_s29  ;;  %v2506_v51 = vpop.permute.xlu1 %2505  ;;  %v2876_v0 = vadd.f32 %v2830_v10, %v2764_v50 }
 0x6e6   :  { %v2538_v31 = vadd.f32 %v2506_v51, %v2442_v4 }
 0x6e7   :  { %v2896_v39 = vadd.f32 %v6422_v18, %v2876_v0 }
 0x6e8   :  { %v2634_v15 = vadd.f32 %v6205_v14, %v2538_v31  ;;  %v2763_v14 = vadd.f32 %v2716_v32, %v6258_v55 }
 0x6ea   :  { %v2713_v29 = vrot.slane %v2634_v15, 1  ;;  %v2825_v12 = vrot.slane %v2634_v15, 2  ;;  %v2875_v46 = vadd.f32 %v2828_v20, %v2763_v14  ;;  %v2768_v20 = vadd.f32 %v2726_v58, %v6297_v33 }
 0x6eb   :  { %2853 = vrot.lane.b32.xlu0 %v2820_v53, %s4587_s29 }
 0x6ec   :  { %v2714_v25 = vsel %vm1256_vm12, %v2712_v17, %v2713_v29  ;;  %v2826_v11 = vsel %vm1369_vm13, %v2824_v26, %v2825_v12  ;;  %v2895_v61 = vadd.f32 %v6422_v18, %v2875_v46  ;;  %v2838_v5 = vpop.permute.xlu2 %2837 }
 0x6ed   :  { %2929 = vrot.lane.b32.xlu2 %v2896_v39, %s4589_s11  ;;  %2745 = vrot.lane.b32.xlu1 %v2714_v25, %s4586_s0  ;;  %v2720_v41 = vpop.permute.xlu1 %2719  ;;  %v2880_v24 = vadd.f32 %v2838_v5, %v2768_v20 }
 0x6ee   :  { %v2765_v56 = vadd.f32 %v2720_v41, %v6268_v23 }
 0x6ef   :  { %v2900_v21 = vadd.f32 %v6422_v18, %v2880_v24 }
 0x6f0   :  { %v2877_v55 = vadd.f32 %v2832_v30, %v2765_v56 }
 0x6f2   :  { %v2897_v1 = vadd.f32 %v6422_v18, %v2877_v55 }
 0x6f3   :  { %2857 = vrot.lane.b32.xlu0 %v2826_v11, %s4587_s29 }
 0x6f5   :  { %v2724_v32 = vpop.permute.xlu0 %2723  ;;  %2927 = vrot.lane.b32.xlu1 %v2895_v61, %s4589_s11  ;;  %v2722_v34 = vpop.permute.xlu1 %2721 }
 0x6f6   :  { %v2767_v23 = vadd.f32 %v2724_v32, %v6289_v49  ;;  %v2766_v8 = vadd.f32 %v2722_v34, %v6282_v16 }
 0x6fb   :  { %2931 = vrot.lane.b32.xlu0 %v2897_v1, %s4589_s11 }
 0x6fc   :  { %v2732_v48 = vpop.permute.xlu2 %2731 }
 0x6fd   :  { %v2836_v28 = vpop.permute.xlu0 %2835  ;;  %v2834_v27 = vpop.permute.xlu1 %2833  ;;  %v2771_v49 = vadd.f32 %v2732_v48, %v6337_v38 }
 0x6fe   :  { %v2879_v37 = vadd.f32 %v2836_v28, %v2767_v23  ;;  %v2878_v57 = vadd.f32 %v2834_v27, %v2766_v8 }
 0x700   :  { %v2899_v6 = vadd.f32 %v6422_v18, %v2879_v37  ;;  %v2898_v13 = vadd.f32 %v6422_v18, %v2878_v57 }
 0x702   :  { %2935 = vrot.lane.b32.xlu2 %v2899_v6, %s4589_s11  ;;  %2933 = vrot.lane.b32.xlu1 %v2898_v13, %s4589_s11  ;;  %v3187_v6 = vld [vmem:[%s7276_s19 + $0x8] sm:$0xf] }
 0x703   :  { %2937 = vrot.lane.b32.xlu0 %v2900_v21, %s4589_s11  ;;  %4488 = vmatpush.msk.msrb.mxu0 %vm412_vm0, %v3187_v6 }
 0x704   :  { %v2844_v16 = vpop.permute.xlu2 %2843 }
 0x705   :  { %v2883_v33 = vadd.f32 %v2844_v16, %v2771_v49  ;;  %v2728_v7 = vpop.permute.xlu1 %2727 }
 0x706   :  { %v2769_v60 = vadd.f32 %v2728_v7, %v6319_v9 }
 0x707   :  { %v2903_v59 = vadd.f32 %v6422_v18, %v2883_v33 }
 0x70b   :  { %2943 = vrot.lane.b32.xlu0 %v2903_v59, %s4589_s11 }
 0x70d   :  { %v2840_v30 = vpop.permute.xlu1 %2839 }
 0x70e   :  { %v2881_v3 = vadd.f32 %v2840_v30, %v2769_v60 }
 0x710   :  { %v2901_v2 = vadd.f32 %v6422_v18, %v2881_v3 }
 0x712   :  { %2939 = vrot.lane.b32.xlu1 %v2901_v2, %s4589_s11 }
 0x715   :  { %v2730_v40 = vpop.permute.xlu0 %2729 }
 0x716   :  { %v2770_v38 = vadd.f32 %v2730_v40, %v6335_v63 }
 0x71c   :  { %v2738_v19 = vpop.permute.xlu2 %2737 }
 0x71d   :  { %v2842_v43 = vpop.permute.xlu0 %2841  ;;  %v2774_v50 = vadd.f32 %v2738_v19, %v6370_v47 }
 0x71e   :  { %v2882_v10 = vadd.f32 %v2842_v43, %v2770_v38 }
 0x720   :  { %v2902_v52 = vadd.f32 %v6422_v18, %v2882_v10 }
 0x722   :  { %2941 = vrot.lane.b32.xlu2 %v2902_v52, %s4589_s11 }
 0x724   :  { %v2850_v4 = vpop.permute.xlu2 %2849 }
 0x725   :  { %v2886_v9 = vadd.f32 %v2850_v4, %v2774_v50  ;;  %v2734_v51 = vpop.permute.xlu1 %2733 }
 0x726   :  { %v2772_v31 = vadd.f32 %v2734_v51, %v6355_v54 }
 0x727   :  { %v2906_v42 = vadd.f32 %v6422_v18, %v2886_v9 }
 0x729   :  { %2949 = vrot.lane.b32.xlu0 %v2906_v42, %s4589_s11 }
 0x72d   :  { %v2846_v0 = vpop.permute.xlu1 %2845 }
 0x72e   :  { %v2884_v63 = vadd.f32 %v2846_v0, %v2772_v31 }
 0x730   :  { %v2904_v15 = vadd.f32 %v6422_v18, %v2884_v63 }
 0x732   :  { %2945 = vrot.lane.b32.xlu1 %v2904_v15, %s4589_s11 }
 0x735   :  { %v2736_v62 = vpop.permute.xlu0 %2735 }
 0x736   :  { %v2773_v29 = vadd.f32 %v2736_v62, %v6368_v35 }
 0x737   :  { %v2744_v58 = vpop.permute.xlu2 %2743 }
 0x738   :  { %v2777_v53 = vadd.f32 %v2744_v58, %v6396_v22 }
 0x73d   :  { %v2848_v47 = vpop.permute.xlu0 %2847 }
 0x73e   :  { %v2885_v17 = vadd.f32 %v2848_v47, %v2773_v29 }
 0x73f   :  { %v2856_v39 = vpop.permute.xlu2 %2855 }
 0x740   :  { %v2905_v25 = vadd.f32 %v6422_v18, %v2885_v17  ;;  %v2889_v14 = vadd.f32 %v2856_v39, %v2777_v53 }
 0x742   :  { %v2909_v54 = vadd.f32 %v6422_v18, %v2889_v14  ;;  %2947 = vrot.lane.b32.xlu2 %v2905_v25, %s4589_s11 }
 0x744   :  { %2955 = vrot.lane.b32.xlu0 %v2909_v54, %s4589_s11 }
 0x745   :  { %v2740_v41 = vpop.permute.xlu1 %2739 }
 0x746   :  { %v2775_v35 = vadd.f32 %v2740_v41, %v6386_v44 }
 0x747   :  { %v2930_v12 = vpop.permute.xlu2 %2929 }
 0x748   :  { %2977 = vst.msk [vmem:[#allocation3 + $0x8] sm:$0xff] %vm2975_vm8, %v2930_v12 }
 0x74d   :  { %v2852_v46 = vpop.permute.xlu1 %2851 }
 0x74e   :  { %v2887_v22 = vadd.f32 %v2852_v46, %v2775_v35  ;;  %v3186_v46 = vld [vmem:[%s7276_s19] sm:$0xff] }
 0x74f   :  { %v6497_v21 = vld [vmem:[#allocation3 + $0x8] sm:$0xff]  ;;  %3258 = vmatpush.msrb.mxu0 %v3186_v46 }
 0x750   :  { %v2907_v26 = vadd.f32 %v6422_v18, %v2887_v22  ;;  %v3047_v60 = vmul.f32 %v6497_v21, %v6497_v21  ;;  %v3010_v3 = vsel %vm3008_vm9, %v6497_v21, 0.0 }
 0x752   :  { %2951 = vrot.lane.b32.xlu1 %v2907_v26, %s4589_s11  ;;  %v3063_v10 = vsel %vm3008_vm9, %v3047_v60, 0.0 }
 0x755   :  { %v2742_v56 = vpop.permute.xlu0 %2741 }
 0x756   :  { %v2776_v11 = vadd.f32 %v2742_v56, %v6402_v36 }
 0x75c   :  { %v2936_v61 = vpop.permute.xlu2 %2935 }
 0x75d   :  { %2980 = vst.msk [vmem:[#allocation3 + $0x20] sm:$0xff] %vm2975_vm8, %v2936_v61  ;;  %v2854_v5 = vpop.permute.xlu0 %2853 }
 0x75e   :  { %v2888_v55 = vadd.f32 %v2854_v5, %v2776_v11 }
 0x75f   :  { %v2746_v32 = vpop.permute.xlu1 %2745 }
 0x760   :  { %v2908_v34 = vadd.f32 %v6422_v18, %v2888_v55  ;;  %v2778_v44 = vadd.f32 %v2746_v32, %v6415_v45 }
 0x762   :  { %2953 = vrot.lane.b32.xlu2 %v2908_v34, %s4589_s11 }
 0x764   :  { %v6523_v4 = vld [vmem:[#allocation3 + $0x20] sm:$0xff] }
 0x765   :  { %v2858_v1 = vpop.permute.xlu0 %2857  ;;  %v3050_v63 = vmul.f32 %v6523_v4, %v6523_v4  ;;  %v3016_v29 = vsel %vm3008_vm9, %v6523_v4, 0.0 }
 0x766   :  { %v2890_v20 = vadd.f32 %v2858_v1, %v2778_v44 }
 0x767   :  { %v2928_v23 = vpop.permute.xlu1 %2927  ;;  %v3069_v39 = vsel %vm3008_vm9, %v3050_v63, 0.0 }
 0x768   :  { %v2910_v8 = vadd.f32 %v6422_v18, %v2890_v20  ;;  %2976 = vst.msk [vmem:[#allocation3] sm:$0xff] %vm2975_vm8, %v2928_v23 }
 0x76a   :  { %2957 = vrot.lane.b32.xlu1 %v2910_v8, %s4589_s11 }
 0x76d   :  { %v2932_v36 = vpop.permute.xlu0 %2931 }
 0x76e   :  { %2978 = vst.msk [vmem:[#allocation3 + $0x10] sm:$0xff] %vm2975_vm8, %v2932_v36 }
 0x76f   :  { %v6495_v13 = vld [vmem:[#allocation3] sm:$0xff] }
 0x770   :  { %v3046_v16 = vmul.f32 %v6495_v13, %v6495_v13  ;;  %v3009_v59 = vsel %vm3008_vm9, %v6495_v13, 0.0 }
 0x771   :  { %v3011_v19 = vadd.f32 %v3010_v3, %v3009_v59 }
 0x772   :  { %v3062_v38 = vsel %vm3008_vm9, %v3046_v16, 0.0 }
 0x773   :  { %v3064_v51 = vadd.f32 %v3063_v10, %v3062_v38 }
 0x774   :  { %v2934_v48 = vpop.permute.xlu1 %2933 }
 0x775   :  { %2979 = vst.msk [vmem:[#allocation3 + $0x18] sm:$0xff] %vm2975_vm8, %v2934_v48  ;;  %v2938_v24 = vpop.permute.xlu0 %2937  ;;  %v6499_v49 = vld [vmem:[#allocation3 + $0x10] sm:$0xff] }
 0x776   :  { %2981 = vst.msk [vmem:[#allocation3 + $0x28] sm:$0xff] %vm2975_vm8, %v2938_v24  ;;  %v3048_v30 = vmul.f32 %v6499_v49, %v6499_v49  ;;  %v3012_v2 = vsel %vm3008_vm9, %v6499_v49, 0.0 }
 0x777   :  { %v3013_v9 = vadd.f32 %v3012_v2, %v3011_v19 }
 0x778   :  { %v3065_v52 = vsel %vm3008_vm9, %v3048_v30, 0.0 }
 0x779   :  { %v3066_v0 = vadd.f32 %v3065_v52, %v3064_v51 }
 0x77c   :  { %v2942_v28 = vpop.permute.xlu2 %2941  ;;  %v6503_v7 = vld [vmem:[#allocation3 + $0x18] sm:$0xff] }
 0x77d   :  { %2983 = vst.msk [vmem:[#allocation3 + $0x38] sm:$0xff] %vm2975_vm8, %v2942_v28  ;;  %v2944_v45 = vpop.permute.xlu0 %2943  ;;  %v3049_v40 = vmul.f32 %v6503_v7, %v6503_v7  ;;  %v3014_v43 = vsel %vm3008_vm9, %v6503_v7, 0.0  ;;  %v6531_v62 = vld [vmem:[#allocation3 + $0x28] sm:$0xff] }
 0x77e   :  { %2984 = vst.msk [vmem:[#allocation3 + $0x40] sm:$0xff] %vm2975_vm8, %v2944_v45  ;;  %v3015_v31 = vadd.f32 %v3014_v43, %v3013_v9  ;;  %v3051_v53 = vmul.f32 %v6531_v62, %v6531_v62  ;;  %v3018_v54 = vsel %vm3008_vm9, %v6531_v62, 0.0 }
 0x77f   :  { %v3067_v42 = vsel %vm3008_vm9, %v3049_v40, 0.0 }
 0x780   :  { %v3068_v58 = vadd.f32 %v3067_v42, %v3066_v0  ;;  %v3017_v47 = vadd.f32 %v3016_v29, %v3015_v31  ;;  %v3071_v22 = vsel %vm3008_vm9, %v3051_v53, 0.0 }
 0x782   :  { %v3070_v14 = vadd.f32 %v3069_v39, %v3068_v58  ;;  %v3019_v35 = vadd.f32 %v3018_v54, %v3017_v47 }
 0x784   :  { %v2940_v18 = vpop.permute.xlu1 %2939  ;;  %v6545_v12 = vld [vmem:[#allocation3 + $0x38] sm:$0xff]  ;;  %v3072_v11 = vadd.f32 %v3071_v22, %v3070_v14 }
 0x785   :  { %2982 = vst.msk [vmem:[#allocation3 + $0x30] sm:$0xff] %vm2975_vm8, %v2940_v18  ;;  %v3053_v61 = vmul.f32 %v6545_v12, %v6545_v12  ;;  %v6554_v5 = vld [vmem:[#allocation3 + $0x40] sm:$0xff]  ;;  %v3022_v34 = vsel %vm3008_vm9, %v6545_v12, 0.0 }
 0x786   :  { %v3054_v1 = vmul.f32 %v6554_v5, %v6554_v5  ;;  %v3024_v36 = vsel %vm3008_vm9, %v6554_v5, 0.0 }
 0x787   :  { %v3075_v23 = vsel %vm3008_vm9, %v3053_v61, 0.0 }
 0x788   :  { %v3077_v45 = vsel %vm3008_vm9, %v3054_v1, 0.0 }
 0x78c   :  { %v6529_v15 = vld [vmem:[#allocation3 + $0x30] sm:$0xff] }
 0x78d   :  { %v3052_v17 = vmul.f32 %v6529_v15, %v6529_v15  ;;  %v3020_v41 = vsel %vm3008_vm9, %v6529_v15, 0.0 }
 0x78e   :  { %v3021_v56 = vadd.f32 %v3020_v41, %v3019_v35 }
 0x78f   :  { %v3073_v26 = vsel %vm3008_vm9, %v3052_v17, 0.0 }
 0x790   :  { %v3074_v32 = vadd.f32 %v3073_v26, %v3072_v11  ;;  %v3023_v44 = vadd.f32 %v3022_v34, %v3021_v56 }
 0x792   :  { %v3076_v8 = vadd.f32 %v3075_v23, %v3074_v32  ;;  %v3025_v28 = vadd.f32 %v3024_v36, %v3023_v44 }
 0x79b   :  { %v2950_v27 = vpop.permute.xlu0 %2949 }
 0x79c   :  { %v2948_v37 = vpop.permute.xlu2 %2947  ;;  %2987 = vst.msk [vmem:[#allocation3 + $0x58] sm:$0xff] %vm2975_vm8, %v2950_v27 }
 0x79d   :  { %2986 = vst.msk [vmem:[#allocation3 + $0x50] sm:$0xff] %vm2975_vm8, %v2948_v37  ;;  %v3078_v37 = vadd.f32 %v3077_v45, %v3076_v8 }
 0x7a3   :  { %v6575_v6 = vld [vmem:[#allocation3 + $0x58] sm:$0xff] }
 0x7a4   :  { %v2946_v57 = vpop.permute.xlu1 %2945  ;;  %v6569_v24 = vld [vmem:[#allocation3 + $0x50] sm:$0xff]  ;;  %v3057_v3 = vmul.f32 %v6575_v6, %v6575_v6  ;;  %v3030_v38 = vsel %vm3008_vm9, %v6575_v6, 0.0 }
 0x7a5   :  { %2985 = vst.msk [vmem:[#allocation3 + $0x48] sm:$0xff] %vm2975_vm8, %v2946_v57  ;;  %v3056_v57 = vmul.f32 %v6569_v24, %v6569_v24  ;;  %v3028_v59 = vsel %vm3008_vm9, %v6569_v24, 0.0 }
 0x7a6   :  { %v3083_v52 = vsel %vm3008_vm9, %v3057_v3, 0.0 }
 0x7a7   :  { %v3081_v30 = vsel %vm3008_vm9, %v3056_v57, 0.0 }
 0x7ac   :  { %v6556_v55 = vld [vmem:[#allocation3 + $0x48] sm:$0xff] }
 0x7ad   :  { %v3055_v20 = vmul.f32 %v6556_v55, %v6556_v55  ;;  %v3026_v48 = vsel %vm3008_vm9, %v6556_v55, 0.0 }
 0x7ae   :  { %v3027_v27 = vadd.f32 %v3026_v48, %v3025_v28 }
 0x7af   :  { %v3079_v18 = vsel %vm3008_vm9, %v3055_v20, 0.0 }
 0x7b0   :  { %v3029_v60 = vadd.f32 %v3028_v59, %v3027_v27 }
 0x7b2   :  { %v3031_v10 = vadd.f32 %v3030_v38, %v3029_v60  ;;  %v3131_v38 = vld [vmem:[%s7274_s17] sm:$0x1] }
 0x7b6   :  { %v2956_v33 = vpop.permute.xlu0 %2955 }
 0x7b7   :  { %2990 = vst.msk [vmem:[#allocation3 + $0x70] sm:$0xff] %vm2975_vm8, %v2956_v33  ;;  %v3080_v33 = vadd.f32 %v3079_v18, %v3078_v37 }
 0x7b9   :  { %v3082_v40 = vadd.f32 %v3081_v30, %v3080_v33 }
 0x7bb   :  { %v3084_v42 = vadd.f32 %v3083_v52, %v3082_v40 }
 0x7bc   :  { %v2954_v50 = vpop.permute.xlu2 %2953 }
 0x7bd   :  { %2989 = vst.msk [vmem:[#allocation3 + $0x68] sm:$0xff] %vm2975_vm8, %v2954_v50 }
 0x7be   :  { %v6597_v0 = vld [vmem:[#allocation3 + $0x70] sm:$0xff] }
 0x7bf   :  { %v3060_v47 = vmul.f32 %v6597_v0, %v6597_v0  ;;  %v3036_v39 = vsel %vm3008_vm9, %v6597_v0, 0.0 }
 0x7c1   :  { %v3089_v54 = vsel %vm3008_vm9, %v3060_v47, 0.0 }
 0x7c4   :  { %v2952_v25 = vpop.permute.xlu1 %2951  ;;  %v6590_v43 = vld [vmem:[#allocation3 + $0x68] sm:$0xff] }
 0x7c5   :  { %2988 = vst.msk [vmem:[#allocation3 + $0x60] sm:$0xff] %vm2975_vm8, %v2952_v25  ;;  %v3059_v31 = vmul.f32 %v6590_v43, %v6590_v43  ;;  %v3034_v58 = vsel %vm3008_vm9, %v6590_v43, 0.0 }
 0x7c7   :  { %v3087_v53 = vsel %vm3008_vm9, %v3059_v31, 0.0 }
 0x7cc   :  { %v6577_v16 = vld [vmem:[#allocation3 + $0x60] sm:$0xff] }
 0x7cd   :  { %v3058_v2 = vmul.f32 %v6577_v16, %v6577_v16  ;;  %v3032_v19 = vsel %vm3008_vm9, %v6577_v16, 0.0 }
 0x7ce   :  { %v3033_v51 = vadd.f32 %v3032_v19, %v3031_v10 }
 0x7cf   :  { %v3085_v50 = vsel %vm3008_vm9, %v3058_v2, 0.0 }
 0x7d0   :  { %v3086_v63 = vadd.f32 %v3085_v50, %v3084_v42  ;;  %v3035_v29 = vadd.f32 %v3034_v58, %v3033_v51 }
 0x7d2   :  { %v3088_v17 = vadd.f32 %v3087_v53, %v3086_v63  ;;  %v3037_v14 = vadd.f32 %v3036_v39, %v3035_v29 }
 0x7d4   :  { %v3090_v22 = vadd.f32 %v3089_v54, %v3088_v17 }
 0x7dc   :  { %v2958_v9 = vpop.permute.xlu1 %2957 }
 0x7dd   :  { %2991 = vst.msk [vmem:[#allocation3 + $0x78] sm:$0xff] %vm2975_vm8, %v2958_v9  ;;  %v4541_v9 = vld [vmem:[%s7275_s18] ss:$0 sm:$0xff] }
 0x7e4   :  { %v6606_v25 = vld [vmem:[#allocation3 + $0x78] sm:$0xff] }
 0x7e5   :  { %v3038_v41 = vsel %vm3008_vm9, %v6606_v25, 0.0  ;;  %v3061_v35 = vmul.f32 %v6606_v25, %v6606_v25 }
 0x7e6   :  { %v3039_v46 = vadd.f32 %v3038_v41, %v3037_v14 }
 0x7e7   :  { %v3091_v26 = vsel %vm3008_vm9, %v3061_v35, 0.0 }
 0x7e8   :  { %v3040_v56 = vrot.slane %v3039_v46, 4  ;;  %v3092_v11 = vadd.f32 %v3091_v26, %v3090_v22 }
 0x7ea   :  { %v3041_v61 = vadd.f32 %v3040_v56, %v3039_v46  ;;  %v3093_v32 = vrot.slane %v3092_v11, 4 }
 0x7ec   :  { %v3042_v34 = vrot.slane %v3041_v61, 2  ;;  %v3094_v44 = vadd.f32 %v3093_v32, %v3092_v11 }
 0x7ee   :  { %v3043_v1 = vadd.f32 %v3042_v34, %v3041_v61  ;;  %v3095_v20 = vrot.slane %v3094_v44, 2 }
 0x7f0   :  { %v3044_v23 = vrot.slane %v3043_v1, 1  ;;  %v3096_v8 = vadd.f32 %v3095_v20, %v3094_v44 }
 0x7f2   :  { %v3045_v36 = vadd.f32 %v3044_v23, %v3043_v1  ;;  %v3097_v48 = vrot.slane %v3096_v8, 1 }
 0x7f4   :  { %v3098_v28 = vadd.f32 %v3097_v48, %v3096_v8  ;;  %v6614_v45 = vmul.f32 0.0078125, %v3045_v36 }
 0x7f6   :  { %v3100_v18 = vmul.f32 0.0078125, %v3098_v28  ;;  %v3101_v27 = vmul.f32 %v6614_v45, %v6614_v45  ;;  %v3104_v52 = vsub.f32 %v6495_v13, %v6614_v45  ;;  %v3105_v51 = vsub.f32 %v6497_v21, %v6614_v45 }
 0x7f7   :  { %v3112_v58 = vsub.f32 %v6554_v5, %v6614_v45  ;;  %v3113_v29 = vsub.f32 %v6556_v55, %v6614_v45  ;;  %v3114_v13 = vsub.f32 %v6569_v24, %v6614_v45  ;;  %v3115_v53 = vsub.f32 %v6575_v6, %v6614_v45 }
 0x7f8   :  { %v3102_v37 = vsub.f32 %v3100_v18, %v3101_v27  ;;  %v3116_v17 = vsub.f32 %v6577_v16, %v6614_v45  ;;  %v3117_v39 = vsub.f32 %v6590_v43, %v6614_v45  ;;  %v3118_v5 = vsub.f32 %v6597_v0, %v6614_v45 }
 0x7f9   :  { %v3119_v55 = vsub.f32 %v6606_v25, %v6614_v45  ;;  %v3106_v25 = vsub.f32 %v6499_v49, %v6614_v45  ;;  %v3107_v20 = vsub.f32 %v6503_v7, %v6614_v45  ;;  %v3108_v48 = vsub.f32 %v6523_v4, %v6614_v45 }
 0x7fa   :  { %v3103_v57 = vmax.f32 %v3102_v37, 0.0  ;;  %v3109_v27 = vsub.f32 %v6531_v62, %v6614_v45 }
 0x7fc   :  { %v3120_v33 = vadd.f32 1e-05, %v3103_v57 }
 0x7fe   :  { %4553 = vrsqrt.f32 %v3120_v33  ;;  %vm3127_vm10 = vweird.f32 %v3120_v33 }
 0x804   :  { %v4554_v59 = vpop.eup %4553 }
 0x805   :  { %v3122_v60 = vmul.f32 %v4554_v59, %v3120_v33  ;;  %vm3128_vm0 = vweird.f32 %v4554_v59  ;;  %v3110_v33 = vsub.f32 %v6529_v15, %v6614_v45 }
 0x806   :  { %vm3129_vm14 = vmor %vm3127_vm10, %vm3128_vm0 }
 0x807   :  { %v3123_v30 = vmul.f32 %v4554_v59, %v3122_v60 }
 0x809   :  { %v3124_v3 = vmul.f32 0.5, %v3123_v30  ;;  %v3111_v30 = vsub.f32 %v6545_v12, %v6614_v45 }
 0x80b   :  { %v3125_v2 = vsub.f32 1.5, %v3124_v3 }
 0x80d   :  { %v3126_v40 = vmul.f32 %v4554_v59, %v3125_v2 }
 0x80f   :  { %v3130_v19 = vsel %vm3129_vm14, %v4554_v59, %v3126_v40 }
 0x810   :  { %v3132_v10 = vmul.f32 %v3131_v38, %v3130_v19 }
 0x812   :  { %v3133_v50 = vperm.slane %v3132_v10, 0 }
 0x814   :  { %v3134_v42 = vmul.f32 %v3133_v50, %v3104_v52  ;;  %v3135_v31 = vmul.f32 %v3133_v50, %v3105_v51  ;;  %v3142_v14 = vmul.f32 %v3133_v50, %v3112_v58  ;;  %v3143_v24 = vmul.f32 %v3133_v50, %v3113_v29 }
 0x815   :  { %v3144_v54 = vmul.f32 %v3133_v50, %v3114_v13  ;;  %v3145_v41 = vmul.f32 %v3133_v50, %v3115_v53  ;;  %v3146_v6 = vmul.f32 %v3133_v50, %v3116_v17  ;;  %v3147_v35 = vmul.f32 %v3133_v50, %v3117_v39  ;;  %v3486_v39 = vld [vmem:[%s7280_s23 + $0x8] sm:$0xff] }
 0x816   :  { %v3154_v63 = vadd.f32 %v4541_v9, %v3134_v42  ;;  %v3155_v21 = vadd.f32 %v4541_v9, %v3135_v31  ;;  %v3148_v46 = vmul.f32 %v3133_v50, %v3118_v5  ;;  %v3149_v16 = vmul.f32 %v3133_v50, %v3119_v55  ;;  %3549 = vmatpush.msrb.mxu2 %v3486_v39 }
 0x817   :  { %v3162_v22 = vadd.f32 %v4541_v9, %v3142_v14  ;;  %v3163_v26 = vadd.f32 %v4541_v9, %v3143_v24  ;;  %v3164_v56 = vadd.f32 %v4541_v9, %v3144_v54  ;;  %v3165_v43 = vadd.f32 %v4541_v9, %v3145_v41 }
 0x818   :  { %v3170_v47 = vmax.f32 %v3154_v63, 0.0  ;;  %v3166_v11 = vadd.f32 %v4541_v9, %v3146_v6  ;;  %v3167_v61 = vadd.f32 %v4541_v9, %v3147_v35  ;;  %v3168_v0 = vadd.f32 %v4541_v9, %v3148_v46 }
 0x819   :  { %v3169_v32 = vadd.f32 %v4541_v9, %v3149_v16  ;;  %v3171_v34 = vmax.f32 %v3155_v21, 0.0  ;;  %v3136_v44 = vmul.f32 %v3133_v50, %v3106_v25  ;;  %v3137_v8 = vmul.f32 %v3133_v50, %v3107_v20  ;;  %v6675_v21 = vld [vmem:[%s7277_s20] ss:$0 sm:$0xff] }
 0x81a   :  { %4489 = vmatmul.msk.f32.vlgmr.msrb.gmra.mxu0 %vm3008_vm9, %v3170_v47  ;;  %v3138_v18 = vmul.f32 %v3133_v50, %v3108_v48  ;;  %v3139_v57 = vmul.f32 %v3133_v50, %v3109_v27  ;;  %v3140_v60 = vmul.f32 %v3133_v50, %v3110_v33  ;;  %v3141_v2 = vmul.f32 %v3133_v50, %v3111_v30 }
 0x81b   :  { %v3156_v1 = vadd.f32 %v4541_v9, %v3136_v44  ;;  %v3157_v36 = vadd.f32 %v4541_v9, %v3137_v8  ;;  %v3178_v38 = vmax.f32 %v3162_v22, 0.0  ;;  %v3179_v15 = vmax.f32 %v3163_v26, 0.0 }
 0x81c   :  { %v3158_v49 = vadd.f32 %v4541_v9, %v3138_v18  ;;  %v3159_v7 = vadd.f32 %v4541_v9, %v3139_v57  ;;  %v3160_v4 = vadd.f32 %v4541_v9, %v3140_v60  ;;  %v3161_v62 = vadd.f32 %v4541_v9, %v3141_v2 }
 0x81d   :  { %v3172_v23 = vmax.f32 %v3156_v1, 0.0  ;;  %v3173_v28 = vmax.f32 %v3157_v36, 0.0  ;;  %v3180_v19 = vmax.f32 %v3164_v56, 0.0  ;;  %v3181_v10 = vmax.f32 %v3165_v43, 0.0 }
 0x81e   :  { %v3174_v37 = vmax.f32 %v3158_v49, 0.0  ;;  %v3175_v59 = vmax.f32 %v3159_v7, 0.0  ;;  %v3176_v3 = vmax.f32 %v3160_v4, 0.0  ;;  %v3177_v40 = vmax.f32 %v3161_v62, 0.0 }
 0x81f   :  { %v3182_v12 = vmax.f32 %v3166_v11, 0.0  ;;  %v3183_v45 = vmax.f32 %v3167_v61, 0.0  ;;  %v3184_v52 = vmax.f32 %v3168_v0, 0.0  ;;  %v3185_v50 = vmax.f32 %v3169_v32, 0.0 }
 0x822   :  { %4490 = vmatmul.msk.f32.gmra.mxu0 %vm3008_vm9, %v3171_v34 }
 0x82a   :  { %4491 = vmatmul.msk.f32.gmra.mxu0 %vm3008_vm9, %v3172_v23 }
 0x832   :  { %4492 = vmatmul.msk.f32.gmra.mxu0 %vm3008_vm9, %v3173_v28 }
 0x83a   :  { %4493 = vmatmul.msk.f32.gmra.mxu0 %vm3008_vm9, %v3174_v37 }
 0x842   :  { %4494 = vmatmul.msk.f32.gmra.mxu0 %vm3008_vm9, %v3175_v59 }
 0x84a   :  { %4495 = vmatmul.msk.f32.gmra.mxu0 %vm3008_vm9, %v3176_v3 }
 0x852   :  { %4496 = vmatmul.msk.f32.gmra.mxu0 %vm3008_vm9, %v3177_v40 }
 0x85a   :  { %4497 = vmatmul.msk.f32.gmra.mxu0 %vm3008_vm9, %v3178_v38 }
 0x862   :  { %4498 = vmatmul.msk.f32.gmra.mxu0 %vm3008_vm9, %v3179_v15 }
 0x86a   :  { %4499 = vmatmul.msk.f32.gmra.mxu0 %vm3008_vm9, %v3180_v19 }
 0x872   :  { %4500 = vmatmul.msk.f32.gmra.mxu0 %vm3008_vm9, %v3181_v10 }
 0x87a   :  { %4501 = vmatmul.msk.f32.gmra.mxu0 %vm3008_vm9, %v3182_v12 }
 0x882   :  { %4502 = vmatmul.msk.f32.gmra.mxu0 %vm3008_vm9, %v3183_v45 }
 0x88a   :  { %4503 = vmatmul.msk.f32.gmra.mxu0 %vm3008_vm9, %v3184_v52 }
 0x892   :  { %4504 = vmatmul.msk.f32.gmra.mxu0 %vm3008_vm9, %v3185_v50 }
 0x897   :  { %v3260_v9 = vpop.f32.mrf.mxu0 }
 0x898   :  { %v6684_v55 = vadd.f32 %v6675_v21, %v3260_v9 }
 0x89a   :  { %v3345_v6 = vmul.f32 %v6684_v55, %v6684_v55  ;;  %v3308_v22 = vsel %vm481_vm5, %v6684_v55, 0.0 }
 0x89c   :  { %v3361_v61 = vsel %vm481_vm5, %v3345_v6, 0.0 }
 0x89f   :  { %v3263_v51 = vpop.f32.mrf.mxu0 }
 0x8a0   :  { %v6681_v5 = vadd.f32 %v6675_v21, %v3263_v51 }
 0x8a2   :  { %v3346_v54 = vmul.f32 %v6681_v5, %v6681_v5  ;;  %v3309_v35 = vsel %vm481_vm5, %v6681_v5, 0.0 }
 0x8a3   :  { %v3310_v0 = vadd.f32 %v3309_v35, %v3308_v22 }
 0x8a4   :  { %v3362_v26 = vsel %vm481_vm5, %v3346_v54, 0.0 }
 0x8a5   :  { %v3363_v20 = vadd.f32 %v3362_v26, %v3361_v61 }
 0x8a7   :  { %v3266_v42 = vpop.f32.mrf.mxu0 }
 0x8a8   :  { %v6687_v24 = vadd.f32 %v6675_v21, %v3266_v42 }
 0x8aa   :  { %v3347_v46 = vmul.f32 %v6687_v24, %v6687_v24  ;;  %v3311_v56 = vsel %vm481_vm5, %v6687_v24, 0.0 }
 0x8ab   :  { %v3312_v23 = vadd.f32 %v3311_v56, %v3310_v0 }
 0x8ac   :  { %v3364_v25 = vsel %vm481_vm5, %v3347_v46, 0.0 }
 0x8ad   :  { %v3365_v18 = vadd.f32 %v3364_v25, %v3363_v20 }
 0x8af   :  { %v3269_v31 = vpop.f32.mrf.mxu0 }
 0x8b0   :  { %v6692_v41 = vadd.f32 %v6675_v21, %v3269_v31 }
 0x8b2   :  { %v3348_v43 = vmul.f32 %v6692_v41, %v6692_v41  ;;  %v3313_v34 = vsel %vm481_vm5, %v6692_v41, 0.0 }
 0x8b3   :  { %v3314_v49 = vadd.f32 %v3313_v34, %v3312_v23 }
 0x8b4   :  { %v3366_v8 = vsel %vm481_vm5, %v3348_v43, 0.0 }
 0x8b5   :  { %v3367_v33 = vadd.f32 %v3366_v8, %v3365_v18 }
 0x8b7   :  { %v3272_v63 = vpop.f32.mrf.mxu0 }
 0x8b8   :  { %v6701_v16 = vadd.f32 %v6675_v21, %v3272_v63 }
 0x8ba   :  { %v3349_v44 = vmul.f32 %v6701_v16, %v6701_v16  ;;  %v3315_v36 = vsel %vm481_vm5, %v6701_v16, 0.0 }
 0x8bb   :  { %v3316_v59 = vadd.f32 %v3315_v36, %v3314_v49 }
 0x8bc   :  { %v3368_v27 = vsel %vm481_vm5, %v3349_v44, 0.0 }
 0x8bd   :  { %v3369_v2 = vadd.f32 %v3368_v27, %v3367_v33 }
 0x8bf   :  { %v3275_v58 = vpop.f32.mrf.mxu0 }
 0x8c0   :  { %v6711_v11 = vadd.f32 %v6675_v21, %v3275_v58 }
 0x8c2   :  { %v3350_v48 = vmul.f32 %v6711_v11, %v6711_v11  ;;  %v3317_v37 = vsel %vm481_vm5, %v6711_v11, 0.0 }
 0x8c3   :  { %v3318_v62 = vadd.f32 %v3317_v37, %v3316_v59 }
 0x8c4   :  { %v3370_v60 = vsel %vm481_vm5, %v3350_v48, 0.0 }
 0x8c5   :  { %v3371_v12 = vadd.f32 %v3370_v60, %v3369_v2 }
 0x8c7   :  { %v3278_v29 = vpop.f32.mrf.mxu0 }
 0x8c8   :  { %v6720_v1 = vadd.f32 %v6675_v21, %v3278_v29 }
 0x8ca   :  { %v3351_v57 = vmul.f32 %v6720_v1, %v6720_v1  ;;  %v3319_v4 = vsel %vm481_vm5, %v6720_v1, 0.0 }
 0x8cb   :  { %v3320_v45 = vadd.f32 %v3319_v4, %v3318_v62 }
 0x8cc   :  { %v3372_v38 = vsel %vm481_vm5, %v3351_v57, 0.0 }
 0x8cd   :  { %v3373_v42 = vadd.f32 %v3372_v38, %v3371_v12 }
 0x8cf   :  { %v3281_v47 = vpop.f32.mrf.mxu0 }
 0x8d0   :  { %v6728_v28 = vadd.f32 %v6675_v21, %v3281_v47 }
 0x8d2   :  { %v3352_v30 = vmul.f32 %v6728_v28, %v6728_v28  ;;  %v3321_v15 = vsel %vm481_vm5, %v6728_v28, 0.0 }
 0x8d3   :  { %v3322_v31 = vadd.f32 %v3321_v15, %v3320_v45 }
 0x8d4   :  { %v3374_v52 = vsel %vm481_vm5, %v3352_v30, 0.0 }
 0x8d7   :  { %v3284_v13 = vpop.f32.mrf.mxu0 }
 0x8d8   :  { %v6736_v7 = vadd.f32 %v6675_v21, %v3284_v13  ;;  %v3375_v13 = vadd.f32 %v3374_v52, %v3373_v42 }
 0x8da   :  { %v3353_v19 = vmul.f32 %v6736_v7, %v6736_v7  ;;  %v3323_v50 = vsel %vm481_vm5, %v6736_v7, 0.0 }
 0x8dc   :  { %v3376_v63 = vsel %vm481_vm5, %v3353_v19, 0.0 }
 0x8dd   :  { %v3377_v6 = vadd.f32 %v3376_v63, %v3375_v13  ;;  %v3485_v13 = vld [vmem:[%s7280_s23] sm:$0xff] }
 0x8de   :  { %3550 = vmatpush.msrb.mxu2 %v3485_v13 }
 0x8df   :  { %v3287_v53 = vpop.f32.mrf.mxu0 }
 0x8e0   :  { %v6744_v3 = vadd.f32 %v6675_v21, %v3287_v53  ;;  %v3324_v53 = vadd.f32 %v3323_v50, %v3322_v31 }
 0x8e2   :  { %v3354_v9 = vmul.f32 %v6744_v3, %v6744_v3  ;;  %v3325_v58 = vsel %vm481_vm5, %v6744_v3, 0.0 }
 0x8e3   :  { %v3326_v35 = vadd.f32 %v3325_v58, %v3324_v53 }
 0x8e7   :  { %v3290_v17 = vpop.f32.mrf.mxu0 }
 0x8e8   :  { %v6752_v10 = vadd.f32 %v6675_v21, %v3290_v17  ;;  %v3378_v17 = vsel %vm481_vm5, %v3354_v9, 0.0 }
 0x8e9   :  { %v3379_v61 = vadd.f32 %v3378_v17, %v3377_v6 }
 0x8ea   :  { %v3355_v29 = vmul.f32 %v6752_v10, %v6752_v10  ;;  %v3327_v39 = vsel %vm481_vm5, %v6752_v10, 0.0 }
 0x8eb   :  { %v3328_v0 = vadd.f32 %v3327_v39, %v3326_v35 }
 0x8ec   :  { %v3380_v22 = vsel %vm481_vm5, %v3355_v29, 0.0 }
 0x8ed   :  { %v3381_v44 = vadd.f32 %v3380_v22, %v3379_v61 }
 0x8ef   :  { %v3293_v14 = vpop.f32.mrf.mxu0 }
 0x8f0   :  { %v6760_v51 = vadd.f32 %v6675_v21, %v3293_v14 }
 0x8f2   :  { %v3356_v14 = vmul.f32 %v6760_v51, %v6760_v51  ;;  %v3329_v26 = vsel %vm481_vm5, %v6760_v51, 0.0 }
 0x8f3   :  { %v3330_v20 = vadd.f32 %v3329_v26, %v3328_v0 }
 0x8f7   :  { %v3296_v32 = vpop.f32.mrf.mxu0 }
 0x8f8   :  { %v6768_v47 = vadd.f32 %v6675_v21, %v3296_v32  ;;  %v3382_v32 = vsel %vm481_vm5, %v3356_v14, 0.0 }
 0x8f9   :  { %v3383_v48 = vadd.f32 %v3382_v32, %v3381_v44 }
 0x8fa   :  { %v3357_v56 = vmul.f32 %v6768_v47, %v6768_v47  ;;  %v3331_v25 = vsel %vm481_vm5, %v6768_v47, 0.0 }
 0x8fb   :  { %v3332_v18 = vadd.f32 %v3331_v25, %v3330_v20 }
 0x8fc   :  { %v3384_v23 = vsel %vm481_vm5, %v3357_v56, 0.0 }
 0x8fd   :  { %v3385_v37 = vadd.f32 %v3384_v23, %v3383_v48 }
 0x8ff   :  { %v3299_v40 = vpop.f32.mrf.mxu0 }
 0x900   :  { %v6776_v54 = vadd.f32 %v6675_v21, %v3299_v40 }
 0x902   :  { %v3358_v34 = vmul.f32 %v6776_v54, %v6776_v54  ;;  %v3333_v8 = vsel %vm481_vm5, %v6776_v54, 0.0 }
 0x903   :  { %v3334_v57 = vadd.f32 %v3333_v8, %v3332_v18 }
 0x904   :  { %v3386_v49 = vsel %vm481_vm5, %v3358_v34, 0.0 }
 0x905   :  { %v3387_v4 = vadd.f32 %v3386_v49, %v3385_v37 }
 0x907   :  { %v3302_v46 = vpop.f32.mrf.mxu0 }
 0x908   :  { %v6784_v43 = vadd.f32 %v6675_v21, %v3302_v46 }
 0x90a   :  { %v3359_v36 = vmul.f32 %v6784_v43, %v6784_v43  ;;  %v3335_v27 = vsel %vm481_vm5, %v6784_v43, 0.0 }
 0x90b   :  { %v3336_v30 = vadd.f32 %v3335_v27, %v3334_v57 }
 0x90c   :  { %v3388_v59 = vsel %vm481_vm5, %v3359_v36, 0.0  ;;  %v4543_v36 = vld [vmem:[%s7279_s22] ss:$0 sm:$0xff] }
 0x90d   :  { %v3389_v40 = vadd.f32 %v3388_v59, %v3387_v4 }
 0x90f   :  { %v3305_v33 = vpop.f32.mrf.mxu0 }
 0x910   :  { %v6801_v60 = vadd.f32 %v6675_v21, %v3305_v33 }
 0x912   :  { %v3337_v2 = vsel %vm481_vm5, %v6801_v60, 0.0  ;;  %v3360_v62 = vmul.f32 %v6801_v60, %v6801_v60 }
 0x913   :  { %v3338_v38 = vadd.f32 %v3337_v2, %v3336_v30 }
 0x914   :  { %v3390_v15 = vsel %vm481_vm5, %v3360_v62, 0.0 }
 0x915   :  { %v3339_v19 = vrot.slane %v3338_v38, 4  ;;  %v3391_v12 = vadd.f32 %v3390_v15, %v3389_v40 }
 0x917   :  { %v3340_v45 = vadd.f32 %v3339_v19, %v3338_v38  ;;  %v3392_v52 = vrot.slane %v3391_v12, 4 }
 0x919   :  { %v3341_v50 = vrot.slane %v3340_v45, 2  ;;  %v3393_v9 = vadd.f32 %v3392_v52, %v3391_v12 }
 0x91b   :  { %v3342_v21 = vadd.f32 %v3341_v50, %v3340_v45  ;;  %v3394_v42 = vrot.slane %v3393_v9, 2 }
 0x91d   :  { %v3343_v31 = vrot.slane %v3342_v21, 1  ;;  %v3395_v63 = vadd.f32 %v3394_v42, %v3393_v9 }
 0x91f   :  { %v3344_v58 = vadd.f32 %v3343_v31, %v3342_v21  ;;  %v3396_v29 = vrot.slane %v3395_v63, 1 }
 0x921   :  { %v3397_v53 = vadd.f32 %v3396_v29, %v3395_v63  ;;  %v6811_v17 = vmul.f32 0.0078125, %v3344_v58 }
 0x923   :  { %v3399_v39 = vmul.f32 0.0078125, %v3397_v53  ;;  %v3400_v14 = vmul.f32 %v6811_v17, %v6811_v17  ;;  %v3418_v6 = vsub.f32 %v6801_v60, %v6811_v17  ;;  %v3413_v46 = vsub.f32 %v6752_v10, %v6811_v17 }
 0x924   :  { %v3414_v22 = vsub.f32 %v6760_v51, %v6811_v17  ;;  %v3415_v56 = vsub.f32 %v6768_v47, %v6811_v17  ;;  %v3416_v61 = vsub.f32 %v6776_v54, %v6811_v17  ;;  %v3417_v0 = vsub.f32 %v6784_v43, %v6811_v17  ;;  %v3430_v51 = vld [vmem:[%s7278_s21] sm:$0x1] }
 0x925   :  { %v3401_v35 = vsub.f32 %v3399_v39, %v3400_v14  ;;  %v3403_v43 = vsub.f32 %v6684_v55, %v6811_v17  ;;  %v3404_v48 = vsub.f32 %v6681_v5, %v6811_v17  ;;  %v3411_v57 = vsub.f32 %v6736_v7, %v6811_v17 }
 0x926   :  { %v3412_v33 = vsub.f32 %v6744_v3, %v6811_v17  ;;  %v3405_v3 = vsub.f32 %v6687_v24, %v6811_v17  ;;  %v3406_v31 = vsub.f32 %v6692_v41, %v6811_v17  ;;  %v3407_v13 = vsub.f32 %v6701_v16, %v6811_v17 }
 0x927   :  { %v3402_v26 = vmax.f32 %v3401_v35, 0.0  ;;  %v3408_v14 = vsub.f32 %v6711_v11, %v6811_v17 }
 0x929   :  { %v3419_v32 = vadd.f32 1e-05, %v3402_v26 }
 0x92b   :  { %4555 = vrsqrt.f32 %v3419_v32  ;;  %vm3426_vm1 = vweird.f32 %v3419_v32 }
 0x931   :  { %v4556_v25 = vpop.eup %4555 }
 0x932   :  { %v3421_v34 = vmul.f32 %v4556_v25, %v3419_v32  ;;  %vm3427_vm15 = vweird.f32 %v4556_v25 }
 0x933   :  { %vm3428_vm2 = vmor %vm3426_vm1, %vm3427_vm15 }
 0x934   :  { %v3422_v44 = vmul.f32 %v4556_v25, %v3421_v34 }
 0x936   :  { %v3423_v20 = vmul.f32 0.5, %v3422_v44 }
 0x938   :  { %v3424_v10 = vsub.f32 1.5, %v3423_v20  ;;  %v3967_v20 = vld [vmem:[#allocation2 + $0x138] sm:$0x3] }
 0x93a   :  { %v3425_v23 = vmul.f32 %v4556_v25, %v3424_v10  ;;  %v3966_v10 = vld [vmem:[#allocation2 + $0x128] sm:$0x3] }
 0x93b   :  { %4012 = vrot.lane.b32.xlu1 %v3966_v10, %s4584_s9 }
 0x93c   :  { %v3429_v47 = vsel %vm3428_vm2, %v4556_v25, %v3425_v23 }
 0x93d   :  { %v3431_v54 = vmul.f32 %v3430_v51, %v3429_v47  ;;  %v3743_v51 = vld [vmem:[#allocation2 + $0x130] sm:$0xff] }
 0x93e   :  { %3790 = vrot.lane.b32.xlu0 %v3743_v51, %s4584_s9 }
 0x93f   :  { %v3432_v8 = vperm.slane %v3431_v54, 0 }
 0x941   :  { %v3433_v18 = vmul.f32 %v3432_v8, %v3403_v43  ;;  %v3434_v49 = vmul.f32 %v3432_v8, %v3404_v48  ;;  %v3441_v55 = vmul.f32 %v3432_v8, %v3411_v57  ;;  %v3442_v60 = vmul.f32 %v3432_v8, %v3412_v33 }
 0x942   :  { %v3443_v4 = vmul.f32 %v3432_v8, %v3413_v46  ;;  %v3444_v30 = vmul.f32 %v3432_v8, %v3414_v22  ;;  %v3445_v2 = vmul.f32 %v3432_v8, %v3415_v56  ;;  %v3446_v62 = vmul.f32 %v3432_v8, %v3416_v61 }
 0x943   :  { %v3453_v27 = vadd.f32 %v4543_v36, %v3433_v18  ;;  %v3454_v59 = vadd.f32 %v4543_v36, %v3434_v49  ;;  %v3447_v5 = vmul.f32 %v3432_v8, %v3417_v0  ;;  %v3448_v40 = vmul.f32 %v3432_v8, %v3418_v6 }
 0x944   :  { %v3461_v38 = vadd.f32 %v4543_v36, %v3441_v55  ;;  %v3462_v15 = vadd.f32 %v4543_v36, %v3442_v60  ;;  %v3463_v19 = vadd.f32 %v4543_v36, %v3443_v4  ;;  %v3464_v12 = vadd.f32 %v4543_v36, %v3444_v30 }
 0x945   :  { %v3469_v37 = vmax.f32 %v3453_v27, 0.0  ;;  %v3465_v45 = vadd.f32 %v4543_v36, %v3445_v2  ;;  %v3466_v7 = vadd.f32 %v4543_v36, %v3446_v62  ;;  %v3467_v52 = vadd.f32 %v4543_v36, %v3447_v5 }
 0x946   :  { %v3468_v50 = vadd.f32 %v4543_v36, %v3448_v40  ;;  %v3470_v9 = vmax.f32 %v3454_v59, 0.0  ;;  %v3435_v21 = vmul.f32 %v3432_v8, %v3405_v3  ;;  %v3436_v58 = vmul.f32 %v3432_v8, %v3406_v31 }
 0x947   :  { %4505 = vmatmul.msk.f32.vlgmr.msrb.gmra.mxu2 %vm481_vm5, %v3469_v37  ;;  %v3437_v39 = vmul.f32 %v3432_v8, %v3407_v13  ;;  %v3438_v35 = vmul.f32 %v3432_v8, %v3408_v14  ;;  %v3409_v46 = vsub.f32 %v6720_v1, %v6811_v17  ;;  %v3410_v56 = vsub.f32 %v6728_v28, %v6811_v17  ;;  %v3742_v28 = vld [vmem:[#allocation2 + $0x120] sm:$0xff] }
 0x948   :  { %v3455_v42 = vadd.f32 %v4543_v36, %v3435_v21  ;;  %v3456_v29 = vadd.f32 %v4543_v36, %v3436_v58  ;;  %v3477_v25 = vmax.f32 %v3461_v38, 0.0  ;;  %v3478_v1 = vmax.f32 %v3462_v15, 0.0  ;;  %3788 = vrot.lane.b32.xlu2 %v3742_v28, %s4584_s9 }
 0x949   :  { %v3457_v24 = vadd.f32 %v4543_v36, %v3437_v39  ;;  %v3458_v41 = vadd.f32 %v4543_v36, %v3438_v35  ;;  %v3439_v26 = vmul.f32 %v3432_v8, %v3409_v46  ;;  %v3440_v0 = vmul.f32 %v3432_v8, %v3410_v56 }
 0x94a   :  { %v3471_v63 = vmax.f32 %v3455_v42, 0.0  ;;  %v3472_v53 = vmax.f32 %v3456_v29, 0.0  ;;  %v3479_v34 = vmax.f32 %v3463_v19, 0.0  ;;  %v3480_v44 = vmax.f32 %v3464_v12, 0.0 }
 0x94b   :  { %v3473_v6 = vmax.f32 %v3457_v24, 0.0  ;;  %v3474_v22 = vmax.f32 %v3458_v41, 0.0  ;;  %v3459_v16 = vadd.f32 %v4543_v36, %v3439_v26  ;;  %v3460_v11 = vadd.f32 %v4543_v36, %v3440_v0 }
 0x94c   :  { %v3481_v17 = vmax.f32 %v3465_v45, 0.0  ;;  %v3482_v23 = vmax.f32 %v3466_v7, 0.0  ;;  %v3483_v47 = vmax.f32 %v3467_v52, 0.0  ;;  %v3484_v54 = vmax.f32 %v3468_v50, 0.0 }
 0x94d   :  { %v3475_v61 = vmax.f32 %v3459_v16, 0.0  ;;  %v3476_v32 = vmax.f32 %v3460_v11, 0.0 }
 0x94f   :  { %4506 = vmatmul.msk.f32.gmra.mxu2 %vm481_vm5, %v3470_v9 }
 0x950   :  { %4014 = vrot.lane.b32.xlu2 %v3967_v20, %s4584_s9 }
 0x957   :  { %4507 = vmatmul.msk.f32.gmra.mxu2 %vm481_vm5, %v3471_v63 }
 0x95f   :  { %4508 = vmatmul.msk.f32.gmra.mxu2 %vm481_vm5, %v3472_v53 }
 0x967   :  { %4509 = vmatmul.msk.f32.gmra.mxu2 %vm481_vm5, %v3473_v6 }
 0x96f   :  { %4510 = vmatmul.msk.f32.gmra.mxu2 %vm481_vm5, %v3474_v22 }
 0x977   :  { %4511 = vmatmul.msk.f32.gmra.mxu2 %vm481_vm5, %v3475_v61 }
 0x97f   :  { %4512 = vmatmul.msk.f32.gmra.mxu2 %vm481_vm5, %v3476_v32 }
 0x987   :  { %4513 = vmatmul.msk.f32.gmra.mxu2 %vm481_vm5, %v3477_v25 }
 0x98f   :  { %4514 = vmatmul.msk.f32.gmra.mxu2 %vm481_vm5, %v3478_v1 }
 0x997   :  { %4515 = vmatmul.msk.f32.gmra.mxu2 %vm481_vm5, %v3479_v34 }
 0x99f   :  { %4516 = vmatmul.msk.f32.gmra.mxu2 %vm481_vm5, %v3480_v44 }
 0x9a2   :  { %v6937_v42 = vpop.permute.xlu2 %3788 }
 0x9a7   :  { %4517 = vmatmul.msk.f32.gmra.mxu2 %vm481_vm5, %v3481_v17 }
 0x9aa   :  { %v6950_v39 = vpop.permute.xlu2 %4014 }
 0x9ad   :  { %v6986_v44 = vpop.permute.xlu1 %4012 }
 0x9af   :  { %4518 = vmatmul.msk.f32.gmra.mxu2 %vm481_vm5, %v3482_v23 }
 0x9b0   :  { %v6984_v34 = vpop.permute.xlu0 %3790 }
 0x9b7   :  { %4519 = vmatmul.msk.f32.gmra.mxu2 %vm481_vm5, %v3483_v47 }
 0x9bf   :  { %4520 = vmatmul.msk.f32.gmra.mxu2 %vm481_vm5, %v3484_v54  ;;  %vm4388_vm5 = vcmask 130144  }
 0x9ca   :  { %v3552_v8 = vpop.f32.mrf.mxu2 }
 0x9cb   :  { %3600 = vst.msk [vmem:[#allocation2 + $0x21] sm:$0xff] %vm114_vm11, %v3552_v8 }
 0x9d2   :  { %v3555_v43 = vpop.f32.mrf.mxu2  ;;  %v3856_v36 = vld [vmem:[#allocation2 + $0x28] sm:$0x3]  ;;  %v6874_v48 = vld [vmem:[#allocation2 + $0x20] sm:$0xff] }
 0x9d3   :  { %3601 = vst.msk [vmem:[#allocation2 + $0x31] sm:$0xff] %vm114_vm11, %v3555_v43  ;;  %3888 = vrot.lane.b32.xlu1 %v3856_v36, %s4585_s5  ;;  %3664 = vrot.lane.b32.xlu2 %v6874_v48, %s4585_s5 }
 0x9da   :  { %v3558_v18 = vpop.f32.mrf.mxu2  ;;  %v3857_v49 = vld [vmem:[#allocation2 + $0x38] sm:$0x3]  ;;  %v6880_v27 = vld [vmem:[#allocation2 + $0x30] sm:$0xff] }
 0x9db   :  { %3602 = vst.msk [vmem:[#allocation2 + $0x41] sm:$0xff] %vm114_vm11, %v3558_v18  ;;  %3890 = vrot.lane.b32.xlu2 %v3857_v49, %s4585_s5  ;;  %3666 = vrot.lane.b32.xlu0 %v6880_v27, %s4585_s5 }
 0x9e2   :  { %v3561_v37 = vpop.f32.mrf.mxu2  ;;  %v3952_v57 = vld [vmem:[#allocation2 + $0x48] sm:$0x3]  ;;  %v6886_v33 = vld [vmem:[#allocation2 + $0x40] sm:$0xff] }
 0x9e3   :  { %3603 = vst.msk [vmem:[#allocation2 + $0x51] sm:$0xff] %vm114_vm11, %v3561_v37  ;;  %3984 = vrot.lane.b32.xlu2 %v3952_v57, %s4584_s9  ;;  %3760 = vrot.lane.b32.xlu0 %v6886_v33, %s4584_s9  ;;  %v3858_v55 = vld [vmem:[#allocation2 + $0x48] sm:$0x3] }
 0x9e4   :  { %3668 = vrot.lane.b32.xlu1 %v6886_v33, %s4585_s5 }
 0x9ea   :  { %v3564_v59 = vpop.f32.mrf.mxu2  ;;  %v6894_v60 = vld [vmem:[#allocation2 + $0x50] sm:$0xff]  ;;  %v3953_v30 = vld [vmem:[#allocation2 + $0x58] sm:$0x3] }
 0x9eb   :  { %3604 = vst.msk [vmem:[#allocation2 + $0x61] sm:$0xff] %vm114_vm11, %v3564_v59  ;;  %3892 = vrot.lane.b32.xlu0 %v3858_v55, %s4585_s5  ;;  %3670 = vrot.lane.b32.xlu2 %v6894_v60, %s4585_s5  ;;  %v3859_v62 = vld [vmem:[#allocation2 + $0x58] sm:$0x3] }
 0x9ec   :  { %3762 = vrot.lane.b32.xlu1 %v6894_v60, %s4584_s9 }
 0x9f2   :  { %v3567_v4 = vpop.f32.mrf.mxu2  ;;  %v6902_v2 = vld [vmem:[#allocation2 + $0x60] sm:$0xff]  ;;  %v3860_v40 = vld [vmem:[#allocation2 + $0x68] sm:$0x3] }
 0x9f3   :  { %3605 = vst.msk [vmem:[#allocation2 + $0x71] sm:$0xff] %vm114_vm11, %v3567_v4  ;;  %3986 = vrot.lane.b32.xlu0 %v3953_v30, %s4584_s9  ;;  %3764 = vrot.lane.b32.xlu2 %v6902_v2, %s4584_s9  ;;  %v3954_v38 = vld [vmem:[#allocation2 + $0x68] sm:$0x3] }
 0x9f4   :  { %3894 = vrot.lane.b32.xlu1 %v3859_v62, %s4585_s5  ;;  %v3841_v62 = vld [vmem:[#allocation2 + $0x18] sm:$0x3] }
 0x9fa   :  { %v3570_v5 = vpop.f32.mrf.mxu2  ;;  %v3955_v19 = vld [vmem:[#allocation2 + $0x78] sm:$0x3]  ;;  %v6914_v12 = vld [vmem:[#allocation2 + $0x70] sm:$0xff] }
 0x9fb   :  { %3606 = vst.msk [vmem:[#allocation2 + $0x81] sm:$0xff] %vm114_vm11, %v3570_v5  ;;  %3896 = vrot.lane.b32.xlu2 %v3860_v40, %s4585_s5  ;;  %3672 = vrot.lane.b32.xlu0 %v6902_v2, %s4585_s5  ;;  %v3861_v7 = vld [vmem:[#allocation2 + $0x78] sm:$0x3] }
 0x9fc   :  { %3988 = vrot.lane.b32.xlu1 %v3954_v38, %s4584_s9 }
 0xa02   :  { %v3573_v15 = vpop.f32.mrf.mxu2  ;;  %v6922_v52 = vld [vmem:[#allocation2 + $0x80] sm:$0xff]  ;;  %v3956_v3 = vld [vmem:[#allocation2 + $0x88] sm:$0x3] }
 0xa03   :  { %3607 = vst.msk [vmem:[#allocation2 + $0x91] sm:$0xff] %vm114_vm11, %v3573_v15  ;;  %3990 = vrot.lane.b32.xlu2 %v3955_v19, %s4584_s9  ;;  %3766 = vrot.lane.b32.xlu0 %v6914_v12, %s4584_s9  ;;  %v3862_v21 = vld [vmem:[#allocation2 + $0x88] sm:$0x3]  ;;  %v3617_v15 = vld [vmem:[#allocation2 + $0x10] sm:$0xff] }
 0xa04   :  { %3674 = vrot.lane.b32.xlu1 %v6914_v12, %s4585_s5 }
 0xa0a   :  { %v3576_v45 = vpop.f32.mrf.mxu2  ;;  %v6930_v9 = vld [vmem:[#allocation2 + $0x90] sm:$0xff]  ;;  %v3863_v63 = vld [vmem:[#allocation2 + $0x98] sm:$0x3] }
 0xa0b   :  { %3608 = vst.msk [vmem:[#allocation2 + $0xa1] sm:$0xff] %vm114_vm11, %v3576_v45  ;;  %3898 = vrot.lane.b32.xlu0 %v3861_v7, %s4585_s5  ;;  %3676 = vrot.lane.b32.xlu2 %v6922_v52, %s4585_s5  ;;  %v3957_v58 = vld [vmem:[#allocation2 + $0x98] sm:$0x3] }
 0xa0c   :  { %3768 = vrot.lane.b32.xlu1 %v6922_v52, %s4584_s9 }
 0xa12   :  { %v3579_v50 = vpop.f32.mrf.mxu2  ;;  %v3958_v13 = vld [vmem:[#allocation2 + $0xa8] sm:$0x3]  ;;  %v6944_v53 = vld [vmem:[#allocation2 + $0xa0] sm:$0xff] }
 0xa13   :  { %3609 = vst.msk [vmem:[#allocation2 + $0xb1] sm:$0xff] %vm114_vm11, %v3579_v50  ;;  %3992 = vrot.lane.b32.xlu0 %v3956_v3, %s4584_s9  ;;  %3770 = vrot.lane.b32.xlu2 %v6930_v9, %s4584_s9  ;;  %v3864_v14 = vld [vmem:[#allocation2 + $0xa8] sm:$0x3] }
 0xa14   :  { %3900 = vrot.lane.b32.xlu1 %v3862_v21, %s4585_s5  ;;  %v3616_v21 = vld [vmem:[#allocation2] sm:$0xff] }
 0xa1a   :  { %v3582_v31 = vpop.f32.mrf.mxu2  ;;  %v6954_v6 = vld [vmem:[#allocation2 + $0xb0] sm:$0xff]  ;;  %v3959_v46 = vld [vmem:[#allocation2 + $0xb8] sm:$0x3] }
 0xa1b   :  { %3610 = vst.msk [vmem:[#allocation2 + $0xc1] sm:$0xff] %vm114_vm11, %v3582_v31  ;;  %3902 = vrot.lane.b32.xlu2 %v3863_v63, %s4585_s5  ;;  %3678 = vrot.lane.b32.xlu0 %v6930_v9, %s4585_s5  ;;  %v3865_v26 = vld [vmem:[#allocation2 + $0xb8] sm:$0x3]  ;;  %v3840_v63 = vld [vmem:[#allocation2 + $0x8] sm:$0x3] }
 0xa1c   :  { %3994 = vrot.lane.b32.xlu1 %v3957_v58, %s4584_s9 }
 0xa22   :  { %v3585_v29 = vpop.f32.mrf.mxu2  ;;  %v6964_v22 = vld [vmem:[#allocation2 + $0xc0] sm:$0xff]  ;;  %v3866_v61 = vld [vmem:[#allocation2 + $0xc8] sm:$0x3] }
 0xa23   :  { %3611 = vst.msk [vmem:[#allocation2 + $0xd1] sm:$0xff] %vm114_vm11, %v3585_v29  ;;  %3996 = vrot.lane.b32.xlu2 %v3958_v13, %s4584_s9  ;;  %3772 = vrot.lane.b32.xlu0 %v6944_v53, %s4584_s9  ;;  %v3960_v0 = vld [vmem:[#allocation2 + $0xc8] sm:$0x3] }
 0xa24   :  { %3680 = vrot.lane.b32.xlu1 %v6944_v53, %s4585_s5 }
 0xa2a   :  { %v3588_v24 = vpop.f32.mrf.mxu2  ;;  %v3961_v25 = vld [vmem:[#allocation2 + $0xd8] sm:$0x3]  ;;  %v6978_v1 = vld [vmem:[#allocation2 + $0xd0] sm:$0xff] }
 0xa2b   :  { %3612 = vst.msk [vmem:[#allocation2 + $0xe1] sm:$0xff] %vm114_vm11, %v3588_v24  ;;  %3904 = vrot.lane.b32.xlu0 %v3864_v14, %s4585_s5  ;;  %3682 = vrot.lane.b32.xlu2 %v6954_v6, %s4585_s5  ;;  %v3867_v17 = vld [vmem:[#allocation2 + $0xd8] sm:$0x3] }
 0xa2c   :  { %3774 = vrot.lane.b32.xlu1 %v6954_v6, %s4584_s9 }
 0xa2d   :  { %v6962_v35 = vpop.permute.xlu2 %3664 }
 0xa2e   :  { %v3712_v14 = vadd.f32 %v6962_v35, %v3616_v21 }
 0xa32   :  { %v3591_v41 = vpop.f32.mrf.mxu2  ;;  %v6992_v20 = vld [vmem:[#allocation2 + $0xe0] sm:$0xff]  ;;  %v3962_v47 = vld [vmem:[#allocation2 + $0xe8] sm:$0x3] }
 0xa33   :  { %3613 = vst.msk [vmem:[#allocation2 + $0xf1] sm:$0xff] %vm114_vm11, %v3591_v41  ;;  %3998 = vrot.lane.b32.xlu0 %v3959_v46, %s4584_s9  ;;  %3776 = vrot.lane.b32.xlu2 %v6964_v22, %s4584_s9  ;;  %v3868_v8 = vld [vmem:[#allocation2 + $0xe8] sm:$0x3] }
 0xa34   :  { %3906 = vrot.lane.b32.xlu1 %v3865_v26, %s4585_s5  ;;  %v3842_v41 = vld [vmem:[#allocation2 + $0x28] sm:$0x3] }
 0xa35   :  { %v3891_v16 = vpop.permute.xlu2 %3890 }
 0xa36   :  { %v3937_v19 = vadd.f32 %v3891_v16, %v3841_v62 }
 0xa3a   :  { %v3594_v56 = vpop.f32.mrf.mxu2  ;;  %v6999_v54 = vld [vmem:[#allocation2 + $0xf0] sm:$0xff]  ;;  %v3869_v49 = vld [vmem:[#allocation2 + $0xf8] sm:$0x3] }
 0xa3b   :  { %3614 = vst.msk [vmem:[#allocation2 + $0x101] sm:$0xff] %vm114_vm11, %v3594_v56  ;;  %3908 = vrot.lane.b32.xlu2 %v3866_v61, %s4585_s5  ;;  %3684 = vrot.lane.b32.xlu0 %v6964_v22, %s4585_s5  ;;  %v3963_v37 = vld [vmem:[#allocation2 + $0xf8] sm:$0x3] }
 0xa3c   :  { %4000 = vrot.lane.b32.xlu1 %v3960_v0, %s4584_s9 }
 0xa3d   :  { %v6976_v11 = vpop.permute.xlu2 %3984 }
 0xa42   :  { %v3597_v32 = vpop.f32.mrf.mxu2  ;;  %v3964_v4 = vld [vmem:[#allocation2 + $0x108] sm:$0x3]  ;;  %v3740_v30 = vld [vmem:[#allocation2 + $0x100] sm:$0xff] }
 0xa43   :  { %3615 = vst.msk [vmem:[#allocation2 + $0x111] sm:$0xff] %vm114_vm11, %v3597_v32  ;;  %4002 = vrot.lane.b32.xlu2 %v3961_v25, %s4584_s9  ;;  %3778 = vrot.lane.b32.xlu0 %v6978_v1, %s4584_s9  ;;  %v3870_v50 = vld [vmem:[#allocation2 + $0x108] sm:$0x3] }
 0xa44   :  { %3686 = vrot.lane.b32.xlu1 %v6978_v1, %s4585_s5 }
 0xa45   :  { %v6990_v28 = vpop.permute.xlu2 %3670  ;;  %v3889_v51 = vpop.permute.xlu1 %3888 }
 0xa46   :  { %v3936_v46 = vadd.f32 %v3889_v51, %v3840_v63 }
 0xa48   :  { %v4032_v35 = vadd.f32 %v6976_v11, %v3936_v46 }
 0xa4a   :  { %v3741_v3 = vld [vmem:[#allocation2 + $0x110] sm:$0xff]  ;;  %v3965_v32 = vld [vmem:[#allocation2 + $0x118] sm:$0x3] }
 0xa4b   :  { %3910 = vrot.lane.b32.xlu0 %v3867_v17, %s4585_s5  ;;  %3688 = vrot.lane.b32.xlu2 %v6992_v20, %s4585_s5  ;;  %v3871_v17 = vld [vmem:[#allocation2 + $0x118] sm:$0x3] }
 0xa4c   :  { %3780 = vrot.lane.b32.xlu1 %v6992_v20, %s4584_s9 }
 0xa4d   :  { %v3667_v10 = vpop.permute.xlu0 %3666  ;;  %v3765_v23 = vpop.permute.xlu2 %3764 }
 0xa4e   :  { %v3713_v45 = vadd.f32 %v3667_v10, %v3617_v15  ;;  %v3843_v15 = vld [vmem:[#allocation2 + $0x38] sm:$0x3] }
 0xa53   :  { %4004 = vrot.lane.b32.xlu0 %v3962_v47, %s4584_s9  ;;  %3782 = vrot.lane.b32.xlu2 %v6999_v54, %s4584_s9 }
 0xa54   :  { %3912 = vrot.lane.b32.xlu1 %v3868_v8, %s4585_s5 }
 0xa55   :  { %v3761_v43 = vpop.permute.xlu0 %3760  ;;  %v7005_v36 = vpop.permute.xlu2 %3896 }
 0xa56   :  { %v3669_v18 = vpop.permute.xlu1 %3668  ;;  %v7028_v61 = vadd.f32 %v3761_v43, %v3712_v14  ;;  %v3844_v14 = vld [vmem:[#allocation2 + $0x48] sm:$0x3] }
 0xa57   :  { %v3714_v26 = vadd.f32 %v3669_v18, %v6874_v48  ;;  %v4081_v18 = vrot.slane %v4032_v35, 1 }
 0xa58   :  { %v4080_v51 = vrot.slane %v7028_v61, 1  ;;  %v4192_v43 = vrot.slane %v7028_v61, 2 }
 0xa59   :  { %v7034_v10 = vadd.f32 %v3765_v23, %v3714_v26 }
 0xa5b   :  { %3914 = vrot.lane.b32.xlu2 %v3869_v49, %s4585_s5  ;;  %3690 = vrot.lane.b32.xlu0 %v6999_v54, %s4585_s5  ;;  %v4086_v49 = vrot.slane %v7034_v10, 1 }
 0xa5c   :  { %4006 = vrot.lane.b32.xlu1 %v3963_v37, %s4584_s9 }
 0xa5d   :  { %v3893_v57 = vpop.permute.xlu0 %3892  ;;  %v7011_v59 = vpop.permute.xlu2 %3990 }
 0xa5e   :  { %v3763_v55 = vpop.permute.xlu1 %3762  ;;  %v3938_v16 = vadd.f32 %v3893_v57, %v3842_v41  ;;  %v4193_v57 = vrot.slane %v4032_v35, 2 }
 0xa5f   :  { %v7020_v31 = vadd.f32 %v3763_v55, %v3713_v45  ;;  %v4082_v55 = vsel %vm1256_vm12, %v4080_v51, %v4081_v18  ;;  %v4198_v45 = vrot.slane %v7034_v10, 2  ;;  %v3846_v18 = vld [vmem:[#allocation2 + $0x68] sm:$0x3] }
 0xa60   :  { %v4194_v23 = vsel %vm1369_vm13, %v4192_v43, %v4193_v57 }
 0xa61   :  { %v4195_v56 = vrot.slane %v7020_v31, 2 }
 0xa63   :  { %4008 = vrot.lane.b32.xlu2 %v3964_v4, %s4584_s9  ;;  %3784 = vrot.lane.b32.xlu0 %v3740_v30, %s4584_s9 }
 0xa64   :  { %3692 = vrot.lane.b32.xlu1 %v3740_v30, %s4585_s5 }
 0xa65   :  { %v3987_v5 = vpop.permute.xlu0 %3986  ;;  %v7016_v40 = vpop.permute.xlu2 %3676 }
 0xa66   :  { %v3895_v38 = vpop.permute.xlu1 %3894  ;;  %v4033_v7 = vadd.f32 %v3987_v5, %v3937_v19  ;;  %v3715_v19 = vadd.f32 %v6990_v28, %v6880_v27 }
 0xa68   :  { %v4196_v29 = vrot.slane %v4033_v7, 2  ;;  %v4084_v5 = vrot.slane %v4033_v7, 1  ;;  %v3940_v7 = vadd.f32 %v7005_v36, %v3844_v14 }
 0xa6a   :  { %v4197_v25 = vsel %vm1369_vm13, %v4195_v56, %v4196_v29 }
 0xa6b   :  { %3916 = vrot.lane.b32.xlu0 %v3870_v50, %s4585_s5  ;;  %3694 = vrot.lane.b32.xlu2 %v3741_v3, %s4585_s5  ;;  %v3939_v50 = vadd.f32 %v3895_v38, %v3843_v15  ;;  %v3718_v15 = vadd.f32 %v6902_v2, %v7016_v40 }
 0xa6c   :  { %3786 = vrot.lane.b32.xlu1 %v3741_v3, %s4584_s9  ;;  %v4083_v3 = vrot.slane %v7020_v31, 1 }
 0xa6d   :  { %v3673_v58 = vpop.permute.xlu0 %3672  ;;  %v7023_v13 = vpop.permute.xlu2 %3770  ;;  %v4035_v27 = vadd.f32 %v7011_v59, %v3939_v50 }
 0xa6e   :  { %v3989_v24 = vpop.permute.xlu1 %3988  ;;  %v3716_v21 = vadd.f32 %v6886_v33, %v3673_v58  ;;  %v4085_v41 = vsel %vm1256_vm12, %v4083_v3, %v4084_v5 }
 0xa6f   :  { %v4034_v0 = vadd.f32 %v3989_v24, %v3938_v16  ;;  %v4090_v16 = vrot.slane %v4035_v27, 1  ;;  %v4202_v36 = vrot.slane %v4035_v27, 2 }
 0xa71   :  { %v4087_v47 = vrot.slane %v4034_v0, 1  ;;  %v4199_v30 = vrot.slane %v4034_v0, 2 }
 0xa73   :  { %4010 = vrot.lane.b32.xlu0 %v3965_v32, %s4584_s9  ;;  %4242 = vrot.lane.b32.xlu2 %v4197_v25, %s4587_s29  ;;  %v4088_v11 = vsel %vm1256_vm12, %v4086_v49, %v4087_v47  ;;  %v4200_v24 = vsel %vm1369_vm13, %v4198_v45, %v4199_v30 }
 0xa74   :  { %3918 = vrot.lane.b32.xlu1 %v3871_v17, %s4585_s5 }
 0xa75   :  { %v3767_v48 = vpop.permute.xlu0 %3766  ;;  %v7040_v37 = vpop.permute.xlu2 %3902 }
 0xa76   :  { %v3675_v8 = vpop.permute.xlu1 %3674  ;;  %v7053_v63 = vadd.f32 %v3767_v48, %v3715_v19  ;;  %v3845_v48 = vld [vmem:[#allocation2 + $0x58] sm:$0x3] }
 0xa77   :  { %v3717_v56 = vadd.f32 %v6894_v60, %v3675_v8 }
 0xa78   :  { %v4089_v33 = vrot.slane %v7053_v63, 1  ;;  %v4201_v26 = vrot.slane %v7053_v63, 2 }
 0xa79   :  { %v7073_v35 = vadd.f32 %v7023_v13, %v3717_v56 }
 0xa7a   :  { %v4091_v59 = vsel %vm1256_vm12, %v4089_v33, %v4090_v16  ;;  %v4203_v17 = vsel %vm1369_vm13, %v4201_v26, %v4202_v36 }
 0xa7b   :  { %4128 = vrot.lane.b32.xlu0 %v4082_v55, %s4586_s0  ;;  %4132 = vrot.lane.b32.xlu2 %v4088_v11, %s4586_s0  ;;  %v4095_v57 = vrot.slane %v7073_v35, 1  ;;  %v4207_v11 = vrot.slane %v7073_v35, 2 }
 0xa7c   :  { %4240 = vrot.lane.b32.xlu1 %v4194_v23, %s4587_s29 }
 0xa7d   :  { %v3899_v4 = vpop.permute.xlu0 %3898  ;;  %v3997_v29 = vpop.permute.xlu2 %3996 }
 0xa7e   :  { %v3769_v62 = vpop.permute.xlu1 %3768  ;;  %v3941_v60 = vadd.f32 %v3899_v4, %v3845_v48 }
 0xa7f   :  { %v7060_v28 = vadd.f32 %v3769_v62, %v3716_v21 }
 0xa81   :  { %v4204_v0 = vrot.slane %v7060_v28, 2  ;;  %v4092_v23 = vrot.slane %v7060_v28, 1 }
 0xa83   :  { %4244 = vrot.lane.b32.xlu0 %v4200_v24, %s4587_s29 }
 0xa84   :  { %4130 = vrot.lane.b32.xlu1 %v4085_v41, %s4586_s0 }
 0xa85   :  { %v3993_v38 = vpop.permute.xlu0 %3992  ;;  %v7075_v51 = vpop.permute.xlu2 %3682 }
 0xa86   :  { %v4036_v58 = vadd.f32 %v3993_v38, %v3940_v7  ;;  %v3901_v46 = vpop.permute.xlu1 %3900 }
 0xa87   :  { %v3942_v55 = vadd.f32 %v3901_v46, %v3846_v18 }
 0xa88   :  { %v4205_v32 = vrot.slane %v4036_v58, 2  ;;  %v4093_v43 = vrot.slane %v4036_v58, 1  ;;  %v3847_v58 = vld [vmem:[#allocation2 + $0x78] sm:$0x3] }
 0xa89   :  { %v4038_v19 = vadd.f32 %v3997_v29, %v3942_v55  ;;  %v3943_v46 = vadd.f32 %v7040_v37, %v3847_v58  ;;  %v3848_v37 = vld [vmem:[#allocation2 + $0x88] sm:$0x3] }
 0xa8a   :  { %v4206_v25 = vsel %vm1369_vm13, %v4204_v0, %v4205_v32  ;;  %v4094_v62 = vsel %vm1256_vm12, %v4092_v23, %v4093_v43 }
 0xa8b   :  { %4134 = vrot.lane.b32.xlu0 %v4091_v59, %s4586_s0  ;;  %4248 = vrot.lane.b32.xlu2 %v4206_v25, %s4587_s29  ;;  %v4099_v24 = vrot.slane %v4038_v19, 1  ;;  %v4211_v14 = vrot.slane %v4038_v19, 2 }
 0xa8c   :  { %4246 = vrot.lane.b32.xlu1 %v4203_v17, %s4587_s29 }
 0xa8d   :  { %v3679_v47 = vpop.permute.xlu0 %3678  ;;  %v3777_v50 = vpop.permute.xlu2 %3776 }
 0xa8e   :  { %v3995_v8 = vpop.permute.xlu1 %3994  ;;  %v3719_v33 = vadd.f32 %v6914_v12, %v3679_v47 }
 0xa8f   :  { %v4037_v49 = vadd.f32 %v3995_v8, %v3941_v60 }
 0xa91   :  { %v4096_v13 = vrot.slane %v4037_v49, 1  ;;  %v4208_v30 = vrot.slane %v4037_v49, 2  ;;  %v3849_v49 = vld [vmem:[#allocation2 + $0x98] sm:$0x3] }
 0xa93   :  { %v4209_v5 = vsel %vm1369_vm13, %v4207_v11, %v4208_v30  ;;  %v4097_v4 = vsel %vm1256_vm12, %v4095_v57, %v4096_v13 }
 0xa94   :  { %4136 = vrot.lane.b32.xlu1 %v4094_v62, %s4586_s0  ;;  %4250 = vrot.lane.b32.xlu0 %v4209_v5, %s4587_s29  ;;  %v3721_v5 = vadd.f32 %v6930_v9, %v7075_v51 }
 0xa95   :  { %4138 = vrot.lane.b32.xlu2 %v4097_v4, %s4586_s0  ;;  %v3773_v45 = vpop.permute.xlu0 %3772  ;;  %v3909_v38 = vpop.permute.xlu2 %3908 }
 0xa96   :  { %v7089_v3 = vadd.f32 %v3773_v45, %v3718_v15  ;;  %v3681_v21 = vpop.permute.xlu1 %3680 }
 0xa97   :  { %v3720_v17 = vadd.f32 %v6922_v52, %v3681_v21 }
 0xa98   :  { %v4098_v41 = vrot.slane %v7089_v3, 1  ;;  %v4210_v7 = vrot.slane %v7089_v3, 2 }
 0xa99   :  { %v7108_v47 = vadd.f32 %v3777_v50, %v3720_v17 }
 0xa9a   :  { %v4212_v2 = vsel %vm1369_vm13, %v4210_v7, %v4211_v14  ;;  %v4100_v40 = vsel %vm1256_vm12, %v4098_v41, %v4099_v24 }
 0xa9b   :  { %v4104_v52 = vrot.slane %v7108_v47, 1  ;;  %v4216_v11 = vrot.slane %v7108_v47, 2 }
 0xa9c   :  { %4252 = vrot.lane.b32.xlu1 %v4212_v2, %s4587_s29  ;;  %4140 = vrot.lane.b32.xlu0 %v4100_v40, %s4586_s0 }
 0xa9d   :  { %v3905_v29 = vpop.permute.xlu0 %3904  ;;  %v4003_v48 = vpop.permute.xlu2 %4002 }
 0xa9e   :  { %v3775_v27 = vpop.permute.xlu1 %3774  ;;  %v3944_v8 = vadd.f32 %v3905_v29, %v3848_v37 }
 0xa9f   :  { %v7099_v26 = vadd.f32 %v3775_v27, %v3719_v33  ;;  %v3850_v27 = vld [vmem:[#allocation2 + $0xa8] sm:$0x3] }
 0xaa0   :  { %v3946_v33 = vadd.f32 %v3909_v38, %v3850_v27  ;;  %v3851_v38 = vld [vmem:[#allocation2 + $0xb8] sm:$0x3] }
 0xaa1   :  { %v4101_v32 = vrot.slane %v7099_v26, 1  ;;  %v4213_v36 = vrot.slane %v7099_v26, 2 }
 0xaa5   :  { %v3999_v16 = vpop.permute.xlu0 %3998  ;;  %v3689_v4 = vpop.permute.xlu2 %3688 }
 0xaa6   :  { %v4039_v56 = vadd.f32 %v3999_v16, %v3943_v46  ;;  %v3907_v0 = vpop.permute.xlu1 %3906 }
 0xaa7   :  { %v3945_v55 = vadd.f32 %v3907_v0, %v3849_v49 }
 0xaa8   :  { %v4102_v59 = vrot.slane %v4039_v56, 1  ;;  %v4214_v25 = vrot.slane %v4039_v56, 2 }
 0xaa9   :  { %v4041_v15 = vadd.f32 %v4003_v48, %v3945_v55 }
 0xaaa   :  { %v4215_v60 = vsel %vm1369_vm13, %v4213_v36, %v4214_v25  ;;  %v4103_v12 = vsel %vm1256_vm12, %v4101_v32, %v4102_v59 }
 0xaab   :  { %4254 = vrot.lane.b32.xlu2 %v4215_v60, %s4587_s29  ;;  %4142 = vrot.lane.b32.xlu1 %v4103_v12, %s4586_s0  ;;  %v4108_v21 = vrot.slane %v4041_v15, 1  ;;  %v4220_v24 = vrot.slane %v4041_v15, 2 }
 0xaad   :  { %v3685_v43 = vpop.permute.xlu0 %3684  ;;  %v3783_v2 = vpop.permute.xlu2 %3782 }
 0xaae   :  { %v4001_v18 = vpop.permute.xlu1 %4000  ;;  %v3722_v29 = vadd.f32 %v6944_v53, %v3685_v43  ;;  %v3852_v43 = vld [vmem:[#allocation2 + $0xc8] sm:$0x3] }
 0xaaf   :  { %v4040_v57 = vadd.f32 %v4001_v18, %v3944_v8 }
 0xab1   :  { %v4105_v23 = vrot.slane %v4040_v57, 1  ;;  %v4217_v13 = vrot.slane %v4040_v57, 2 }
 0xab3   :  { %v4218_v30 = vsel %vm1369_vm13, %v4216_v11, %v4217_v13  ;;  %v4106_v62 = vsel %vm1256_vm12, %v4104_v52, %v4105_v23 }
 0xab4   :  { %4256 = vrot.lane.b32.xlu0 %v4218_v30, %s4587_s29  ;;  %4144 = vrot.lane.b32.xlu2 %v4106_v62, %s4586_s0  ;;  %v3724_v30 = vadd.f32 %v6964_v22, %v3689_v4 }
 0xab5   :  { %v3779_v19 = vpop.permute.xlu0 %3778  ;;  %v3915_v0 = vpop.permute.xlu2 %3914 }
 0xab6   :  { %v7118_v45 = vadd.f32 %v3779_v19, %v3721_v5  ;;  %v3687_v50 = vpop.permute.xlu1 %3686 }
 0xab7   :  { %v3723_v17 = vadd.f32 %v6954_v6, %v3687_v50 }
 0xab8   :  { %v4107_v14 = vrot.slane %v7118_v45, 1  ;;  %v4219_v41 = vrot.slane %v7118_v45, 2 }
 0xab9   :  { %v7136_v60 = vadd.f32 %v3783_v2, %v3723_v17 }
 0xaba   :  { %v4221_v7 = vsel %vm1369_vm13, %v4219_v41, %v4220_v24  ;;  %v4109_v9 = vsel %vm1256_vm12, %v4107_v14, %v4108_v21 }
 0xabb   :  { %4258 = vrot.lane.b32.xlu1 %v4221_v7, %s4587_s29  ;;  %v4113_v57 = vrot.slane %v7136_v60, 1  ;;  %v4225_v6 = vrot.slane %v7136_v60, 2 }
 0xabc   :  { %4146 = vrot.lane.b32.xlu0 %v4109_v9, %s4586_s0  ;;  %v3854_v9 = vld [vmem:[#allocation2 + $0xe8] sm:$0x3] }
 0xabd   :  { %v3911_v51 = vpop.permute.xlu0 %3910  ;;  %v4009_v11 = vpop.permute.xlu2 %4008 }
 0xabe   :  { %v3781_v40 = vpop.permute.xlu1 %3780  ;;  %v3947_v12 = vadd.f32 %v3911_v51, %v3851_v38 }
 0xabf   :  { %v7127_v58 = vadd.f32 %v3781_v40, %v3722_v29 }
 0xac1   :  { %v4110_v32 = vrot.slane %v7127_v58, 1  ;;  %v4222_v36 = vrot.slane %v7127_v58, 2 }
 0xac5   :  { %v4005_v46 = vpop.permute.xlu0 %4004  ;;  %v3695_v4 = vpop.permute.xlu2 %3694 }
 0xac6   :  { %v4042_v16 = vadd.f32 %v4005_v46, %v3946_v33  ;;  %v3913_v56 = vpop.permute.xlu1 %3912 }
 0xac7   :  { %v3948_v49 = vadd.f32 %v3913_v56, %v3852_v43  ;;  %v3727_v56 = vadd.f32 %v6999_v54, %v3695_v4 }
 0xac8   :  { %v4111_v59 = vrot.slane %v4042_v16, 1  ;;  %v4223_v25 = vrot.slane %v4042_v16, 2  ;;  %v3853_v16 = vld [vmem:[#allocation2 + $0xd8] sm:$0x3] }
 0xac9   :  { %v4044_v62 = vadd.f32 %v4009_v11, %v3948_v49 }
 0xaca   :  { %v4224_v48 = vsel %vm1369_vm13, %v4222_v36, %v4223_v25  ;;  %v4112_v53 = vsel %vm1256_vm12, %v4110_v32, %v4111_v59  ;;  %v3949_v32 = vadd.f32 %v3915_v0, %v3853_v16 }
 0xacb   :  { %4260 = vrot.lane.b32.xlu2 %v4224_v48, %s4587_s29  ;;  %4148 = vrot.lane.b32.xlu1 %v4112_v53, %s4586_s0  ;;  %v4117_v50 = vrot.slane %v4044_v62, 1  ;;  %v4229_v21 = vrot.slane %v4044_v62, 2  ;;  %v3855_v48 = vld [vmem:[#allocation2 + $0xf8] sm:$0x3] }
 0xacd   :  { %v3691_v37 = vpop.permute.xlu0 %3690 }
 0xace   :  { %v4007_v8 = vpop.permute.xlu1 %4006 }
 0xacf   :  { %v4043_v18 = vadd.f32 %v4007_v8, %v3947_v12 }
 0xad1   :  { %v4114_v55 = vrot.slane %v4043_v18, 1  ;;  %v4226_v52 = vrot.slane %v4043_v18, 2 }
 0xad3   :  { %v4227_v23 = vsel %vm1369_vm13, %v4225_v6, %v4226_v52  ;;  %v4115_v13 = vsel %vm1256_vm12, %v4113_v57, %v4114_v55 }
 0xad4   :  { %4262 = vrot.lane.b32.xlu0 %v4227_v23, %s4587_s29  ;;  %4150 = vrot.lane.b32.xlu2 %v4115_v13, %s4586_s0 }
 0xad5   :  { %v3785_v5 = vpop.permute.xlu0 %3784 }
 0xad6   :  { %v7145_v15 = vadd.f32 %v3785_v5, %v3724_v30  ;;  %v3693_v19 = vpop.permute.xlu1 %3692 }
 0xad7   :  { %v3726_v41 = vadd.f32 %v6992_v20, %v3693_v19  ;;  %v3725_v20 = vadd.f32 %v6978_v1, %v3691_v37  ;;  %v7166_v1 = vadd.f32 %v6984_v34, %v3727_v56 }
 0xad8   :  { %v4116_v24 = vrot.slane %v7145_v15, 1  ;;  %v4228_v14 = vrot.slane %v7145_v15, 2 }
 0xad9   :  { %v7155_v2 = vadd.f32 %v6937_v42, %v3726_v41  ;;  %v4243_v42 = vpop.permute.xlu2 %4242  ;;  %v4125_v43 = vrot.slane %v7166_v1, 1  ;;  %v4237_v11 = vrot.slane %v7166_v1, 2 }
 0xada   :  { %v4230_v7 = vsel %vm1369_vm13, %v4228_v14, %v4229_v21  ;;  %v4118_v22 = vsel %vm1256_vm12, %v4116_v24, %v4117_v50 }
 0xadb   :  { %4264 = vrot.lane.b32.xlu1 %v4230_v7, %s4587_s29  ;;  %v4122_v33 = vrot.slane %v7155_v2, 1  ;;  %v4234_v19 = vrot.slane %v7155_v2, 2 }
 0xadc   :  { %4152 = vrot.lane.b32.xlu0 %v4118_v22, %s4586_s0 }
 0xadd   :  { %v3917_v51 = vpop.permute.xlu0 %3916 }
 0xade   :  { %v3950_v40 = vadd.f32 %v3917_v51, %v3854_v9  ;;  %v3787_v29 = vpop.permute.xlu1 %3786 }
 0xadf   :  { %v7161_v36 = vadd.f32 %v3787_v29, %v3725_v20 }
 0xae0   :  { %v4046_v27 = vadd.f32 %v6986_v44, %v3950_v40 }
 0xae1   :  { %v4119_v38 = vrot.slane %v7161_v36, 1  ;;  %v4231_v37 = vrot.slane %v7161_v36, 2  ;;  %v4133_v23 = vpop.permute.xlu2 %4132 }
 0xae2   :  { %v4123_v46 = vrot.slane %v4046_v27, 1  ;;  %v4235_v30 = vrot.slane %v4046_v27, 2 }
 0xae4   :  { %v4124_v59 = vsel %vm1256_vm12, %v4122_v33, %v4123_v46  ;;  %v4236_v21 = vsel %vm1369_vm13, %v4234_v19, %v4235_v30 }
 0xae5   :  { %v4011_v25 = vpop.permute.xlu0 %4010  ;;  %4156 = vrot.lane.b32.xlu2 %v4124_v59, %s4586_s0 }
 0xae6   :  { %v4045_v17 = vadd.f32 %v4011_v25, %v3949_v32  ;;  %v3919_v44 = vpop.permute.xlu1 %3918 }
 0xae7   :  { %v3951_v53 = vadd.f32 %v3919_v44, %v3855_v48 }
 0xae8   :  { %v4120_v12 = vrot.slane %v4045_v17, 1  ;;  %v4232_v54 = vrot.slane %v4045_v17, 2 }
 0xae9   :  { %v4047_v0 = vadd.f32 %v6950_v39, %v3951_v53  ;;  %v7182_v39 = vld [vmem:[%s7281_s24] ss:$0 sm:$0xff]  ;;  %s4590_s24 = smov 12   ;;  %v4249_v7 = vpop.permute.xlu2 %4248 }
 0xaea   :  { %v4121_v8 = vsel %vm1256_vm12, %v4119_v38, %v4120_v12  ;;  %v4233_v49 = vsel %vm1369_vm13, %v4231_v37, %v4232_v54 }
 0xaeb   :  { %v4126_v18 = vrot.slane %v4047_v0, 1  ;;  %4154 = vrot.lane.b32.xlu1 %v4121_v8, %s4586_s0  ;;  %v4238_v6 = vrot.slane %v4047_v0, 2 }
 0xaed   :  { %v4129_v34 = vpop.permute.xlu0 %4128  ;;  %4266 = vrot.lane.b32.xlu2 %v4233_v49, %s4587_s29  ;;  %v4127_v57 = vsel %vm1256_vm12, %v4125_v43, %v4126_v18  ;;  %v4239_v5 = vsel %vm1369_vm13, %v4237_v11, %v4238_v6 }
 0xaee   :  { %v4176_v55 = vadd.f32 %v4129_v34, %v7028_v61  ;;  %4158 = vrot.lane.b32.xlu0 %v4127_v57, %s4586_s0  ;;  %v4241_v52 = vpop.permute.xlu1 %4240  ;;  %v4178_v61 = vadd.f32 %v4133_v23, %v7034_v10  ;;  %s4411_s0 = sshll.u32 %s7282_s25, 4  ;;  %s4412_s0 = int_to_ptr.hbm [resolvable:$true] %s4411_s0 }
 0xaf0   :  { %v4288_v13 = vadd.f32 %v4241_v52, %v4176_v55 }
 0xaf1   :  { %v4139_v27 = vpop.permute.xlu2 %4138 }
 0xaf2   :  { %v4308_v62 = vadd.f32 %v7182_v39, %v4288_v13 }
 0xaf3   :  { %4270 = vrot.lane.b32.xlu1 %v4239_v5, %s4587_s29 }
 0xaf5   :  { %v4245_v50 = vpop.permute.xlu0 %4244  ;;  %4340 = vrot.lane.b32.xlu2 %v4308_v62, %s4590_s24 }
 0xaf6   :  { %v4290_v24 = vadd.f32 %v4245_v50, %v4178_v61  ;;  %4268 = vrot.lane.b32.xlu0 %v4236_v21, %s4587_s29  ;;  %v4131_v14 = vpop.permute.xlu1 %4130  ;;  %s4591_s29 = smov [#allocation3]  }
 0xaf7   :  { %v4177_v41 = vadd.f32 %v4131_v14, %v7020_v31  ;;  %v4181_v31 = vadd.f32 %v4139_v27, %v7073_v35  ;;  %s4409_s26 = sshll.u32 %s4591_s29, 4  ;;  %s4410_s26 = int_to_ptr.vmem [resolvable:$true] %s4409_s26 }
 0xaf8   :  { %v4310_v22 = vadd.f32 %v7182_v39, %v4290_v24 }
 0xaf9   :  { %v4289_v4 = vadd.f32 %v4243_v42, %v4177_v41 }
 0xafb   :  { %v4309_v9 = vadd.f32 %v7182_v39, %v4289_v4  ;;  %4344 = vrot.lane.b32.xlu1 %v4310_v22, %s4590_s24 }
 0xafd   :  { %v4135_v10 = vpop.permute.xlu0 %4134 }
 0xafe   :  { %v4179_v51 = vadd.f32 %v4135_v10, %v7053_v63  ;;  %4342 = vrot.lane.b32.xlu0 %v4309_v9, %s4590_s24  ;;  %v4247_v40 = vpop.permute.xlu1 %4246 }
 0xb00   :  { %v4291_v29 = vadd.f32 %v4247_v40, %v4179_v51 }
 0xb02   :  { %v4311_v20 = vadd.f32 %v7182_v39, %v4291_v29 }
 0xb04   :  { %4346 = vrot.lane.b32.xlu2 %v4311_v20, %s4590_s24 }
 0xb05   :  { %v4255_v44 = vpop.permute.xlu2 %4254 }
 0xb06   :  { %v4251_v33 = vpop.permute.xlu0 %4250  ;;  %v4137_v46 = vpop.permute.xlu1 %4136 }
 0xb07   :  { %v4293_v16 = vadd.f32 %v4251_v33, %v4181_v31  ;;  %v4180_v56 = vadd.f32 %v4137_v46, %v7060_v28 }
 0xb09   :  { %v4313_v32 = vadd.f32 %v7182_v39, %v4293_v16  ;;  %v4292_v59 = vadd.f32 %v4249_v7, %v4180_v56 }
 0xb0b   :  { %v4312_v63 = vadd.f32 %v7182_v39, %v4292_v59  ;;  %4350 = vrot.lane.b32.xlu1 %v4313_v32, %s4590_s24 }
 0xb0d   :  { %4348 = vrot.lane.b32.xlu0 %v4312_v63, %s4590_s24 }
 0xb0e   :  { %v4141_v25 = vpop.permute.xlu0 %4140  ;;  %v4253_v17 = vpop.permute.xlu1 %4252 }
 0xb0f   :  { %v4182_v42 = vadd.f32 %v4141_v25, %v7089_v3  ;;  %v4145_v12 = vpop.permute.xlu2 %4144 }
 0xb10   :  { %v4184_v0 = vadd.f32 %v4145_v12, %v7108_v47 }
 0xb11   :  { %v4294_v48 = vadd.f32 %v4253_v17, %v4182_v42 }
 0xb13   :  { %v4314_v35 = vadd.f32 %v7182_v39, %v4294_v48 }
 0xb15   :  { %4352 = vrot.lane.b32.xlu2 %v4314_v35, %s4590_s24 }
 0xb1d   :  { %v4143_v28 = vpop.permute.xlu1 %4142 }
 0xb1e   :  { %v4183_v53 = vadd.f32 %v4143_v28, %v7099_v26 }
 0xb20   :  { %v4295_v38 = vadd.f32 %v4255_v44, %v4183_v53 }
 0xb22   :  { %v4315_v54 = vadd.f32 %v7182_v39, %v4295_v38 }
 0xb24   :  { %4354 = vrot.lane.b32.xlu0 %v4315_v54, %s4590_s24 }
 0xb25   :  { %v4261_v43 = vpop.permute.xlu2 %4260 }
 0xb26   :  { %v4257_v37 = vpop.permute.xlu0 %4256 }
 0xb27   :  { %v4296_v3 = vadd.f32 %v4257_v37, %v4184_v0 }
 0xb29   :  { %v4316_v8 = vadd.f32 %v7182_v39, %v4296_v3 }
 0xb2b   :  { %4356 = vrot.lane.b32.xlu1 %v4316_v8, %s4590_s24 }
 0xb2d   :  { %v4259_v34 = vpop.permute.xlu1 %4258 }
 0xb2e   :  { %v4147_v18 = vpop.permute.xlu0 %4146  ;;  %v4151_v6 = vpop.permute.xlu2 %4150 }
 0xb2f   :  { %v4185_v49 = vadd.f32 %v4147_v18, %v7118_v45  ;;  %v4187_v13 = vadd.f32 %v4151_v6, %v7136_v60 }
 0xb31   :  { %v4297_v26 = vadd.f32 %v4259_v34, %v4185_v49 }
 0xb33   :  { %v4317_v57 = vadd.f32 %v7182_v39, %v4297_v26 }
 0xb35   :  { %4358 = vrot.lane.b32.xlu2 %v4317_v57, %s4590_s24 }
 0xb3d   :  { %v4149_v55 = vpop.permute.xlu1 %4148 }
 0xb3e   :  { %v4186_v47 = vadd.f32 %v4149_v55, %v7127_v58 }
 0xb3f   :  { %v4157_v52 = vpop.permute.xlu2 %4156 }
 0xb40   :  { %v4298_v11 = vadd.f32 %v4261_v43, %v4186_v47  ;;  %v4190_v51 = vadd.f32 %v4157_v52, %v7155_v2 }
 0xb42   :  { %v4318_v23 = vadd.f32 %v7182_v39, %v4298_v11 }
 0xb44   :  { %4360 = vrot.lane.b32.xlu0 %v4318_v23, %s4590_s24 }
 0xb46   :  { %v4263_v30 = vpop.permute.xlu0 %4262 }
 0xb47   :  { %v4299_v45 = vadd.f32 %v4263_v30, %v4187_v13  ;;  %v4267_v62 = vpop.permute.xlu2 %4266 }
 0xb49   :  { %v4319_v5 = vadd.f32 %v7182_v39, %v4299_v45 }
 0xb4b   :  { %4362 = vrot.lane.b32.xlu1 %v4319_v5, %s4590_s24 }
 0xb4d   :  { %v4265_v50 = vpop.permute.xlu1 %4264 }
 0xb4e   :  { %v4153_v19 = vpop.permute.xlu0 %4152 }
 0xb4f   :  { %v4188_v61 = vadd.f32 %v4153_v19, %v7145_v15  ;;  %v4341_v58 = vpop.permute.xlu2 %4340 }
 0xb50   :  { %4389 = vst.msk [vmem:[#allocation3] sm:$0xff] %vm4388_vm5, %v4341_v58 }
 0xb51   :  { %v4300_v21 = vadd.f32 %v4265_v50, %v4188_v61 }
 0xb53   :  { %v4320_v24 = vadd.f32 %v7182_v39, %v4300_v21 }
 0xb55   :  { %4364 = vrot.lane.b32.xlu2 %v4320_v24, %s4590_s24 }
 0xb5d   :  { %v4155_v60 = vpop.permute.xlu1 %4154 }
 0xb5e   :  { %v4189_v14 = vadd.f32 %v4155_v60, %v7161_v36  ;;  %v4347_v41 = vpop.permute.xlu2 %4346 }
 0xb5f   :  { %4392 = vst.msk [vmem:[#allocation3 + $0x18] sm:$0xff] %vm4388_vm5, %v4347_v41 }
 0xb60   :  { %v4301_v7 = vadd.f32 %v4267_v62, %v4189_v14  ;;  %v4159_v22 = vpop.permute.xlu0 %4158 }
 0xb61   :  { %v4191_v15 = vadd.f32 %v4159_v22, %v7166_v1 }
 0xb62   :  { %v4321_v4 = vadd.f32 %v7182_v39, %v4301_v7 }
 0xb64   :  { %4366 = vrot.lane.b32.xlu0 %v4321_v4, %s4590_s24 }
 0xb65   :  { %v4271_v9 = vpop.permute.xlu1 %4270 }
 0xb66   :  { %v4303_v10 = vadd.f32 %v4271_v9, %v4191_v15 }
 0xb68   :  { %v4323_v40 = vadd.f32 %v7182_v39, %v4303_v10  ;;  %v4269_v29 = vpop.permute.xlu0 %4268 }
 0xb69   :  { %v4302_v27 = vadd.f32 %v4269_v29, %v4190_v51 }
 0xb6a   :  { %4370 = vrot.lane.b32.xlu2 %v4323_v40, %s4590_s24 }
 0xb6b   :  { %v4322_v36 = vadd.f32 %v7182_v39, %v4302_v27 }
 0xb6d   :  { %4368 = vrot.lane.b32.xlu1 %v4322_v36, %s4590_s24  ;;  %v4345_v20 = vpop.permute.xlu1 %4344 }
 0xb6e   :  { %4391 = vst.msk [vmem:[#allocation3 + $0x10] sm:$0xff] %vm4388_vm5, %v4345_v20 }
 0xb6f   :  { %v4353_v1 = vpop.permute.xlu2 %4352 }
 0xb70   :  { %4395 = vst.msk [vmem:[#allocation3 + $0x30] sm:$0xff] %vm4388_vm5, %v4353_v1  ;;  %v4343_v31 = vpop.permute.xlu0 %4342 }
 0xb71   :  { %4390 = vst.msk [vmem:[#allocation3 + $0x8] sm:$0xff] %vm4388_vm5, %v4343_v31 }
 0xb7d   :  { %v4351_v2 = vpop.permute.xlu1 %4350 }
 0xb7e   :  { %4394 = vst.msk [vmem:[#allocation3 + $0x28] sm:$0xff] %vm4388_vm5, %v4351_v2 }
 0xb7f   :  { %v4349_v33 = vpop.permute.xlu0 %4348 }
 0xb80   :  { %4393 = vst.msk [vmem:[#allocation3 + $0x20] sm:$0xff] %vm4388_vm5, %v4349_v33 }
 0xb8f   :  { %v4359_v46 = vpop.permute.xlu2 %4358 }
 0xb90   :  { %4398 = vst.msk [vmem:[#allocation3 + $0x48] sm:$0xff] %vm4388_vm5, %v4359_v46 }
 0xb96   :  { %v4355_v39 = vpop.permute.xlu0 %4354 }
 0xb97   :  { %4396 = vst.msk [vmem:[#allocation3 + $0x38] sm:$0xff] %vm4388_vm5, %v4355_v39 }
 0xb9d   :  { %v4357_v16 = vpop.permute.xlu1 %4356 }
 0xb9e   :  { %4397 = vst.msk [vmem:[#allocation3 + $0x40] sm:$0xff] %vm4388_vm5, %v4357_v16 }
 0xbaf   :  { %v4365_v56 = vpop.permute.xlu2 %4364 }
 0xbb0   :  { %4401 = vst.msk [vmem:[#allocation3 + $0x60] sm:$0xff] %vm4388_vm5, %v4365_v56 }
 0xbb6   :  { %v4361_v32 = vpop.permute.xlu0 %4360 }
 0xbb7   :  { %4399 = vst.msk [vmem:[#allocation3 + $0x50] sm:$0xff] %vm4388_vm5, %v4361_v32 }
 0xbbd   :  { %v4363_v59 = vpop.permute.xlu1 %4362 }
 0xbbe   :  { %4400 = vst.msk [vmem:[#allocation3 + $0x58] sm:$0xff] %vm4388_vm5, %v4363_v59 }
 0xbc4   :  { %v4371_v63 = vpop.permute.xlu2 %4370 }
 0xbc5   :  { %4404 = vst.msk [vmem:[#allocation3 + $0x78] sm:$0xff] %vm4388_vm5, %v4371_v63 }
 0xbd6   :  { %v4367_v25 = vpop.permute.xlu0 %4366 }
 0xbd7   :  { %4402 = vst.msk [vmem:[#allocation3 + $0x68] sm:$0xff] %vm4388_vm5, %v4367_v25 }
 0xbdf   :  { %v4369_v42 = vpop.permute.xlu1 %4368 }
 0xbe0   :  { %4403 = vst.msk [vmem:[#allocation3 + $0x70] sm:$0xff] %vm4388_vm5, %v4369_v42 }
 0xbe1   :  { %4417 = dma.vmem_to_hbm [thread:$0]  %s4410_s26, 2048, %s4412_s0, [#allocation4], %s4592_s1, %s4592_s1, %s4589_s11  }
 0xbe2   :  { %4581 = dma.done.wait [#allocation4], 2048  }
 0xbe3   :  { %4582 = vsyncadd [#allocation4], 4294965248 }
 0xbe4   :  { %4422 = vsyncpa [#allocation4], 1 }

</bundles_post_ra>
